<compile_context>
chip_gen: v7x
topology: tpu7x:2x2x1
jax: 0.10.0
libtpu: 0.0.40
codegen_flags: <defaults>
</compile_context>

<pallas_src>
import functools

import jax
import jax.numpy as jnp
from jax import lax
from jax.experimental import pallas as pl
from jax.experimental.pallas import tpu as pltpu


# Safe on v5e/v6e (128 MiB physical) and v7x (64 MiB physical).
_VMEM_LIMIT = 48 * 1024 * 1024


# ----------------------------------------------------------------------------
# Kernel 1: conv1 block = (broadcast/concat of src & trg features) +
#           Conv2d(2*Hb -> C1, 3x3, pad=1) + BatchNorm(eval) + ReLU +
#           MaxPool2d(2, 2).  Grid = (batch, row-tiles).
# ----------------------------------------------------------------------------
def _conv1_kernel(xs_ref, xt_ref, ws_ref, wt_ref, scale_ref, shift_ref, o_ref,
                  t_mid_ref, pre_ref):
    # xs_ref: (1, TH, 3*Hb) bf16  src taps packed along channels (rows y-1,y,y+1)
    # xt_ref: (1, Tt, 3*Hb) bf16  trg taps packed along channels (cols x-1,x,x+1)
    # ws_ref: (3, 3*Hb, C1) bf16  [sum_dx W_src, W_src(dx=0), W_src(dx=2)]
    # wt_ref: (3, 3*Hb, C1) bf16  [sum_dy W_trg, W_trg(dy=0), W_trg(dy=2)]
    # t_mid_ref: (Tt, C1) f32 scratch -- trg contribution, computed once / batch
    # pre_ref  : (TH, Tt, C1) f32 scratch -- pre-activation tile
    th = xs_ref.shape[1]
    tt = xt_ref.shape[1]
    r = pl.program_id(1)
    nr = pl.num_programs(1)
    f32 = jnp.float32

    # Hoisted once per batch: the dominant (Tt, 3Hb) x (3Hb, C1) matmul.
    @pl.when(r == 0)
    def _():
        t_mid_ref[...] = jnp.dot(xt_ref[0], wt_ref[0],
                                 preferred_element_type=f32)

    xs = xs_ref[0]
    # src half of the conv: constant along the trg axis -> per-row vectors.
    s_mid = jnp.dot(xs, ws_ref[0], preferred_element_type=f32)   # (TH, C1)
    s_l = jnp.dot(xs, ws_ref[1], preferred_element_type=f32)     # col == 0
    s_r = jnp.dot(xs, ws_ref[2], preferred_element_type=f32)     # col == Tt-1

    pre_ref[...] = s_mid[:, None, :] + t_mid_ref[...][None, :, :]
    # Zero-padding edge corrections: tiny slice updates, no iota/select.
    pre_ref[:, 0:1, :] = pre_ref[:, 0:1, :] - s_l[:, None, :]
    pre_ref[:, tt - 1:tt, :] = pre_ref[:, tt - 1:tt, :] - s_r[:, None, :]

    # Row corrections only touch the first/last *global* row.
    @pl.when(r == 0)
    def _():
        t_t = jnp.dot(xt_ref[0], wt_ref[1], preferred_element_type=f32)
        pre_ref[0] = pre_ref[0] - t_t

    @pl.when(r == nr - 1)
    def _():
        t_b = jnp.dot(xt_ref[0], wt_ref[2], preferred_element_type=f32)
        pre_ref[th - 1] = pre_ref[th - 1] - t_b

    # BatchNorm (eval, fused with conv bias) + ReLU.
    act = jnp.maximum(pre_ref[...] * scale_ref[...] + shift_ref[...], 0.0)

    # MaxPool2d(2, 2) as pairwise maxima (VPU only).
    a5 = act.reshape(th // 2, 2, tt // 2, 2, -1)
    m = jnp.maximum(a5[:, 0], a5[:, 1])             # (TH//2, Tt//2, 2, C1)
    m = jnp.maximum(m[:, :, 0, :], m[:, :, 1, :])   # (TH//2, Tt//2, C1)
    o_ref[0] = m.astype(o_ref.dtype)


def _pack_taps(x):
    """(B, T, Hb) -> (B, T, 3*Hb): channel blocks are the zero-padded rows at
    t-1, t, t+1 (the three conv taps along that axis)."""
    _, t, _ = x.shape
    xp = jnp.pad(x, ((0, 0), (1, 1), (0, 0)))
    return jnp.concatenate([xp[:, 0:t], xp[:, 1:t + 1], xp[:, 2:t + 2]],
                           axis=-1)


def conv1_block(src_out, trg_out, w, scale, shift, *, row_tile=None):
    """Fused broadcast/concat + Conv(3x3,pad=1) + BN + ReLU + MaxPool(2,2).

    src_out: (B, Ts, Hb), trg_out: (B, Tt, Hb), w: (3, 3, 2*Hb, C1) (HWIO).
    Returns (B, Ts//2, Tt//2, C1) bf16 in NHWC layout.
    """
    B, Ts, Hb = src_out.shape
    Tt = trg_out.shape[1]
    C1 = w.shape[-1]
    TH = row_tile if row_tile is not None else min(Ts, 32)
    assert Ts % TH == 0 and TH % 2 == 0 and Tt % 2 == 0

    # bf16 MXU operands, f32 accumulation inside the kernel.
    xs = _pack_taps(src_out).astype(jnp.bfloat16)        # (B, Ts, 3*Hb)
    xt = _pack_taps(trg_out).astype(jnp.bfloat16)        # (B, Tt, 3*Hb)

    w_src, w_trg = w[:, :, :Hb, :], w[:, :, Hb:, :]
    # src half: the dx taps collapse (zero-pad corrections for first/last col).
    a_src = jnp.concatenate([w_src[dy].sum(axis=0) for dy in range(3)], axis=0)
    c_src_l = jnp.concatenate([w_src[dy, 0] for dy in range(3)], axis=0)
    c_src_r = jnp.concatenate([w_src[dy, 2] for dy in range(3)], axis=0)
    ws = jnp.stack([a_src, c_src_l, c_src_r], axis=0).astype(jnp.bfloat16)
    # trg half: the dy taps collapse (corrections for first/last row).
    a_trg = jnp.concatenate([w_trg[:, dx].sum(axis=0) for dx in range(3)],
                            axis=0)
    c_trg_t = jnp.concatenate([w_trg[0, dx] for dx in range(3)], axis=0)
    c_trg_b = jnp.concatenate([w_trg[2, dx] for dx in range(3)], axis=0)
    wt = jnp.stack([a_trg, c_trg_t, c_trg_b], axis=0).astype(jnp.bfloat16)

    return pl.pallas_call(
        _conv1_kernel,
        out_shape=jax.ShapeDtypeStruct((B, Ts // 2, Tt // 2, C1),
                                       jnp.bfloat16),
        grid=(B, Ts // TH),
        in_specs=[
            pl.BlockSpec((1, TH, 3 * Hb), lambda b, r: (b, r, 0)),
            pl.BlockSpec((1, Tt, 3 * Hb), lambda b, r: (b, 0, 0)),
            pl.BlockSpec((3, 3 * Hb, C1), lambda b, r: (0, 0, 0)),
            pl.BlockSpec((3, 3 * Hb, C1), lambda b, r: (0, 0, 0)),
            pl.BlockSpec((1, C1), lambda b, r: (0, 0)),
            pl.BlockSpec((1, C1), lambda b, r: (0, 0)),
        ],
        out_specs=pl.BlockSpec((1, TH // 2, Tt // 2, C1),
                               lambda b, r: (b, r, 0, 0)),
        scratch_shapes=[
            pltpu.VMEM((Tt, C1), jnp.float32),       # hoisted trg contribution
            pltpu.VMEM((TH, Tt, C1), jnp.float32),   # pre-activation tile
        ],
        compiler_params=pltpu.CompilerParams(
            # row axis carries the per-batch t_mid scratch -> "arbitrary".
            dimension_semantics=("parallel", "arbitrary"),
            vmem_limit_bytes=_VMEM_LIMIT),
    )(xs, xt, ws, wt, scale, shift)


# ----------------------------------------------------------------------------
# Kernel 2: conv2 block = Conv2d(3x3, pad=1) + BatchNorm(eval) + ReLU +
#           MaxPool2d(2, 2).  dx taps packed along channels (3 aligned
#           matmuls, K = 3*Cin), Cout tiled over a second parallel grid axis.
# ----------------------------------------------------------------------------
def _conv2_kernel(x_ref, w_ref, scale_ref, shift_ref, o_ref, *, H, W):
    # x_ref: (1, (H+2)*W, 3*Cin) bf16 -- padded rows, dx taps packed on channels
    # w_ref: (3, 3*Cin, tc) bf16      -- one (3*Cin, tc) slab per dy tap
    # o_ref: (1, H//2, W//2, tc)
    tc = w_ref.shape[-1]
    acc = jnp.zeros((H * W, tc), jnp.float32)
    for dy in range(3):
        # One contiguous, W-aligned (W % 8 == 0) sublane slice per dy tap.
        tap = x_ref[0, dy * W:dy * W + H * W, :]
        acc = acc + jnp.dot(tap, w_ref[dy],
                            preferred_element_type=jnp.float32)
    y = jnp.maximum(acc * scale_ref[...] + shift_ref[...], 0.0)
    y5 = y.reshape(H // 2, 2, W // 2, 2, tc)
    m = jnp.maximum(y5[:, 0], y5[:, 1])
    m = jnp.maximum(m[:, :, 0, :], m[:, :, 1, :])
    o_ref[0] = m.astype(o_ref.dtype)


def conv2_block(x, w, scale, shift, *, cout_tile=None):
    """Conv(3x3,pad=1) + BN + ReLU + MaxPool(2,2).  x: (B, H, W, Cin) NHWC."""
    # TODO(synk): row-tile with a 1-row halo (manual DMA) for very large H on
    # v7x; Cout tiling below already bounds the accumulator / weight blocks.
    B, H, W, Cin = x.shape
    Cout = w.shape[-1]
    assert H % 2 == 0 and W % 2 == 0 and W % 8 == 0
    if cout_tile is None:
        cout_tile = 128 if Cout % 128 == 0 else Cout
    tc = cout_tile
    assert Cout % tc == 0

    xp = jnp.pad(x.astype(jnp.bfloat16), ((0, 0), (1, 1), (1, 1), (0, 0)))
    # Pack the three dx taps along channels -> (B, H+2, W, 3*Cin), flatten rows.
    xpk = jnp.concatenate(
        [xp[:, :, 0:W], xp[:, :, 1:W + 1], xp[:, :, 2:W + 2]], axis=-1)
    xf = xpk.reshape(B, (H + 2) * W, 3 * Cin)
    # Weights: (3, 3, Cin, Cout) -> (3, 3*Cin, Cout), dx concatenated on K.
    wpk = jnp.concatenate([w[:, dx] for dx in range(3)],
                          axis=1).astype(jnp.bfloat16)

    kernel = functools.partial(_conv2_kernel, H=H, W=W)
    return pl.pallas_call(
        kernel,
        out_shape=jax.ShapeDtypeStruct((B, H // 2, W // 2, Cout),
                                       jnp.bfloat16),
        grid=(B, Cout // tc),
        in_specs=[
            pl.BlockSpec((1, (H + 2) * W, 3 * Cin), lambda b, c: (b, 0, 0)),
            pl.BlockSpec((3, 3 * Cin, tc), lambda b, c: (0, 0, c)),
            pl.BlockSpec((1, tc), lambda b, c: (0, c)),
            pl.BlockSpec((1, tc), lambda b, c: (0, c)),
        ],
        out_specs=pl.BlockSpec((1, H // 2, W // 2, tc),
                               lambda b, c: (b, 0, 0, c)),
        compiler_params=pltpu.CompilerParams(
            dimension_semantics=("parallel", "parallel"),
            vmem_limit_bytes=_VMEM_LIMIT),
    )(xf, wpk, scale, shift)


# ----------------------------------------------------------------------------
# Kernel 3: classifier  Linear -> ReLU -> Linear -> ReLU -> Linear -> sigmoid
# with the F (feature) reduction tiled over the grid.  w1 is streamed
# unpadded (F, 20) bf16; the tiny hidden layers stay f32.
# ----------------------------------------------------------------------------
def _mlp_kernel(x_ref, w1_ref, b1_ref, w2_ref, b2_ref, w3_ref, b3_ref,
                o_ref, acc_ref):
    k = pl.program_id(0)

    @pl.when(k == 0)
    def _():
        acc_ref[...] = jnp.zeros_like(acc_ref)

    acc_ref[...] += jnp.dot(x_ref[...], w1_ref[...],
                            preferred_element_type=jnp.float32)

    @pl.when(k == pl.num_programs(0) - 1)
    def _():
        h = jnp.maximum(acc_ref[...] + b1_ref[...], 0.0)
        h = jnp.maximum(jnp.dot(h, w2_ref[...],
                                preferred_element_type=jnp.float32)
                        + b2_ref[...], 0.0)
        z = jnp.dot(h, w3_ref[...],
                    preferred_element_type=jnp.float32) + b3_ref[...]
        # numerically stable sigmoid
        o_ref[...] = (0.5 * (jnp.tanh(0.5 * z) + 1.0)).astype(o_ref.dtype)


def classifier(x, w1, b1, w2, b2, w3, b3, *, max_f_tile=8192):
    B, F = x.shape
    Hc = w1.shape[1]                     # 20 in the reference module
    assert w3.shape[1] == 1

    x = x.astype(jnp.bfloat16)
    w1 = w1.astype(jnp.bfloat16)         # streamed unpadded: (F, Hc)

    if F <= max_f_tile:
        f_tile, Fp = F, F
    else:
        # max_f_tile is a multiple of 128; zero-pad F up instead of ever
        # loading a whole-F weight block.
        assert max_f_tile % 128 == 0
        f_tile = max_f_tile
        Fp = ((F + f_tile - 1) // f_tile) * f_tile
        if Fp != F:
            x = jnp.pad(x, ((0, 0), (0, Fp - F)))
            w1 = jnp.pad(w1, ((0, Fp - F), (0, 0)))

    out = pl.pallas_call(
        _mlp_kernel,
        out_shape=jax.ShapeDtypeStruct((B, 1), jnp.float32),
        grid=(Fp // f_tile,),
        in_specs=[
            pl.BlockSpec((B, f_tile), lambda k: (0, k)),
            pl.BlockSpec((f_tile, Hc), lambda k: (k, 0)),
            pl.BlockSpec((1, Hc), lambda k: (0, 0)),
            pl.BlockSpec((Hc, Hc), lambda k: (0, 0)),
            pl.BlockSpec((1, Hc), lambda k: (0, 0)),
            pl.BlockSpec((Hc, 1), lambda k: (0, 0)),
            pl.BlockSpec((1, 1), lambda k: (0, 0)),
        ],
        out_specs=pl.BlockSpec((B, 1), lambda k: (0, 0)),
        scratch_shapes=[pltpu.VMEM((B, Hc), jnp.float32)],
        compiler_params=pltpu.CompilerParams(
            dimension_semantics=("arbitrary",)),
    )(x, w1, b1, w2, b2, w3, b3)
    return out


# ----------------------------------------------------------------------------
# Parameter construction (deterministic, mirrors the module's __init__ shapes)
# ----------------------------------------------------------------------------
def _kaiming_uniform(key, shape, fan_in):
    bound = jnp.sqrt(6.0 / fan_in)
    return jax.random.uniform(key, shape, jnp.float32, -bound, bound)


def make_params(key, *, vocab, hidden, c1, c2, feat_dim, cls_hidden=20):
    ks = jax.random.split(key, 16)
    p = {}
    # BERT stand-in embeddings.
    p["emb_src"] = jax.random.normal(ks[0], (vocab, hidden), jnp.float32)
    p["emb_trg"] = jax.random.normal(ks[1], (vocab, hidden), jnp.float32)

    def bn(kg, kb, km, kv, c):
        return (1.0 + 0.1 * jax.random.normal(kg, (c,), jnp.float32),
                0.1 * jax.random.normal(kb, (c,), jnp.float32),
                0.1 * jax.random.normal(km, (c,), jnp.float32),
                jax.random.uniform(kv, (c,), jnp.float32, 0.5, 1.5))

    cin1 = 2 * hidden
    p["w_c1"] = _kaiming_uniform(ks[2], (3, 3, cin1, c1), cin1 * 9)
    p["b_c1"] = jnp.zeros((c1,), jnp.float32)
    p["g1"], p["be1"], p["mu1"], p["var1"] = bn(ks[3], ks[4], ks[5], ks[6], c1)

    p["w_c2"] = _kaiming_uniform(ks[7], (3, 3, c1, c2), c1 * 9)
    p["b_c2"] = jnp.zeros((c2,), jnp.float32)
    p["g2"], p["be2"], p["mu2"], p["var2"] = bn(ks[8], ks[9], ks[10], ks[11],
                                                c2)

    p["w1"] = _kaiming_uniform(ks[12], (feat_dim, cls_hidden), feat_dim)
    p["b1"] = jnp.zeros((1, cls_hidden), jnp.float32)
    p["w2"] = _kaiming_uniform(ks[13], (cls_hidden, cls_hidden), cls_hidden)
    p["b2"] = jnp.zeros((1, cls_hidden), jnp.float32)
    p["w3"] = _kaiming_uniform(ks[14], (cls_hidden, 1), cls_hidden)
    p["b3"] = jnp.zeros((1, 1), jnp.float32)
    return p


def _bn_scale_shift(gamma, beta, mean, var, conv_bias, eps=1e-5):
    scale = gamma / jnp.sqrt(var + eps)
    shift = (conv_bias - mean) * scale + beta
    return scale.reshape(1, -1), shift.reshape(1, -1)


# ----------------------------------------------------------------------------
# Forward pass (matches Discriminator_cnn_bert.forward semantics)
# ----------------------------------------------------------------------------
def discriminator_forward(src_ids, trg_ids, params, *, row_tile=None,
                          max_f_tile=8192):
    # "BERT" outputs (B, T, hidden).
    src_out = params["emb_src"][src_ids]
    trg_out = params["emb_trg"][trg_ids]
    B = src_out.shape[0]
    s1, sh1 = _bn_scale_shift(params["g1"], params["be1"], params["mu1"],
                              params["var1"], params["b_c1"])
    s2, sh2 = _bn_scale_shift(params["g2"], params["be2"], params["mu2"],
                              params["var2"], params["b_c2"])
    # conv1: the torch.stack/cat broadcast tensor is built inside the kernel.
    h = conv1_block(src_out, trg_out, params["w_c1"], s1, sh1,
                    row_tile=row_tile)
    h = conv2_block(h, params["w_c2"], s2, sh2)
    # permute(0,2,3,1).view(B,-1) of the NCHW reference == flatten of NHWC.
    flat = h.reshape(B, -1)
    # Dropout layers are identity at inference time.
    return classifier(flat, params["w1"], params["b1"], params["w2"],
                      params["b2"], params["w3"], params["b3"],
                      max_f_tile=max_f_tile)


# ----------------------------------------------------------------------------
# Pure-JAX (XLA) reference used for an in-script correctness check.
# ----------------------------------------------------------------------------
def _reference_forward(src_ids, trg_ids, params, eps=1e-5):
    src_out = params["emb_src"][src_ids]
    trg_out = params["emb_trg"][trg_ids]
    B, Ts, Hb = src_out.shape
    Tt = trg_out.shape[1]
    src_b = jnp.broadcast_to(src_out[:, :, None, :], (B, Ts, Tt, Hb))
    trg_b = jnp.broadcast_to(trg_out[:, None, :, :], (B, Ts, Tt, Hb))
    feat = jnp.concatenate([src_b, trg_b], axis=-1)

    def block(x, w, bias, gamma, beta, mean, var):
        y = lax.conv_general_dilated(
            x.astype(jnp.bfloat16), w.astype(jnp.bfloat16),
            window_strides=(1, 1), padding=((1, 1), (1, 1)),
            dimension_numbers=("NHWC", "HWIO", "NHWC"),
            preferred_element_type=jnp.float32)
        y = gamma * (y + bias - mean) / jnp.sqrt(var + eps) + beta
        y = jnp.maximum(y, 0.0)
        b, h, w2, c = y.shape
        return y.reshape(b, h // 2, 2, w2 // 2, 2, c).max(axis=(2, 4))

    h1 = block(feat, params["w_c1"], params["b_c1"], params["g1"],
               params["be1"], params["mu1"], params["var1"]).astype(
                   jnp.bfloat16)
    h2 = block(h1, params["w_c2"], params["b_c2"], params["g2"],
               params["be2"], params["mu2"], params["var2"]).astype(
                   jnp.bfloat16)
    flat = h2.reshape(B, -1)
    h = jnp.maximum(jnp.dot(flat, params["w1"].astype(jnp.bfloat16),
                            preferred_element_type=jnp.float32)
                    + params["b1"], 0.0)
    h = jnp.maximum(jnp.dot(h, params["w2"],
                            preferred_element_type=jnp.float32)
                    + params["b2"], 0.0)
    z = jnp.dot(h, params["w3"],
                preferred_element_type=jnp.float32) + params["b3"]
    return jax.nn.sigmoid(z), h1


if __name__ == "__main__":
    key = jax.random.PRNGKey(0)
    B, Ts, Tt = 2, 16, 16          # small stand-ins (reference assumes 128)
    HIDDEN = 32                    # stand-in for bert hidden size (768)
    C1, C2 = 512, 256              # conv channel counts from the module
    VOCAB = 100
    feat_dim = C2 * (Ts // 4) * (Tt // 4)   # 256 * 4 * 4 = 4096

    k_ids, k_params = jax.random.split(key)
    k_src, k_trg = jax.random.split(k_ids)
    src_sentence = jax.random.randint(k_src, (B, Ts), 0, VOCAB, jnp.int32)
    trg_sentence = jax.random.randint(k_trg, (B, Tt), 0, VOCAB, jnp.int32)

    params = make_params(k_params, vocab=VOCAB, hidden=HIDDEN,
                         c1=C1, c2=C2, feat_dim=feat_dim)

    # row_tile=8 exercises the multi-row-tile path (hoisted trg matmul +
    # first/last-row corrections) even at these small test shapes.
    out = discriminator_forward(src_sentence, trg_sentence, params,
                                row_tile=8)
    out = jax.block_until_ready(out)
    assert out.shape == (B, 1), out.shape
    assert bool(jnp.all(jnp.isfinite(out)))

    # Correctness check against the pure-JAX reference (bf16 conv path).
    ref_out, ref_h1 = _reference_forward(src_sentence, trg_sentence, params)
    src_out = params["emb_src"][src_sentence]
    trg_out = params["emb_trg"][trg_sentence]
    s1, sh1 = _bn_scale_shift(params["g1"], params["be1"], params["mu1"],
                              params["var1"], params["b_c1"])
    h1 = conv1_block(src_out, trg_out, params["w_c1"], s1, sh1, row_tile=8)
    conv1_err = float(jnp.max(jnp.abs(h1.astype(jnp.float32)
                                      - ref_h1.astype(jnp.float32))))
    assert conv1_err < 2e-1, f"conv1 mismatch: {conv1_err}"
    out_err = float(jnp.max(jnp.abs(out - ref_out)))
    assert out_err < 1e-1, f"output mismatch: {out_err}"
    print("KERNEL_OK")
</pallas_src>

<mosaic_0001>
module attributes {stable_mosaic.version = 11 : i64} {
  func.func @_conv1_kernel(%arg0: i32, %arg1: i32, %arg2: memref<1x8x96xbf16, #tpu.memory_space<vmem>>, %arg3: memref<1x16x96xbf16, #tpu.memory_space<vmem>>, %arg4: memref<3x96x512xbf16, #tpu.memory_space<vmem>>, %arg5: memref<3x96x512xbf16, #tpu.memory_space<vmem>>, %arg6: memref<1x512xf32, #tpu.memory_space<vmem>>, %arg7: memref<1x512xf32, #tpu.memory_space<vmem>>, %arg8: memref<1x4x8x512xbf16, #tpu.memory_space<vmem>>, %arg9: memref<16x512xf32, #tpu.memory_space<vmem>>, %arg10: memref<8x16x512xf32, #tpu.memory_space<vmem>>) attributes {dimension_semantics = [#tpu.dimension_semantics<parallel>, #tpu.dimension_semantics<arbitrary>], iteration_bounds = array<i64: 2, 2>, scalar_prefetch = 0 : i64, scratch_operands = 2 : i64, tpu.core_type = #tpu.core_type<tc>, window_params = [{transform_indices = @transform_0, window_bounds = array<i64: 1, 8, 96>}, {transform_indices = @transform_1, window_bounds = array<i64: 1, 16, 96>}, {pipeline_mode = #tpu.pipeline_mode<synchronous>, transform_indices = @transform_2, window_bounds = array<i64: 3, 96, 512>}, {pipeline_mode = #tpu.pipeline_mode<synchronous>, transform_indices = @transform_3, window_bounds = array<i64: 3, 96, 512>}, {pipeline_mode = #tpu.pipeline_mode<synchronous>, transform_indices = @transform_4, window_bounds = array<i64: 1, 512>}, {pipeline_mode = #tpu.pipeline_mode<synchronous>, transform_indices = @transform_5, window_bounds = array<i64: 1, 512>}, {transform_indices = @transform_6, window_bounds = array<i64: 1, 4, 8, 512>}]} {
    %c0_i32 = arith.constant 0 : i32
    %0 = arith.cmpi eq, %arg1, %c0_i32 : i32
    %1 = arith.extui %0 : i1 to i32
    %c0_i32_0 = arith.constant 0 : i32
    %2 = arith.cmpi ne, %1, %c0_i32_0 : i32
    scf.if %2 {
      %c0_43 = arith.constant 0 : index
      %c0_44 = arith.constant 0 : index
      %c0_45 = arith.constant 0 : index
      %61 = vector.load %arg3[%c0_43, %c0_44, %c0_45] : memref<1x16x96xbf16, #tpu.memory_space<vmem>>, vector<1x16x96xbf16>
      %62 = vector.shape_cast %61 : vector<1x16x96xbf16> to vector<16x96xbf16>
      %c0_46 = arith.constant 0 : index
      %c0_47 = arith.constant 0 : index
      %c0_48 = arith.constant 0 : index
      %63 = vector.load %arg5[%c0_46, %c0_47, %c0_48] : memref<3x96x512xbf16, #tpu.memory_space<vmem>>, vector<1x96x512xbf16>
      %64 = vector.shape_cast %63 : vector<1x96x512xbf16> to vector<96x512xbf16>
      %cst_49 = arith.constant dense<0.000000e+00> : vector<16x512xf32>
      %65 = tpu.matmul %62, %64, %cst_49 {dimension_numbers = #tpu.dot_dimension_numbers<[1], [0], [0], [1], [0, 0, 1, 1], [], []>} : vector<16x96xbf16>, vector<96x512xbf16>, vector<16x512xf32> -> vector<16x512xf32>
      %c0_50 = arith.constant 0 : index
      %c0_51 = arith.constant 0 : index
      %66 = vector.load %arg9[%c0_50, %c0_51] : memref<16x512xf32, #tpu.memory_space<vmem>>, vector<16x512xf32>
      tpu.vector_store %arg9[%c0_50, %c0_51], %65 {strides = array<i32>} : memref<16x512xf32, #tpu.memory_space<vmem>>, vector<16x512xf32>,
    } else {
    }
    %c0 = arith.constant 0 : index
    %c0_1 = arith.constant 0 : index
    %c0_2 = arith.constant 0 : index
    %3 = vector.load %arg2[%c0, %c0_1, %c0_2] : memref<1x8x96xbf16, #tpu.memory_space<vmem>>, vector<1x8x96xbf16>
    %4 = vector.shape_cast %3 : vector<1x8x96xbf16> to vector<8x96xbf16>
    %c0_3 = arith.constant 0 : index
    %c0_4 = arith.constant 0 : index
    %c0_5 = arith.constant 0 : index
    %5 = vector.load %arg4[%c0_3, %c0_4, %c0_5] : memref<3x96x512xbf16, #tpu.memory_space<vmem>>, vector<1x96x512xbf16>
    %6 = vector.shape_cast %5 : vector<1x96x512xbf16> to vector<96x512xbf16>
    %cst = arith.constant dense<0.000000e+00> : vector<8x512xf32>
    %7 = tpu.matmul %4, %6, %cst {dimension_numbers = #tpu.dot_dimension_numbers<[1], [0], [0], [1], [0, 0, 1, 1], [], []>} : vector<8x96xbf16>, vector<96x512xbf16>, vector<8x512xf32> -> vector<8x512xf32>
    %c1 = arith.constant 1 : index
    %c0_6 = arith.constant 0 : index
    %c0_7 = arith.constant 0 : index
    %8 = vector.load %arg4[%c1, %c0_6, %c0_7] : memref<3x96x512xbf16, #tpu.memory_space<vmem>>, vector<1x96x512xbf16>
    %9 = vector.shape_cast %8 : vector<1x96x512xbf16> to vector<96x512xbf16>
    %cst_8 = arith.constant dense<0.000000e+00> : vector<8x512xf32>
    %10 = tpu.matmul %4, %9, %cst_8 {dimension_numbers = #tpu.dot_dimension_numbers<[1], [0], [0], [1], [0, 0, 1, 1], [], []>} : vector<8x96xbf16>, vector<96x512xbf16>, vector<8x512xf32> -> vector<8x512xf32>
    %c2 = arith.constant 2 : index
    %c0_9 = arith.constant 0 : index
    %c0_10 = arith.constant 0 : index
    %11 = vector.load %arg4[%c2, %c0_9, %c0_10] : memref<3x96x512xbf16, #tpu.memory_space<vmem>>, vector<1x96x512xbf16>
    %12 = vector.shape_cast %11 : vector<1x96x512xbf16> to vector<96x512xbf16>
    %cst_11 = arith.constant dense<0.000000e+00> : vector<8x512xf32>
    %13 = tpu.matmul %4, %12, %cst_11 {dimension_numbers = #tpu.dot_dimension_numbers<[1], [0], [0], [1], [0, 0, 1, 1], [], []>} : vector<8x96xbf16>, vector<96x512xbf16>, vector<8x512xf32> -> vector<8x512xf32>
    %14 = vector.shape_cast %7 : vector<8x512xf32> to vector<8x1x512xf32>
    %c0_12 = arith.constant 0 : index
    %c0_13 = arith.constant 0 : index
    %15 = vector.load %arg9[%c0_12, %c0_13] : memref<16x512xf32, #tpu.memory_space<vmem>>, vector<16x512xf32>
    %16 = vector.shape_cast %15 : vector<16x512xf32> to vector<1x16x512xf32>
    %17 = vector.broadcast %14 : vector<8x1x512xf32> to vector<8x16x512xf32>
    %18 = vector.broadcast %16 : vector<1x16x512xf32> to vector<8x16x512xf32>
    %19 = arith.addf %17, %18 : vector<8x16x512xf32>
    %c0_14 = arith.constant 0 : index
    %c0_15 = arith.constant 0 : index
    %c0_16 = arith.constant 0 : index
    %20 = vector.load %arg10[%c0_14, %c0_15, %c0_16] : memref<8x16x512xf32, #tpu.memory_space<vmem>>, vector<8x16x512xf32>
    tpu.vector_store %arg10[%c0_14, %c0_15, %c0_16], %19 {strides = array<i32>} : memref<8x16x512xf32, #tpu.memory_space<vmem>>, vector<8x16x512xf32>,
    %c0_17 = arith.constant 0 : index
    %c0_18 = arith.constant 0 : index
    %c0_19 = arith.constant 0 : index
    %21 = vector.load %arg10[%c0_17, %c0_18, %c0_19] : memref<8x16x512xf32, #tpu.memory_space<vmem>>, vector<8x1x512xf32>
    %22 = vector.shape_cast %10 : vector<8x512xf32> to vector<8x1x512xf32>
    %23 = arith.subf %21, %22 : vector<8x1x512xf32>
    %c0_20 = arith.constant 0 : index
    %c0_21 = arith.constant 0 : index
    %c0_22 = arith.constant 0 : index
    %24 = vector.load %arg10[%c0_20, %c0_21, %c0_22] : memref<8x16x512xf32, #tpu.memory_space<vmem>>, vector<8x1x512xf32>
    tpu.vector_store %arg10[%c0_20, %c0_21, %c0_22], %23 {strides = array<i32>} : memref<8x16x512xf32, #tpu.memory_space<vmem>>, vector<8x1x512xf32>,
    %c0_23 = arith.constant 0 : index
    %c15 = arith.constant 15 : index
    %c0_24 = arith.constant 0 : index
    %25 = vector.load %arg10[%c0_23, %c15, %c0_24] : memref<8x16x512xf32, #tpu.memory_space<vmem>>, vector<8x1x512xf32>
    %26 = vector.shape_cast %13 : vector<8x512xf32> to vector<8x1x512xf32>
    %27 = arith.subf %25, %26 : vector<8x1x512xf32>
    %c0_25 = arith.constant 0 : index
    %c15_26 = arith.constant 15 : index
    %c0_27 = arith.constant 0 : index
    %28 = vector.load %arg10[%c0_25, %c15_26, %c0_27] : memref<8x16x512xf32, #tpu.memory_space<vmem>>, vector<8x1x512xf32>
    tpu.vector_store %arg10[%c0_25, %c15_26, %c0_27], %27 {strides = array<i32>} : memref<8x16x512xf32, #tpu.memory_space<vmem>>, vector<8x1x512xf32>,
    %c0_i32_28 = arith.constant 0 : i32
    %29 = arith.cmpi eq, %arg1, %c0_i32_28 : i32
    %30 = arith.extui %29 : i1 to i32
    %c0_i32_29 = arith.constant 0 : i32
    %31 = arith.cmpi ne, %30, %c0_i32_29 : i32
    scf.if %31 {
      %c0_43 = arith.constant 0 : index
      %c0_44 = arith.constant 0 : index
      %c0_45 = arith.constant 0 : index
      %61 = vector.load %arg3[%c0_43, %c0_44, %c0_45] : memref<1x16x96xbf16, #tpu.memory_space<vmem>>, vector<1x16x96xbf16>
      %62 = vector.shape_cast %61 : vector<1x16x96xbf16> to vector<16x96xbf16>
      %c1_46 = arith.constant 1 : index
      %c0_47 = arith.constant 0 : index
      %c0_48 = arith.constant 0 : index
      %63 = vector.load %arg5[%c1_46, %c0_47, %c0_48] : memref<3x96x512xbf16, #tpu.memory_space<vmem>>, vector<1x96x512xbf16>
      %64 = vector.shape_cast %63 : vector<1x96x512xbf16> to vector<96x512xbf16>
      %cst_49 = arith.constant dense<0.000000e+00> : vector<16x512xf32>
      %65 = tpu.matmul %62, %64, %cst_49 {dimension_numbers = #tpu.dot_dimension_numbers<[1], [0], [0], [1], [0, 0, 1, 1], [], []>} : vector<16x96xbf16>, vector<96x512xbf16>, vector<16x512xf32> -> vector<16x512xf32>
      %c0_50 = arith.constant 0 : index
      %c0_51 = arith.constant 0 : index
      %c0_52 = arith.constant 0 : index
      %66 = vector.load %arg10[%c0_50, %c0_51, %c0_52] : memref<8x16x512xf32, #tpu.memory_space<vmem>>, vector<1x16x512xf32>
      %67 = vector.shape_cast %66 : vector<1x16x512xf32> to vector<16x512xf32>
      %68 = arith.subf %67, %65 : vector<16x512xf32>
      %c0_53 = arith.constant 0 : index
      %c0_54 = arith.constant 0 : index
      %c0_55 = arith.constant 0 : index
      %69 = vector.load %arg10[%c0_53, %c0_54, %c0_55] : memref<8x16x512xf32, #tpu.memory_space<vmem>>, vector<1x16x512xf32>
      %70 = vector.shape_cast %69 : vector<1x16x512xf32> to vector<16x512xf32>
      %71 = vector.shape_cast %68 : vector<16x512xf32> to vector<1x16x512xf32>
      tpu.vector_store %arg10[%c0_53, %c0_54, %c0_55], %71 {strides = array<i32>} : memref<8x16x512xf32, #tpu.memory_space<vmem>>, vector<1x16x512xf32>,
    } else {
    }
    %c1_i32 = arith.constant 1 : i32
    %32 = arith.cmpi eq, %arg1, %c1_i32 : i32
    %33 = arith.extui %32 : i1 to i32
    %c0_i32_30 = arith.constant 0 : i32
    %34 = arith.cmpi ne, %33, %c0_i32_30 : i32
    scf.if %34 {
      %c0_43 = arith.constant 0 : index
      %c0_44 = arith.constant 0 : index
      %c0_45 = arith.constant 0 : index
      %61 = vector.load %arg3[%c0_43, %c0_44, %c0_45] : memref<1x16x96xbf16, #tpu.memory_space<vmem>>, vector<1x16x96xbf16>
      %62 = vector.shape_cast %61 : vector<1x16x96xbf16> to vector<16x96xbf16>
      %c2_46 = arith.constant 2 : index
      %c0_47 = arith.constant 0 : index
      %c0_48 = arith.constant 0 : index
      %63 = vector.load %arg5[%c2_46, %c0_47, %c0_48] : memref<3x96x512xbf16, #tpu.memory_space<vmem>>, vector<1x96x512xbf16>
      %64 = vector.shape_cast %63 : vector<1x96x512xbf16> to vector<96x512xbf16>
      %cst_49 = arith.constant dense<0.000000e+00> : vector<16x512xf32>
      %65 = tpu.matmul %62, %64, %cst_49 {dimension_numbers = #tpu.dot_dimension_numbers<[1], [0], [0], [1], [0, 0, 1, 1], [], []>} : vector<16x96xbf16>, vector<96x512xbf16>, vector<16x512xf32> -> vector<16x512xf32>
      %c7 = arith.constant 7 : index
      %c0_50 = arith.constant 0 : index
      %c0_51 = arith.constant 0 : index
      %66 = vector.load %arg10[%c7, %c0_50, %c0_51] : memref<8x16x512xf32, #tpu.memory_space<vmem>>, vector<1x16x512xf32>
      %67 = vector.shape_cast %66 : vector<1x16x512xf32> to vector<16x512xf32>
      %68 = arith.subf %67, %65 : vector<16x512xf32>
      %c7_52 = arith.constant 7 : index
      %c0_53 = arith.constant 0 : index
      %c0_54 = arith.constant 0 : index
      %69 = vector.load %arg10[%c7_52, %c0_53, %c0_54] : memref<8x16x512xf32, #tpu.memory_space<vmem>>, vector<1x16x512xf32>
      %70 = vector.shape_cast %69 : vector<1x16x512xf32> to vector<16x512xf32>
      %71 = vector.shape_cast %68 : vector<16x512xf32> to vector<1x16x512xf32>
      tpu.vector_store %arg10[%c7_52, %c0_53, %c0_54], %71 {strides = array<i32>} : memref<8x16x512xf32, #tpu.memory_space<vmem>>, vector<1x16x512xf32>,
    } else {
    }
    %c0_31 = arith.constant 0 : index
    %c0_32 = arith.constant 0 : index
    %c0_33 = arith.constant 0 : index
    %35 = vector.load %arg10[%c0_31, %c0_32, %c0_33] : memref<8x16x512xf32, #tpu.memory_space<vmem>>, vector<8x16x512xf32>
    %c0_34 = arith.constant 0 : index
    %c0_35 = arith.constant 0 : index
    %36 = vector.load %arg6[%c0_34, %c0_35] : memref<1x512xf32, #tpu.memory_space<vmem>>, vector<1x512xf32>
    %37 = vector.shape_cast %36 : vector<1x512xf32> to vector<1x1x512xf32>
    %38 = vector.broadcast %37 : vector<1x1x512xf32> to vector<8x16x512xf32>
    %39 = arith.mulf %35, %38 : vector<8x16x512xf32>
    %c0_36 = arith.constant 0 : index
    %c0_37 = arith.constant 0 : index
    %40 = vector.load %arg7[%c0_36, %c0_37] : memref<1x512xf32, #tpu.memory_space<vmem>>, vector<1x512xf32>
    %41 = vector.shape_cast %40 : vector<1x512xf32> to vector<1x1x512xf32>
    %42 = vector.broadcast %41 : vector<1x1x512xf32> to vector<8x16x512xf32>
    %43 = arith.addf %39, %42 : vector<8x16x512xf32>
    %cst_38 = arith.constant 0.000000e+00 : f32
    %44 = vector.broadcast %cst_38 : f32 to vector<8x16x512xf32>
    %45 = arith.maximumf %43, %44 : vector<8x16x512xf32>
    %46 = vector.shape_cast %45 : vector<8x16x512xf32> to vector<4x2x8x2x512xf32>
    %47 = vector.extract_strided_slice %46 {offsets = [0, 0, 0, 0, 0], sizes = [4, 1, 8, 2, 512], strides = [1, 1, 1, 1, 1]} : vector<4x2x8x2x512xf32> to vector<4x1x8x2x512xf32>
    %48 = vector.shape_cast %47 : vector<4x1x8x2x512xf32> to vector<4x8x2x512xf32>
    %49 = vector.extract_strided_slice %46 {offsets = [0, 1, 0, 0, 0], sizes = [4, 1, 8, 2, 512], strides = [1, 1, 1, 1, 1]} : vector<4x2x8x2x512xf32> to vector<4x1x8x2x512xf32>
    %50 = vector.shape_cast %49 : vector<4x1x8x2x512xf32> to vector<4x8x2x512xf32>
    %51 = arith.maximumf %48, %50 : vector<4x8x2x512xf32>
    %52 = vector.extract_strided_slice %51 {offsets = [0, 0, 0, 0], sizes = [4, 8, 1, 512], strides = [1, 1, 1, 1]} : vector<4x8x2x512xf32> to vector<4x8x1x512xf32>
    %53 = vector.shape_cast %52 : vector<4x8x1x512xf32> to vector<4x8x512xf32>
    %54 = vector.extract_strided_slice %51 {offsets = [0, 0, 1, 0], sizes = [4, 8, 1, 512], strides = [1, 1, 1, 1]} : vector<4x8x2x512xf32> to vector<4x8x1x512xf32>
    %55 = vector.shape_cast %54 : vector<4x8x1x512xf32> to vector<4x8x512xf32>
    %56 = arith.maximumf %53, %55 : vector<4x8x512xf32>
    %57 = arith.truncf %56 : vector<4x8x512xf32> to vector<4x8x512xbf16>
    %c0_39 = arith.constant 0 : index
    %c0_40 = arith.constant 0 : index
    %c0_41 = arith.constant 0 : index
    %c0_42 = arith.constant 0 : index
    %58 = vector.load %arg8[%c0_39, %c0_40, %c0_41, %c0_42] : memref<1x4x8x512xbf16, #tpu.memory_space<vmem>>, vector<1x4x8x512xbf16>
    %59 = vector.shape_cast %58 : vector<1x4x8x512xbf16> to vector<4x8x512xbf16>
    %60 = vector.shape_cast %57 : vector<4x8x512xbf16> to vector<1x4x8x512xbf16>
    tpu.vector_store %arg8[%c0_39, %c0_40, %c0_41, %c0_42], %60 {strides = array<i32>} : memref<1x4x8x512xbf16, #tpu.memory_space<vmem>>, vector<1x4x8x512xbf16>,
    return
  }
  func.func @transform_0(%arg0: i32, %arg1: i32) -> (i32, i32, i32) {
    %c0_i32 = arith.constant 0 : i32
    %c0_i32_0 = arith.constant 0 : i32
    return %arg0, %arg1, %c0_i32 : i32, i32, i32
  }
  func.func @transform_1(%arg0: i32, %arg1: i32) -> (i32, i32, i32) {
    %c0_i32 = arith.constant 0 : i32
    %c0_i32_0 = arith.constant 0 : i32
    %c0_i32_1 = arith.constant 0 : i32
    return %arg0, %c0_i32, %c0_i32_0 : i32, i32, i32
  }
  func.func @transform_2(%arg0: i32, %arg1: i32) -> (i32, i32, i32) {
    %c0_i32 = arith.constant 0 : i32
    %c0_i32_0 = arith.constant 0 : i32
    %c0_i32_1 = arith.constant 0 : i32
    %c0_i32_2 = arith.constant 0 : i32
    return %c0_i32, %c0_i32_0, %c0_i32_1 : i32, i32, i32
  }
  func.func @transform_3(%arg0: i32, %arg1: i32) -> (i32, i32, i32) {
    %c0_i32 = arith.constant 0 : i32
    %c0_i32_0 = arith.constant 0 : i32
    %c0_i32_1 = arith.constant 0 : i32
    %c0_i32_2 = arith.constant 0 : i32
    return %c0_i32, %c0_i32_0, %c0_i32_1 : i32, i32, i32
  }
  func.func @transform_4(%arg0: i32, %arg1: i32) -> (i32, i32) {
    %c0_i32 = arith.constant 0 : i32
    %c0_i32_0 = arith.constant 0 : i32
    %c0_i32_1 = arith.constant 0 : i32
    return %c0_i32, %c0_i32_0 : i32, i32
  }
  func.func @transform_5(%arg0: i32, %arg1: i32) -> (i32, i32) {
    %c0_i32 = arith.constant 0 : i32
    %c0_i32_0 = arith.constant 0 : i32
    %c0_i32_1 = arith.constant 0 : i32
    return %c0_i32, %c0_i32_0 : i32, i32
  }
  func.func @transform_6(%arg0: i32, %arg1: i32) -> (i32, i32, i32, i32) {
    %c0_i32 = arith.constant 0 : i32
    %c0_i32_0 = arith.constant 0 : i32
    %c0_i32_1 = arith.constant 0 : i32
    return %arg0, %arg1, %c0_i32, %c0_i32_0 : i32, i32, i32, i32
  }
}

</mosaic_0001>

<bundles_post_ra>
// kernel: tpu_custom_call.1
= control target key start
LH: loop header
LB: loop body
LE: loop exit
PB: predicated region body
PF: predicated region fallthrough
CT: control target
= control target key end

     0   :  { %s9767_s0 = inlined_call_operand.hbm [shape: bf16[2,16,96], index: 0, kind: input, shape index: {}]   ;;  %s9768_s1 = inlined_call_operand.hbm [shape: bf16[2,16,96], index: 1, kind: input, shape index: {}]   ;;  %s9769_s2 = inlined_call_operand.hbm [shape: bf16[3,96,512], index: 2, kind: input, shape index: {}]   ;;  %s9770_s3 = inlined_call_operand.hbm [shape: bf16[3,96,512], index: 3, kind: input, shape index: {}]   ;;  %s9771_s4 = inlined_call_operand.vmem [shape: f32[1,512], index: 4, kind: input, shape index: {}]   ;;  %s9772_s5 = inlined_call_operand.vmem [shape: f32[1,512], index: 5, kind: input, shape index: {}]   ;;  %s9773_s6 = inlined_call_operand.hbm [shape: bf16[2,8,8,512], index: 6, kind: output, shape index: {}]  }
   0x1   :  { %9912 = sst [smem:[#allocation54_spill]] %s9769_s2 }
   0x2   :  { %9913 = sst [smem:[#allocation55_spill]] %s9770_s3 }
   0x3   :  { %9914 = sst [smem:[#allocation56_spill]] %s9772_s5 }
   0x4   :  { %9915 = sst [smem:[#allocation57_spill]] %s9773_s6 }
   0x5   :  { %11 = vsyncpa [#allocation5], 0 }
   0x6   :  { %13 = vsyncpa [#allocation5 + $0x1], 0 }
   0x7   :  { %14 = vsyncpa [#allocation8], 0 }
   0x8   :  { %16 = vsyncpa [#allocation8 + $0x1], 0 }
   0x9   :  { %17 = vsyncpa [#allocation11], 0 }
   0xa   :  { %18 = vsyncpa [#allocation6], 0 }
   0xb   :  { %20 = vsyncpa [#allocation6 + $0x1], 0  ;;  %s6302_s21 = smov 0   ;;  %s6304_s22 = smov 0  }
   0xc   :  { %s6306_s23 = smov 0   ;;  %s6308_s24 = smov 0  }
   0xd   :  { %s6310_s25 = smov 0   ;;  %s6312_s26 = smov 0  }
   0xe   :  { %s6314_s27 = smov 0   ;;  %s6316_s28 = smov 0  }
   0xf   :  { %s6318_s29 = smov 0   ;;  %s6320_s30 = smov 0  }
  0x10   :  { %s6322_s7 = smov 0  }
  0x11 LB: > { %9916 = sst [smem:[#allocation18_spill]] %s6236_s28  ;;  %s6356_s8 = sadd.s32 4294967295, %s6248_s7   ;;  %s6248_s7 = sphi %s6322_s7, %s26_s7   ;;  %s6244_s30 = sphi %s6320_s30, %s10564_s30   ;;  %s6240_s29 = sphi %s6318_s29, %s10555_s29   ;;  %s6236_s28 = sphi %s6316_s28, %s10563_s28   ;;  %s6232_s27 = sphi %s6314_s27, %s10554_s27   ;;  %s6228_s26 = sphi %s6312_s26, %s10562_s26   ;;  %s6224_s25 = sphi %s6310_s25, %s10561_s25   ;;  %s6220_s24 = sphi %s6308_s24, %s10560_s24   ;;  %s6216_s23 = sphi %s6306_s23, %s10559_s23   ;;  %s6212_s22 = sphi %s6304_s22, %s10558_s22   ;;  %s6208_s21 = sphi %s6302_s21, %s10557_s21  }
  0x12   : > { %9917 = sst [smem:[#allocation19_spill]] %s6240_s29  ;;  %p86_p0 = scmp.ne.s32.totalorder %s6212_s22, %s6208_s21 }
  0x13   : > { %p9774_p1 = scmp.eq.s32.totalorder %s6356_s8, 0  ;;  %p5292_p2 = scmp.ge.s32.totalorder %s6248_s7, 1 }
  0x14   : > { %p209_p3 = scmp.lt.s32.totalorder %s6248_s7, 5  ;;  %s6250_s11 = smov [#allocation9]  }
  0x15   : > { %p6364_p4 = por %p86_p0, %p9774_p1  ;;  %s221_s12 = sshll.u32 %s6250_s11, 4  ;;  %s222_s12 = int_to_ptr.vmem [resolvable:$true] %s221_s12 }
  0x16   : > { %p6368_p5 = pnand %p5292_p2, %p209_p3  ;;  %s6251_s14 = smov [#allocation10]  }
  0x17   : > { %s9918_s9 = scalar_select %p6364_p4, 1, 0 }
  0x18   : > { %s9919_s10 = scalar_select %p6368_p5, 1, 0 }
  0x19   : > { %p5653_p6 = pneg %p6368_p5  ;;  %s234_s15 = sshll.u32 %s6251_s14, 4  ;;  %s6380_s15 = int_to_ptr.vmem [resolvable:$true] %s234_s15 }
  0x1a   : > { %s9921_s2 = sld [smem:[#allocation54_spill]] }
  0x1b   : > { %p6376_p7 = pnand %p5653_p6, %p9774_p1 }
  0x1d   : > { %p6000_p9 = pneg %p6376_p7 }
  0x20   : > { %s5998_s18 = scalar_lea.hbm %s9921_s2, 9216 }
  0x21   : > { %p5999_p8 = scmp.ne.s32.totalorder %s9921_s2, %s5998_s18  ;;  %p6005_p12 = scmp.lt.u32.totalorder %s5998_s18, %s9921_s2 }
  0x23   : > { %p6001_p10 = pnand %p6000_p9, %p5999_p8 }
  0x25   : > { %p6002_p11 = pneg %p6001_p10 }
  0x27   : > { %p6007_p13 = pnand %p6005_p12, %p6002_p11 }
  0x29   : > { %6010 = shalt.err (!%p6007_p13)
}
  0x2a   : > { %s6011_s14 = scalar_lea.vmem %s222_s12, 9216  ;;  %p6019_p6 = scmp.lt.s32.totalorder %s222_s12, %s222_s12 }
  0x2b   : > { %p6012_p0 = scmp.ne.s32.totalorder %s222_s12, %s6011_s14  ;;  %p6020_p1 = scmp.lt.s32.totalorder %s6011_s14, %s6011_s14 }
  0x2d   : > { %p6014_p2 = pnand %p6012_p0, %p6000_p9  ;;  %p6021_p4 = por %p6020_p1, %p6019_p6 }
  0x2f   : > { %p6015_p3 = pneg %p6014_p2 }
  0x31   : > { %p6022_p5 = pnand %p6021_p4, %p6015_p3 }
  0x33   : > { %6025 = shalt.err (!%p6022_p5)
}
  0x34   : > { %s6252_s16 = smov 256   ;;  %s6253_s17 = smov 16  }
  0x35   : > { %5656 = dma.hbm_to_vmem [thread:$0]  (!%p6376_p7), %s9921_s2, 9216, %s222_s12, [#allocation8], %s6252_s16, %s6252_s16, %s6253_s17  }
  0x36   : > { %s9922_s3 = sld [smem:[#allocation55_spill]] }
  0x3c   : > { %s6026_s11 = scalar_lea.hbm %s9922_s3, 9216 }
  0x3d   : > { %p6027_p8 = scmp.ne.s32.totalorder %s9922_s3, %s6026_s11  ;;  %p6033_p5 = scmp.lt.u32.totalorder %s6026_s11, %s9922_s3 }
  0x3f   : > { %p6029_p1 = pnand %p6027_p8, %p6000_p9 }
  0x41   : > { %p6030_p4 = pneg %p6029_p1 }
  0x43   : > { %p6035_p10 = pnand %p6033_p5, %p6030_p4 }
  0x45   : > { %6038 = shalt.err (!%p6035_p10)
}
  0x46   : > { %s6039_s12 = scalar_lea.vmem %s6380_s15, 9216  ;;  %p6047_p0 = scmp.lt.s32.totalorder %s6380_s15, %s6380_s15 }
  0x47   : > { %p6040_p11 = scmp.ne.s32.totalorder %s6380_s15, %s6039_s12  ;;  %p6048_p2 = scmp.lt.s32.totalorder %s6039_s12, %s6039_s12 }
  0x49   : > { %p6042_p12 = pnand %p6040_p11, %p6000_p9  ;;  %p6049_p3 = por %p6048_p2, %p6047_p0 }
  0x4b   : > { %p6043_p13 = pneg %p6042_p12 }
  0x4d   : > { %p6050_p6 = pnand %p6049_p3, %p6043_p13 }
  0x4f   : > { %6053 = shalt.err (!%p6050_p6)
}
  0x50   : > { %5659 = dma.hbm_to_vmem [thread:$0]  (!%p6376_p7), %s9922_s3, 9216, %s6380_s15, [#allocation11], %s6252_s16, %s6252_s16, %s6253_s17  }
  0x51   : > { %s5291_s28 = sadd.s32 4294967294, %s6248_s7   ;;  %s35_s13 = sadd.s32 1, %s6240_s29 }
  0x52   : > { %p36_p9 = scmp.ge.s32.totalorder %s35_s13, 2  ;;  %s38_s18 = sadd.s32 1, %s6244_s30 }
  0x53   : > { %s47_s19 = sadd.s32 1, %s6228_s26  ;;  %p54_p8 = scmp.ne.s32.totalorder %s6228_s26, %s6224_s25 }
  0x54   : > { %s10566_s13 = smov (%p36_p9, %s35_s13), 0  ;;  %s10568_s18 = smov (!%p36_p9, %s38_s18), %s6244_s30 }
  0x55   : > { %9923 = sst [smem:[#allocation20_spill]] %s10566_s13  ;;  %s43_s15 = ssub.s32 %s6240_s29, %s10566_s13 }
  0x56   : > { %p55_p7 = scmp.eq.s32.totalorder %s6248_s7, 0  ;;  %p40_p1 = scmp.ge.s32.totalorder %s10568_s18, 2 }
  0x57   : > { %p60_p4 = scmp.ne.s32.totalorder %s6224_s25, %s6220_s24  ;;  %s73_s17 = sadd.s32 1, %s6216_s23 }
  0x58   : > { %p6448_p5 = por %p55_p7, %p54_p8  ;;  %s10570_s18 = smov (%p40_p1, %s10568_s18), 0 }
  0x59   : > { %9925 = sst [smem:[#allocation21_spill]] %s10570_s18  ;;  %p9926_p10 = scmp.eq.s32.totalorder %s6356_s8, 0 }
  0x5a   : > { %p80_p12 = scmp.ne.s32.totalorder %s6216_s23, %s6212_s22  ;;  %s42_s21 = ssub.s32 %s6244_s30, %s10570_s18 }
  0x5b   : > { %p6460_p11 = por %p9926_p10, %p60_p4  ;;  %p196_p13 = scmp.eq.s32.totalorder %s6356_s8, 3 }
  0x5c   : > { %s44_s11 = sor.u32 %s43_s15, %s42_s21  ;;  %p71_p0 = scmp.eq.s32.totalorder %s42_s21, 0 }
  0x5d   : > { %s9927_s20 = scalar_select %p6460_p11, 1, 0 }
  0x5e   : > { %p45_p2 = scmp.eq.s32.totalorder %s44_s11, 0  ;;  %p6471_p3 = por %p80_p12, %p55_p7 }
  0x5f   : > { %s6476_s12 = scalar_select %p71_p0, %s6216_s23, %s73_s17  }
  0x60   : > { %s6479_s5 = scalar_select %p45_p2, %s6228_s26, %s47_s19  }
  0x61   : > { %9929 = sst [smem:[#allocation22_spill]] %s6476_s12  ;;  %p6484_p6 = por %p196_p13, %p54_p8 }
  0x62   : > { %9930 = sst [smem:[#allocation23_spill]] %s6479_s5  ;;  %p202_p9 = scmp.eq.s32.totalorder %s5291_s28, 3 }
  0x63   : > { %s9931_s6 = scalar_select %p6484_p6, 1, 0 }
  0x64   : > { %p5673_p1 = scmp.lt.s32.totalorder %s6248_s7, 4  ;;  %s254_s15 = sand.u32 1, %s6228_s26  }
  0x65   : > { %p6493_p7 = por %p202_p9, %p60_p4  ;;  %s5296_s17 = sshll.u32 %s254_s15, 2 }
  0x66   : > { %s5297_s11 = sshll.u32 %s6244_s30, 1  ;;  %s258_s3 = scalar_lea.vmem [#allocation4], %s5296_s17 }
  0x67   : > { %s9932_s21 = scalar_select %p6493_p7, 1, 0 }
  0x68   : > { %s263_s2 = sadd.s32 %s6240_s29, %s5297_s11  ;;  %s267_s18 = sshll.u32 %s258_s3, 4  ;;  %s6504_s18 = int_to_ptr.vmem [resolvable:$true] %s267_s18 }
  0x69   : > { %s5298_s19 = sshll.u32 %s263_s2, 6  ;;  %p6508_p8 = pnand %p5673_p1, %p6448_p5 }
  0x6a   : > { %s6502_s12 = scalar_lea.hbm %s9767_s0, %s5298_s19  ;;  %p6514_p4 = pnand %p5673_p1, %p6471_p3 }
  0x6b   : > { %s274_s3 = sand.u32 1, %s6248_s7   ;;  %s276_s13 = sand.u32 1, %s6216_s23  }
  0x6c   : > { %s255_s5 = scalar_lea.sflag [#allocation5], %s254_s15  ;;  %s6054_s17 = scalar_lea.hbm %s6502_s12, 64 }
  0x6d   : > { %p6055_p10 = scmp.ne.s32.totalorder %s6502_s12, %s6054_s17  ;;  %p6056_p12 = pneg %p6508_p8 }
  0x6e   : > { %s6059_s14 = scalar_lea.hbm %s9767_s0, 256  ;;  %p6060_p0 = scmp.lt.u32.totalorder %s6502_s12, %s9767_s0 }
  0x6f   : > { %p6057_p5 = pnand %p6056_p12, %p6055_p10  ;;  %p6061_p2 = scmp.lt.u32.totalorder %s6059_s14, %s6054_s17 }
  0x70   : > { %p6063_p9 = scmp.lt.u32.totalorder %s6054_s17, %s6502_s12 }
  0x71   : > { %p6058_p13 = pneg %p6057_p5  ;;  %p6062_p3 = por %p6061_p2, %p6060_p0 }
  0x73   : > { %p6064_p1 = por %p6063_p9, %p6062_p3 }
  0x75   : > { %p6065_p7 = pnand %p6064_p1, %p6058_p13 }
  0x77   : > { %6068 = shalt.err (!%p6065_p7)
}
  0x78   : > { %s6069_s15 = scalar_lea.vmem %s6504_s18, 64  ;;  %s6254_s16 = smov [#allocation4]  }
  0x79   : > { %p6070_p10 = scmp.ne.s32.totalorder %s6504_s18, %s6069_s15  ;;  %s6074_s11 = sshll.u32 %s6254_s16, 4  ;;  %s6075_s11 = int_to_ptr.vmem [resolvable:$false] %s6074_s11 }
  0x7a   : > { %s6076_s29 = scalar_lea.vmem %s6075_s11, 128  ;;  %p6077_p11 = scmp.lt.s32.totalorder %s6504_s18, %s6075_s11 }
  0x7b   : > { %p6072_p5 = pnand %p6070_p10, %p6056_p12  ;;  %p6078_p0 = scmp.lt.s32.totalorder %s6076_s29, %s6069_s15 }
  0x7d   : > { %p6073_p6 = pneg %p6072_p5  ;;  %p6079_p2 = por %p6078_p0, %p6077_p11 }
  0x7f   : > { %p6080_p3 = pnand %p6079_p2, %p6073_p6 }
  0x81   : > { %6083 = shalt.err (!%p6080_p3)
}
  0x82   : > { %5663 = dma.hbm_to_vmem [thread:$0]  (!%p6508_p8), %s6502_s12, 64, %s6504_s18, %s255_s5  }
  0x83   : > { %s5299_s17 = sshll.u32 %s276_s13, 3  ;;  %s5573_s14 = sshll.u32 %s6244_s30, 7 }
  0x84   : > { %s6551_s15 = scalar_lea.hbm %s9768_s1, %s5573_s14  ;;  %s278_s28 = scalar_lea.vmem [#allocation7], %s5299_s17 }
  0x85   : > { %s285_s11 = sshll.u32 %s278_s28, 4  ;;  %s6557_s29 = scalar_lea.sflag [#allocation8], %s274_s3  ;;  %s6553_s11 = int_to_ptr.vmem [resolvable:$true] %s285_s11 }
  0x86   : > { %s6084_s18 = scalar_lea.hbm %s6551_s15, 128  ;;  %p6086_p6 = pneg %p6514_p4 }
  0x87   : > { %p6085_p11 = scmp.ne.s32.totalorder %s6551_s15, %s6084_s18  ;;  %s6089_s5 = scalar_lea.hbm %s9768_s1, 256 }
  0x88   : > { %p6090_p12 = scmp.lt.u32.totalorder %s6551_s15, %s9768_s1  ;;  %p6091_p13 = scmp.lt.u32.totalorder %s6089_s5, %s6084_s18 }
  0x89   : > { %p6087_p7 = pnand %p6086_p6, %p6085_p11  ;;  %p6093_p1 = scmp.lt.u32.totalorder %s6084_s18, %s6551_s15 }
  0x8a   : > { %p6092_p9 = por %p6091_p13, %p6090_p12 }
  0x8b   : > { %p6088_p8 = pneg %p6087_p7 }
  0x8c   : > { %p6094_p10 = por %p6093_p1, %p6092_p9 }
  0x8e   : > { %p6095_p5 = pnand %p6094_p10, %p6088_p8 }
  0x90   : > { %6098 = shalt.err (!%p6095_p5)
}
  0x91   : > { %s6099_s3 = scalar_lea.vmem %s6553_s11, 128  ;;  %s6255_s19 = smov [#allocation7]  }
  0x92   : > { %p6100_p0 = scmp.ne.s32.totalorder %s6553_s11, %s6099_s3  ;;  %s6104_s16 = sshll.u32 %s6255_s19, 4  ;;  %s6105_s16 = int_to_ptr.vmem [resolvable:$false] %s6104_s16 }
  0x93   : > { %s6106_s28 = scalar_lea.vmem %s6105_s16, 256  ;;  %p6107_p11 = scmp.lt.s32.totalorder %s6553_s11, %s6105_s16 }
  0x94   : > { %p6102_p2 = pnand %p6100_p0, %p6086_p6  ;;  %p6108_p7 = scmp.lt.s32.totalorder %s6106_s28, %s6099_s3 }
  0x96   : > { %p6103_p3 = pneg %p6102_p2  ;;  %p6109_p12 = por %p6108_p7, %p6107_p11 }
  0x98   : > { %p6110_p13 = pnand %p6109_p12, %p6103_p3 }
  0x9a   : > { %6113 = shalt.err (!%p6110_p13)
}
  0x9b   : > { %s6256_s18 = smov 64   ;;  %s6257_s12 = smov 4  }
  0x9c   : > { %5666 = dma.hbm_to_vmem [thread:$0]  (!%p6514_p4), %s6551_s15, 128, %s6553_s11, %s6557_s29, %s6256_s18, %s6256_s18, %s6257_s12  }
  0x9d   : > { %p9935_p6 = scmp.ne.s32.totalorder %s9919_s10, 0 }
  0x9f   : > { %297 = sbr.rel (%p9935_p6) target bundleno = 1520 (0x5f0), region = 44 }
  0xa6   : > { %s6588_s13 = sand.u32 1, %s6224_s25   ;;  %p9936_p8 = scmp.ne.s32.totalorder %s9927_s20, 0 }
  0xa7   : > { %s5303_s5 = sshll.u32 %s6588_s13, 2  ;;  %s300_s14 = scalar_lea.sflag [#allocation5], %s6588_s13 }
  0xa8   : > { %s6592_s17 = scalar_lea.vmem [#allocation4], %s5303_s5 }
  0xa9   : > { %6187 = dma.done.wait (%p9936_p8), %s300_s14, 64  }
  0xaa   : > { %6189 = vsyncadd (%p9936_p8), %s300_s14, 4294967232  ;;  %s308_s10 = sand.u32 1, %s6356_s8   ;;  %s310_s2 = sand.u32 1, %s6212_s22  }
  0xab   : > { %s5304_s15 = sshll.u32 %s310_s2, 3  ;;  %s309_s11 = scalar_lea.sflag [#allocation8], %s308_s10 }
  0xac   : > { %s6600_s29 = scalar_lea.vmem [#allocation7], %s5304_s15  ;;  %p9937_p4 = scmp.ne.s32.totalorder %s9918_s9, 0 }
  0xae   : > { %6191 = dma.done.wait (%p9937_p4), %s309_s11, 128  }
  0xaf   : > { %6193 = vsyncadd (%p9937_p4), %s309_s11, 4294967168  ;;  %p9938_p9 = scmp.eq.s32.totalorder %s6356_s8, 0 }
  0xb1   : > { %6195 = dma.done.wait (%p9938_p9), [#allocation8], 9216   ;;  %p9939_p1 = pmov %p9938_p9 }
  0xb3   : > { %6197 = vsyncadd (%p9939_p1), [#allocation8], 4294958080  ;;  %p9940_p10 = pmov %p9939_p1 }
  0xb4   : > { %p9941_p5 = pmov %p9939_p1 }
  0xb5   : > { %6199 = dma.done.wait (%p9940_p10), [#allocation11], 9216  }
  0xb6   : > { %6201 = vsyncadd (%p9941_p5), [#allocation11], 4294958080  ;;  %s5307_s20 = sshll.u32 %s6588_s13, 6  ;;  %p5308_p0 = scmp.ne.s32.totalorder %s6232_s27, 0 }
  0xb7   : > { %s6615_s3 = scalar_lea.vmem [#allocation12], %s5307_s20  ;;  %v5779_v0 = vld [vmem:[#allocation10 + $0x4] ss:$16 sps:$4 sm:$0xff] (!%p5308_p0)   ;;  %v5781_v1 = vld [vmem:[#allocation10 + $0xc] ss:$16 sps:$4 sm:$0xff] (!%p5308_p0)   ;;  %v6258_v2 = vmov (!%p5308_p0), 0  }
  0xb8   : > { %359 = sbr.rel (%p5308_p0) target bundleno = 425 (0x1a9), region = 64  ;;  %547 = vmatprep.mubr.bf16.mxu0 (!%p5308_p0), %v6258_v2  ;;  %590 = vmatprep.mubr.bf16.mxu1 (!%p5308_p0), %v6258_v2  ;;  %v5783_v3 = vld [vmem:[#allocation10] ss:$16 sps:$4 sm:$0xff] (!%p5308_p0)   ;;  %v5784_v4 = vld [vmem:[#allocation10 + $0x8] ss:$16 sps:$4 sm:$0xff] (!%p5308_p0)   ;;  %vm511_vm0 = vcmask (!%p5308_p0), 785408  }
  0xb9   : > { %515 = vmatprep.subr.bf16.mxu0 (!%p5308_p0), %v5779_v0  ;;  %558 = vmatprep.subr.bf16.mxu1 (!%p5308_p0), %v5781_v1  ;;  %v5785_v5 = vld [vmem:[#allocation10 + $0x24] ss:$16 sps:$4 sm:$0xff] (!%p5308_p0)   ;;  %v5787_v6 = vld [vmem:[#allocation10 + $0x2c] ss:$16 sps:$4 sm:$0xff] (!%p5308_p0)   ;;  %v5789_v7 = vld [vmem:[#allocation10 + $0x20] ss:$16 sps:$4 sm:$0xff] (!%p5308_p0)  }
  0xba   : > { %516 = vmatpush1.bf16.msra.mxu0 (!%p5308_p0), %v5783_v3  ;;  %559 = vmatpush1.bf16.msra.mxu1 (!%p5308_p0), %v5784_v4  ;;  %v5790_v8 = vld [vmem:[#allocation10 + $0x28] ss:$16 sps:$4 sm:$0xff] (!%p5308_p0)   ;;  %v5791_v9 = vld [vmem:[#allocation10 + $0x44] ss:$16 sps:$4 sm:$0xff] (!%p5308_p0)   ;;  %v5793_v10 = vld [vmem:[#allocation10 + $0x4c] ss:$16 sps:$4 sm:$0xff] (!%p5308_p0)  }
  0xbb   : > { %517 = vmatprep.subr.bf16.mxu0 (!%p5308_p0), %v5785_v5  ;;  %560 = vmatprep.subr.bf16.mxu1 (!%p5308_p0), %v5787_v6  ;;  %v5795_v11 = vld [vmem:[#allocation10 + $0x40] ss:$16 sps:$4 sm:$0xff] (!%p5308_p0)   ;;  %v5796_v12 = vld [vmem:[#allocation10 + $0x48] ss:$16 sps:$4 sm:$0xff] (!%p5308_p0)   ;;  %v5797_v13 = vld [vmem:[#allocation10 + $0x64] ss:$16 sps:$4 sm:$0xff] (!%p5308_p0)  }
  0xbc   : > { %v5799_v14 = vld [vmem:[#allocation10 + $0x6c] ss:$16 sps:$4 sm:$0xff] (!%p5308_p0)   ;;  %v5801_v15 = vld [vmem:[#allocation10 + $0x60] ss:$16 sps:$4 sm:$0xff] (!%p5308_p0)   ;;  %v5802_v16 = vld [vmem:[#allocation10 + $0x68] ss:$16 sps:$4 sm:$0xff] (!%p5308_p0)  }
  0xbd   : > { %v5803_v17 = vld [vmem:[#allocation10 + $0x84] ss:$16 sps:$4 sm:$0xff] (!%p5308_p0)   ;;  %v5805_v18 = vld [vmem:[#allocation10 + $0x8c] ss:$16 sps:$4 sm:$0xff] (!%p5308_p0)   ;;  %v5807_v19 = vld [vmem:[#allocation10 + $0x80] ss:$16 sps:$4 sm:$0xff] (!%p5308_p0)  }
  0xbe   : > { %518 = vmatpush1.bf16.msra.mxu0 (!%p5308_p0), %v5789_v7  ;;  %561 = vmatpush1.bf16.msra.mxu1 (!%p5308_p0), %v5790_v8  ;;  %v5808_v20 = vld [vmem:[#allocation10 + $0x88] ss:$16 sps:$4 sm:$0xff] (!%p5308_p0)   ;;  %v5809_v21 = vld [vmem:[#allocation10 + $0xa4] ss:$16 sps:$4 sm:$0xff] (!%p5308_p0)   ;;  %v5811_v22 = vld [vmem:[#allocation10 + $0xac] ss:$16 sps:$4 sm:$0xff] (!%p5308_p0)  }
  0xbf   : > { %519 = vmatprep.subr.bf16.mxu0 %v5791_v9  ;;  %562 = vmatprep.subr.bf16.mxu1 %v5793_v10  ;;  %v5813_v23 = vld [vmem:[#allocation10 + $0xa0] ss:$16 sps:$4 sm:$0xff]   ;;  %v5814_v24 = vld [vmem:[#allocation10 + $0xa8] ss:$16 sps:$4 sm:$0xff]  }
  0xc0   : > { %v5815_v25 = vld [vmem:[%s6600_s29] sm:$0xff]  }
  0xc2   : > { %520 = vmatpush1.bf16.msra.mxu0 %v5795_v11  ;;  %563 = vmatpush1.bf16.msra.mxu1 %v5796_v12 }
  0xc3   : > { %521 = vmatprep.subr.bf16.mxu0 %v5797_v13  ;;  %564 = vmatprep.subr.bf16.mxu1 %v5799_v14 }
  0xc6   : > { %522 = vmatpush1.bf16.msra.mxu0 %v5801_v15  ;;  %565 = vmatpush1.bf16.msra.mxu1 %v5802_v16 }
  0xc7   : > { %523 = vmatprep.subr.bf16.mxu0 %v5803_v17  ;;  %566 = vmatprep.subr.bf16.mxu1 %v5805_v18 }
  0xca   : > { %524 = vmatpush1.bf16.msra.mxu0 %v5807_v19  ;;  %567 = vmatpush1.bf16.msra.mxu1 %v5808_v20 }
  0xcb   : > { %525 = vmatprep.subr.bf16.mxu0 %v5809_v21  ;;  %568 = vmatprep.subr.bf16.mxu1 %v5811_v22 }
  0xce   : > { %526 = vmatpush1.bf16.msra.mxu0 %v5813_v23  ;;  %569 = vmatpush1.bf16.msra.mxu1 %v5814_v24 }
  0xd1   : > { %5334 = vmatmul.mubr.msk.bf16.vlgmr.msra.gmra.mrb[0].mxu0 %vm511_vm0, %v5815_v25  ;;  %5335 = vmatmul.mubr.msk.bf16.vlgmr.msra.gmra.mrb[0].mxu1 %vm511_vm0, %v5815_v25 }
 0x1a4   : > { %v549_v26 = vpop.f32.mrb[0].mxu0  ;;  %v592_v27 = vpop.f32.mrb[0].mxu1 }
 0x1a5   : > { %601 = vst [vmem:[#allocation2] sm:$0xff] %v549_v26  ;;  %603 = vst [vmem:[#allocation2 + $0x10] sm:$0xff] %v592_v27  ;;  %v551_v28 = vpop.f32.mrb[1].mxu0  ;;  %v594_v29 = vpop.f32.mrb[1].mxu1 }
 0x1a6   : > { %602 = vst [vmem:[#allocation2 + $0x8] sm:$0xff] %v551_v28  ;;  %604 = vst [vmem:[#allocation2 + $0x18] sm:$0xff] %v594_v29  ;;  %v553_v30 = vpop.f32.mrb[2].mxu0  ;;  %v596_v31 = vpop.f32.mrb[2].mxu1 }
 0x1a7   : > { %605 = vst [vmem:[#allocation2 + $0x20] sm:$0xff] %v553_v30  ;;  %607 = vst [vmem:[#allocation2 + $0x30] sm:$0xff] %v596_v31  ;;  %v555_v32 = vpop.f32.mrb[3].mxu0  ;;  %v598_v33 = vpop.f32.mrb[3].mxu1 }
 0x1a8   : > { %606 = vst [vmem:[#allocation2 + $0x28] sm:$0xff] %v555_v32  ;;  %608 = vst [vmem:[#allocation2 + $0x38] sm:$0xff] %v598_v33 }
 0x1a9 PF: > { %v5816_v34 = vld [vmem:[#allocation9 + $0x4] ss:$16 sps:$4 sm:$0xff]   ;;  %v5818_v35 = vld [vmem:[#allocation9 + $0xc] ss:$16 sps:$4 sm:$0xff]   ;;  %v6259_v36 = vmov 0   ;;  %vm754_vm1 = vcmask 785408  }
 0x1aa   : > { %790 = vmatprep.mubr.bf16.mxu0 %v6259_v36  ;;  %831 = vmatprep.mubr.bf16.mxu1 %v6259_v36  ;;  %v5820_v37 = vld [vmem:[#allocation9] ss:$16 sps:$4 sm:$0xff]   ;;  %v5821_v38 = vld [vmem:[#allocation9 + $0x8] ss:$16 sps:$4 sm:$0xff]   ;;  %v5822_v39 = vld [vmem:[#allocation9 + $0x24] ss:$16 sps:$4 sm:$0xff]  }
 0x1ab   : > { %758 = vmatprep.subr.bf16.mxu0 %v5816_v34  ;;  %799 = vmatprep.subr.bf16.mxu1 %v5818_v35  ;;  %v5824_v40 = vld [vmem:[#allocation9 + $0x2c] ss:$16 sps:$4 sm:$0xff]   ;;  %v5826_v41 = vld [vmem:[#allocation9 + $0x20] ss:$16 sps:$4 sm:$0xff]   ;;  %v5827_v42 = vld [vmem:[#allocation9 + $0x28] ss:$16 sps:$4 sm:$0xff]  }
 0x1ac   : > { %759 = vmatpush1.bf16.msra.mxu0 %v5820_v37  ;;  %800 = vmatpush1.bf16.msra.mxu1 %v5821_v38  ;;  %v5828_v43 = vld [vmem:[#allocation9 + $0x44] ss:$16 sps:$4 sm:$0xff]   ;;  %v5830_v44 = vld [vmem:[#allocation9 + $0x4c] ss:$16 sps:$4 sm:$0xff]   ;;  %v5832_v45 = vld [vmem:[#allocation9 + $0x40] ss:$16 sps:$4 sm:$0xff]  }
 0x1ad   : > { %760 = vmatprep.subr.bf16.mxu0 %v5822_v39  ;;  %801 = vmatprep.subr.bf16.mxu1 %v5824_v40  ;;  %v5833_v46 = vld [vmem:[#allocation9 + $0x48] ss:$16 sps:$4 sm:$0xff]   ;;  %v5834_v47 = vld [vmem:[#allocation9 + $0x64] ss:$16 sps:$4 sm:$0xff]   ;;  %v5836_v48 = vld [vmem:[#allocation9 + $0x6c] ss:$16 sps:$4 sm:$0xff]  }
 0x1ae   : > { %v5838_v49 = vld [vmem:[#allocation9 + $0x60] ss:$16 sps:$4 sm:$0xff]   ;;  %v5839_v50 = vld [vmem:[#allocation9 + $0x68] ss:$16 sps:$4 sm:$0xff]   ;;  %v5840_v51 = vld [vmem:[#allocation9 + $0x84] ss:$16 sps:$4 sm:$0xff]  }
 0x1af   : > { %v5842_v52 = vld [vmem:[#allocation9 + $0x8c] ss:$16 sps:$4 sm:$0xff]   ;;  %v5844_v53 = vld [vmem:[#allocation9 + $0x80] ss:$16 sps:$4 sm:$0xff]   ;;  %v5845_v54 = vld [vmem:[#allocation9 + $0x88] ss:$16 sps:$4 sm:$0xff]  }
 0x1b0   : > { %761 = vmatpush1.bf16.msra.mxu0 %v5826_v41  ;;  %802 = vmatpush1.bf16.msra.mxu1 %v5827_v42  ;;  %v5846_v55 = vld [vmem:[#allocation9 + $0xa4] ss:$16 sps:$4 sm:$0xff]   ;;  %v5848_v56 = vld [vmem:[#allocation9 + $0xac] ss:$16 sps:$4 sm:$0xff]   ;;  %v5850_v57 = vld [vmem:[#allocation9 + $0xa0] ss:$16 sps:$4 sm:$0xff]  }
 0x1b1   : > { %762 = vmatprep.subr.bf16.mxu0 %v5828_v43  ;;  %803 = vmatprep.subr.bf16.mxu1 %v5830_v44  ;;  %v5851_v58 = vld [vmem:[#allocation9 + $0xa8] ss:$16 sps:$4 sm:$0xff]   ;;  %v5854_v59 = vld [vmem:[#allocation9 + $0xc4] ss:$16 sps:$4 sm:$0xff]   ;;  %v5857_v60 = vld [vmem:[#allocation9 + $0xcc] ss:$16 sps:$4 sm:$0xff]  }
 0x1b2   : > { %v6624_v61 = vld [vmem:[%s6592_s17] sm:$0xf]  ;;  %v5852_v62 = vld [vmem:[#allocation9 + $0xc0] ss:$16 sps:$4 sm:$0xff]   ;;  %v5860_v0 = vld [vmem:[#allocation9 + $0xe4] ss:$16 sps:$4 sm:$0xff]  }
 0x1b3   : > { %v5855_v63 = vld [vmem:[#allocation9 + $0xc8] ss:$16 sps:$4 sm:$0xff]   ;;  %v5863_v1 = vld [vmem:[#allocation9 + $0xec] ss:$16 sps:$4 sm:$0xff]   ;;  %v5858_v2 = vld [vmem:[#allocation9 + $0xe0] ss:$16 sps:$4 sm:$0xff]  }
 0x1b4   : > { %763 = vmatpush1.bf16.msra.mxu0 %v5832_v45  ;;  %804 = vmatpush1.bf16.msra.mxu1 %v5833_v46  ;;  %v5861_v3 = vld [vmem:[#allocation9 + $0xe8] ss:$16 sps:$4 sm:$0xff]   ;;  %v5866_v4 = vld [vmem:[#allocation9 + $0x104] ss:$16 sps:$4 sm:$0xff]   ;;  %v5869_v5 = vld [vmem:[#allocation9 + $0x10c] ss:$16 sps:$4 sm:$0xff]   ;;  %v1305_v46 = vlaneseq }
 0x1b5   : > { %764 = vmatprep.subr.bf16.mxu0 %v5834_v47  ;;  %805 = vmatprep.subr.bf16.mxu1 %v5836_v48  ;;  %v5864_v6 = vld [vmem:[#allocation9 + $0x100] ss:$16 sps:$4 sm:$0xff]   ;;  %v5867_v7 = vld [vmem:[#allocation9 + $0x108] ss:$16 sps:$4 sm:$0xff]   ;;  %v5872_v8 = vld [vmem:[#allocation9 + $0x124] ss:$16 sps:$4 sm:$0xff]  }
 0x1b6   : > { %v5875_v9 = vld [vmem:[#allocation9 + $0x12c] ss:$16 sps:$4 sm:$0xff]   ;;  %v5870_v10 = vld [vmem:[#allocation9 + $0x120] ss:$16 sps:$4 sm:$0xff]   ;;  %v5873_v11 = vld [vmem:[#allocation9 + $0x128] ss:$16 sps:$4 sm:$0xff]  }
 0x1b7   : > { %v5878_v12 = vld [vmem:[#allocation9 + $0x144] ss:$16 sps:$4 sm:$0xff]   ;;  %v5881_v13 = vld [vmem:[#allocation9 + $0x14c] ss:$16 sps:$4 sm:$0xff]   ;;  %v5876_v14 = vld [vmem:[#allocation9 + $0x140] ss:$16 sps:$4 sm:$0xff]  }
 0x1b8   : > { %765 = vmatpush1.bf16.msra.mxu0 %v5838_v49  ;;  %806 = vmatpush1.bf16.msra.mxu1 %v5839_v50  ;;  %v5879_v15 = vld [vmem:[#allocation9 + $0x148] ss:$16 sps:$4 sm:$0xff]   ;;  %v5884_v16 = vld [vmem:[#allocation9 + $0x164] ss:$16 sps:$4 sm:$0xff]   ;;  %v5887_v17 = vld [vmem:[#allocation9 + $0x16c] ss:$16 sps:$4 sm:$0xff]  }
 0x1b9   : > { %766 = vmatprep.subr.bf16.mxu0 %v5840_v51  ;;  %807 = vmatprep.subr.bf16.mxu1 %v5842_v52  ;;  %v5882_v18 = vld [vmem:[#allocation9 + $0x160] ss:$16 sps:$4 sm:$0xff]   ;;  %v5885_v19 = vld [vmem:[#allocation9 + $0x168] ss:$16 sps:$4 sm:$0xff]   ;;  %v5890_v20 = vld [vmem:[#allocation9 + $0x184] ss:$16 sps:$4 sm:$0xff]  }
 0x1ba   : > { %v5893_v21 = vld [vmem:[#allocation9 + $0x18c] ss:$16 sps:$4 sm:$0xff]   ;;  %v5888_v22 = vld [vmem:[#allocation9 + $0x180] ss:$16 sps:$4 sm:$0xff]   ;;  %v5891_v23 = vld [vmem:[#allocation9 + $0x188] ss:$16 sps:$4 sm:$0xff]  }
 0x1bb   : > { %v5896_v24 = vld [vmem:[#allocation9 + $0x1a4] ss:$16 sps:$4 sm:$0xff]   ;;  %v5899_v25 = vld [vmem:[#allocation9 + $0x1ac] ss:$16 sps:$4 sm:$0xff]   ;;  %v5894_v26 = vld [vmem:[#allocation9 + $0x1a0] ss:$16 sps:$4 sm:$0xff]  }
 0x1bc   : > { %767 = vmatpush1.bf16.msra.mxu0 %v5844_v53  ;;  %808 = vmatpush1.bf16.msra.mxu1 %v5845_v54  ;;  %v5897_v27 = vld [vmem:[#allocation9 + $0x1a8] ss:$16 sps:$4 sm:$0xff]   ;;  %v5902_v28 = vld [vmem:[#allocation9 + $0x1c4] ss:$16 sps:$4 sm:$0xff]   ;;  %v5905_v29 = vld [vmem:[#allocation9 + $0x1cc] ss:$16 sps:$4 sm:$0xff]  }
 0x1bd   : > { %768 = vmatprep.subr.bf16.mxu0 %v5846_v55  ;;  %809 = vmatprep.subr.bf16.mxu1 %v5848_v56  ;;  %v5900_v30 = vld [vmem:[#allocation9 + $0x1c0] ss:$16 sps:$4 sm:$0xff]   ;;  %v5903_v31 = vld [vmem:[#allocation9 + $0x1c8] ss:$16 sps:$4 sm:$0xff]   ;;  %v5908_v32 = vld [vmem:[#allocation9 + $0x1e4] ss:$16 sps:$4 sm:$0xff]  }
 0x1be   : > { %v5911_v33 = vld [vmem:[#allocation9 + $0x1ec] ss:$16 sps:$4 sm:$0xff]   ;;  %v5906_v34 = vld [vmem:[#allocation9 + $0x1e0] ss:$16 sps:$4 sm:$0xff]   ;;  %v5909_v35 = vld [vmem:[#allocation9 + $0x1e8] ss:$16 sps:$4 sm:$0xff]  }
 0x1bf   : > { %v5914_v37 = vld [vmem:[#allocation9 + $0x204] ss:$16 sps:$4 sm:$0xff]   ;;  %v5917_v38 = vld [vmem:[#allocation9 + $0x20c] ss:$16 sps:$4 sm:$0xff]   ;;  %v5912_v39 = vld [vmem:[#allocation9 + $0x200] ss:$16 sps:$4 sm:$0xff]  }
 0x1c0   : > { %769 = vmatpush1.bf16.msra.mxu0 %v5850_v57  ;;  %810 = vmatpush1.bf16.msra.mxu1 %v5851_v58  ;;  %v5920_v40 = vld [vmem:[#allocation9 + $0x224] ss:$16 sps:$4 sm:$0xff]   ;;  %v5923_v41 = vld [vmem:[#allocation9 + $0x22c] ss:$16 sps:$4 sm:$0xff]   ;;  %v5918_v42 = vld [vmem:[#allocation9 + $0x220] ss:$16 sps:$4 sm:$0xff]  }
 0x1c1   : > { %985 = vmatprep.subr.bf16.mxu0 %v5854_v59  ;;  %1026 = vmatprep.subr.bf16.mxu1 %v5857_v60  ;;  %v5921_v43 = vld [vmem:[#allocation9 + $0x228] ss:$16 sps:$4 sm:$0xff]   ;;  %v6260_v44 = vmov 1966171168   ;;  %v6643_v48 = vshrl.u32 %v1305_v46, 7  ;;  %vm6897_vm2 = vcmp.lt.s32.totalorder %v1305_v46, 512 }
 0x1c2   : > { %v1303_v45 = vunpack.c.l.s4 %v6260_v44 }
 0x1c3   : > { %5360 = vmatmul.mubr.msk.bf16.vlgmr.msra.gmra.mrb[0].mxu0 %vm754_vm1, %v6624_v61  ;;  %5361 = vmatmul.mubr.msk.bf16.vlgmr.msra.gmra.mrb[0].mxu1 %vm754_vm1, %v6624_v61 }
 0x1c4   : > { %986 = vmatpush1.bf16.msra.mxu0 %v5852_v62  ;;  %1027 = vmatpush1.bf16.msra.mxu1 %v5855_v63  ;;  %v1304_v47 = vunpack.c.0.s8 %v1303_v45 }
 0x1c5   : > { %987 = vmatprep.subr.bf16.mxu0 %v5860_v0  ;;  %1028 = vmatprep.subr.bf16.mxu1 %v5863_v1 }
 0x1c6   : > { %1017 = vmatprep.mubr.bf16.mxu0 %v6259_v36  ;;  %1058 = vmatprep.mubr.bf16.mxu1 %v6259_v36  ;;  %v6646_v51 = vsub.s32 %v1304_v47, %v6643_v48 }
 0x1c8   : > { %988 = vmatpush1.bf16.msra.mxu0 %v5858_v2  ;;  %1029 = vmatpush1.bf16.msra.mxu1 %v5861_v3 }
 0x1c9   : > { %989 = vmatprep.subr.bf16.mxu0 %v5866_v4  ;;  %1030 = vmatprep.subr.bf16.mxu1 %v5869_v5 }
 0x1cc   : > { %990 = vmatpush1.bf16.msra.mxu0 %v5864_v6  ;;  %1031 = vmatpush1.bf16.msra.mxu1 %v5867_v7  ;;  %v6653_v6 = vsub.s32 0, %v6643_v48  ;;  %v6656_v7 = vsub.s32 1, %v6643_v48 }
 0x1cd   : > { %991 = vmatprep.subr.bf16.mxu0 %v5872_v8  ;;  %1032 = vmatprep.subr.bf16.mxu1 %v5875_v9  ;;  %v6659_v8 = vsub.s32 2, %v6643_v48  ;;  %v6662_v9 = vsub.s32 3, %v6643_v48 }
 0x1ce   : > { %9942 = vst [vmem:[#allocation24_spill] sm:$0xff] %v6653_v6 }
 0x1cf   : > { %9943 = vst [vmem:[#allocation25_spill] sm:$0xff] %v6659_v8 }
 0x1d0   : > { %992 = vmatpush1.bf16.msra.mxu0 %v5870_v10  ;;  %1033 = vmatpush1.bf16.msra.mxu1 %v5873_v11 }
 0x1d1   : > { %993 = vmatprep.subr.bf16.mxu0 %v5878_v12  ;;  %1034 = vmatprep.subr.bf16.mxu1 %v5881_v13 }
 0x1d4   : > { %994 = vmatpush1.bf16.msra.mxu0 %v5876_v14  ;;  %1035 = vmatpush1.bf16.msra.mxu1 %v5879_v15 }
 0x1d5   : > { %995 = vmatprep.subr.bf16.mxu0 %v5884_v16  ;;  %1036 = vmatprep.subr.bf16.mxu1 %v5887_v17 }
 0x1d8   : > { %996 = vmatpush1.bf16.msra.mxu0 %v5882_v18  ;;  %1037 = vmatpush1.bf16.msra.mxu1 %v5885_v19 }
 0x1d9   : > { %1212 = vmatprep.subr.bf16.mxu0 %v5890_v20  ;;  %1253 = vmatprep.subr.bf16.mxu1 %v5893_v21 }
 0x1db   : > { %5386 = vmatmul.mubr.msk.bf16.vlgmr.msra.gmra.mrb[4].mxu0 %vm754_vm1, %v6624_v61  ;;  %5387 = vmatmul.mubr.msk.bf16.vlgmr.msra.gmra.mrb[4].mxu1 %vm754_vm1, %v6624_v61 }
 0x1dc   : > { %1213 = vmatpush1.bf16.msra.mxu0 %v5888_v22  ;;  %1254 = vmatpush1.bf16.msra.mxu1 %v5891_v23 }
 0x1dd   : > { %1214 = vmatprep.subr.bf16.mxu0 %v5896_v24  ;;  %1255 = vmatprep.subr.bf16.mxu1 %v5899_v25 }
 0x1de   : > { %1244 = vmatprep.mubr.bf16.mxu0 %v6259_v36  ;;  %1285 = vmatprep.mubr.bf16.mxu1 %v6259_v36  ;;  %v5915_v36 = vld [vmem:[#allocation9 + $0x208] ss:$16 sps:$4 sm:$0xff]  }
 0x1e0   : > { %1215 = vmatpush1.bf16.msra.mxu0 %v5894_v26  ;;  %1256 = vmatpush1.bf16.msra.mxu1 %v5897_v27 }
 0x1e1   : > { %1216 = vmatprep.subr.bf16.mxu0 %v5902_v28  ;;  %1257 = vmatprep.subr.bf16.mxu1 %v5905_v29 }
 0x1e4   : > { %1217 = vmatpush1.bf16.msra.mxu0 %v5900_v30  ;;  %1258 = vmatpush1.bf16.msra.mxu1 %v5903_v31 }
 0x1e5   : > { %1218 = vmatprep.subr.bf16.mxu0 %v5908_v32  ;;  %1259 = vmatprep.subr.bf16.mxu1 %v5911_v33 }
 0x1e8   : > { %1219 = vmatpush1.bf16.msra.mxu0 %v5906_v34  ;;  %1260 = vmatpush1.bf16.msra.mxu1 %v5909_v35  ;;  %v6700_v34 = vld [vmem:[#allocation2] sm:$0xff]  ;;  %v6702_v35 = vld [vmem:[#allocation2 + $0x8] sm:$0xff] }
 0x1e9   : > { %1220 = vmatprep.subr.bf16.mxu0 %v5914_v37  ;;  %1261 = vmatprep.subr.bf16.mxu1 %v5917_v38 }
 0x1ec   : > { %1221 = vmatpush1.bf16.msra.mxu0 %v5912_v39  ;;  %1262 = vmatpush1.bf16.msra.mxu1 %v5915_v36 }
 0x1ed   : > { %1222 = vmatprep.subr.bf16.mxu0 %v5920_v40  ;;  %1263 = vmatprep.subr.bf16.mxu1 %v5923_v41  ;;  %v6716_v40 = vld [vmem:[#allocation2 + $0x10] sm:$0xff]  ;;  %v6718_v41 = vld [vmem:[#allocation2 + $0x18] sm:$0xff] }
 0x1f0   : > { %1223 = vmatpush1.bf16.msra.mxu0 %v5918_v42  ;;  %1264 = vmatpush1.bf16.msra.mxu1 %v5921_v43  ;;  %v6720_v42 = vld [vmem:[#allocation2 + $0x20] sm:$0xff] }
 0x1f3   : > { %5412 = vmatmul.mubr.msk.bf16.vlgmr.msra.gmra.mrb[8].mxu0 %vm754_vm1, %v6624_v61  ;;  %5413 = vmatmul.mubr.msk.bf16.vlgmr.msra.gmra.mrb[8].mxu1 %vm754_vm1, %v6624_v61 }
 0x296   : > { %v792_v49 = vpop.f32.mrb[0].mxu0  ;;  %v833_v50 = vpop.f32.mrb[0].mxu1 }
 0x297   : > { %v794_v52 = vpop.f32.mrb[1].mxu0  ;;  %v835_v53 = vpop.f32.mrb[1].mxu1 }
 0x298   : > { %v1298_v54 = vcombine.low %v792_v49, %v794_v52  ;;  %v1299_v55 = vcombine.high %v792_v49, %v794_v52  ;;  %v1300_v56 = vcombine.low %v833_v50, %v835_v53  ;;  %v1301_v57 = vcombine.high %v833_v50, %v835_v53  ;;  %v796_v58 = vpop.f32.mrb[2].mxu0  ;;  %v837_v59 = vpop.f32.mrb[2].mxu1  ;;  %v6734_v49 = vld [vmem:[#allocation2 + $0x28] sm:$0xff]  ;;  %v6736_v50 = vld [vmem:[#allocation2 + $0x30] sm:$0xff]  ;;  %v6738_v52 = vld [vmem:[#allocation2 + $0x38] sm:$0xff] }
 0x299   : > { %v797_v60 = vpop.f32.mrb[3].mxu0  ;;  %v838_v61 = vpop.f32.mrb[3].mxu1 }
 0x29a   : > { %v1308_v62 = vrot.slane %v1298_v54, %v6646_v51  ;;  %v1315_v63 = vrot.slane %v1299_v55, %v6646_v51  ;;  %v1322_v0 = vrot.slane %v1300_v56, %v6646_v51  ;;  %v1329_v1 = vrot.slane %v1301_v57, %v6646_v51 }
 0x29c   : > { %v1330_v2 = vcombine.low %v1308_v62, %v1322_v0  ;;  %v1331_v3 = vcombine.high %v1308_v62, %v1322_v0  ;;  %v1332_v4 = vcombine.low %v1315_v63, %v1329_v1  ;;  %v1333_v5 = vcombine.high %v1315_v63, %v1329_v1 }
 0x29e   : > { %v1340_v10 = vrot.slane %v1330_v2, %v6646_v51  ;;  %v1347_v11 = vrot.slane %v1332_v4, %v6646_v51  ;;  %v1354_v12 = vrot.slane %v1331_v3, %v6646_v51  ;;  %v1361_v13 = vrot.slane %v1333_v5, %v6646_v51 }
 0x2a0   : > { %v1362_v14 = vcombine.high %v1340_v10, %v1340_v10  ;;  %v1363_v15 = vcombine.high %v1347_v11, %v1347_v11  ;;  %v1364_v16 = vcombine.high %v1354_v12, %v1354_v12  ;;  %v1365_v17 = vcombine.high %v1361_v13, %v1361_v13 }
 0x2a1   : > { %v1377_v18 = vrot.slane %v1340_v10, %v6653_v6  ;;  %v1381_v19 = vrot.slane %v1340_v10, %v6656_v7  ;;  %v1385_v20 = vrot.slane %v1340_v10, %v6659_v8  ;;  %v1389_v21 = vrot.slane %v1340_v10, %v6662_v9 }
 0x2a2   : > { %v1393_v22 = vrot.slane %v1354_v12, %v6653_v6  ;;  %v1397_v23 = vrot.slane %v1354_v12, %v6656_v7  ;;  %v1401_v24 = vrot.slane %v1354_v12, %v6659_v8  ;;  %v1405_v25 = vrot.slane %v1354_v12, %v6662_v9 }
 0x2a3   : > { %v6677_v26 = vrot.slane %v1362_v14, %v6653_v6  ;;  %v6680_v27 = vrot.slane %v1362_v14, %v6656_v7  ;;  %v6683_v28 = vrot.slane %v1362_v14, %v6659_v8  ;;  %v6686_v29 = vrot.slane %v1362_v14, %v6662_v9 }
 0x2a4   : > { %v6689_v30 = vrot.slane %v1364_v16, %v6653_v6  ;;  %v6692_v31 = vrot.slane %v1364_v16, %v6656_v7  ;;  %v6695_v32 = vrot.slane %v1364_v16, %v6659_v8  ;;  %v6698_v33 = vrot.slane %v1364_v16, %v6662_v9 }
 0x2a5   : > { %v6705_v37 = vrot.slane %v1347_v11, %v6653_v6  ;;  %v6708_v38 = vrot.slane %v1347_v11, %v6656_v7  ;;  %v6711_v39 = vrot.slane %v1347_v11, %v6659_v8  ;;  %v6714_v36 = vrot.slane %v1347_v11, %v6662_v9 }
 0x2a6   : > { %v6723_v43 = vrot.slane %v1361_v13, %v6653_v6  ;;  %v6726_v44 = vrot.slane %v1361_v13, %v6656_v7  ;;  %v6729_v45 = vrot.slane %v1361_v13, %v6659_v8  ;;  %v6732_v47 = vrot.slane %v1361_v13, %v6662_v9 }
 0x2a7   : > { %v6741_v53 = vrot.slane %v1363_v15, %v6653_v6  ;;  %v6744_v54 = vrot.slane %v1363_v15, %v6656_v7  ;;  %v6747_v55 = vrot.slane %v1363_v15, %v6659_v8  ;;  %v6750_v56 = vrot.slane %v1363_v15, %v6662_v9 }
 0x2a8   : > { %v6753_v57 = vrot.slane %v1365_v17, %v6653_v6  ;;  %v6756_v58 = vrot.slane %v1365_v17, %v6656_v7  ;;  %v6759_v59 = vrot.slane %v1365_v17, %v6659_v8  ;;  %v6762_v60 = vrot.slane %v1365_v17, %v6662_v9 }
 0x2a9   : > { %v1534_v61 = vadd.f32 %v1377_v18, %v6700_v34  ;;  %v1535_v62 = vadd.f32 %v1381_v19, %v6702_v35  ;;  %v1536_v63 = vadd.f32 %v1385_v20, %v6716_v40  ;;  %v1537_v0 = vadd.f32 %v1389_v21, %v6718_v41 }
 0x2aa   : > { %v1538_v1 = vadd.f32 %v1377_v18, %v6720_v42  ;;  %v1539_v2 = vadd.f32 %v1381_v19, %v6734_v49  ;;  %v1540_v3 = vadd.f32 %v1385_v20, %v6736_v50  ;;  %v1541_v4 = vadd.f32 %v1389_v21, %v6738_v52 }
 0x2ab   : > { %v1542_v5 = vadd.f32 %v1393_v22, %v6700_v34  ;;  %v1543_v10 = vadd.f32 %v1397_v23, %v6702_v35  ;;  %v1544_v11 = vadd.f32 %v1401_v24, %v6716_v40  ;;  %v1545_v12 = vadd.f32 %v1405_v25, %v6718_v41  ;;  %1598 = vst [vmem:[#allocation3] sm:$0xff] %v1534_v61 }
 0x2ac   : > { %1599 = vst [vmem:[#allocation3 + $0x8] sm:$0xff] %v1535_v62  ;;  %1600 = vst [vmem:[#allocation3 + $0x10] sm:$0xff] %v1536_v63  ;;  %v1546_v13 = vadd.f32 %v1393_v22, %v6720_v42  ;;  %v1547_v14 = vadd.f32 %v1397_v23, %v6734_v49  ;;  %v1548_v15 = vadd.f32 %v1401_v24, %v6736_v50 }
 0x2ad   : > { %1601 = vst [vmem:[#allocation3 + $0x18] sm:$0xff] %v1537_v0  ;;  %v1549_v16 = vadd.f32 %v1405_v25, %v6738_v52  ;;  %1602 = vst [vmem:[#allocation3 + $0x20] sm:$0xff] %v1538_v1  ;;  %v1550_v17 = vadd.f32 %v6677_v26, %v6700_v34  ;;  %v1551_v18 = vadd.f32 %v6680_v27, %v6702_v35 }
 0x2ae   : > { %1603 = vst [vmem:[#allocation3 + $0x28] sm:$0xff] %v1539_v2  ;;  %1604 = vst [vmem:[#allocation3 + $0x30] sm:$0xff] %v1540_v3  ;;  %v1552_v19 = vadd.f32 %v6683_v28, %v6716_v40  ;;  %v1553_v20 = vadd.f32 %v6686_v29, %v6718_v41  ;;  %v1554_v21 = vadd.f32 %v6677_v26, %v6720_v42  ;;  %v6796_v25 = vpop.f32.mrb[4].mxu0  ;;  %v6798_v61 = vpop.f32.mrb[4].mxu1 }
 0x2af   : > { %1605 = vst [vmem:[#allocation3 + $0x38] sm:$0xff] %v1541_v4  ;;  %1606 = vst [vmem:[#allocation3 + $0x40] sm:$0xff] %v1542_v5  ;;  %v1555_v22 = vadd.f32 %v6680_v27, %v6734_v49  ;;  %v1556_v23 = vadd.f32 %v6683_v28, %v6736_v50  ;;  %v1557_v24 = vadd.f32 %v6686_v29, %v6738_v52  ;;  %v6808_v62 = vpop.f32.mrb[5].mxu0  ;;  %v6810_v63 = vpop.f32.mrb[5].mxu1 }
 0x2b0   : > { %1607 = vst [vmem:[#allocation3 + $0x48] sm:$0xff] %v1543_v10  ;;  %1608 = vst [vmem:[#allocation3 + $0x50] sm:$0xff] %v1544_v11  ;;  %v1558_v26 = vadd.f32 %v6689_v30, %v6700_v34  ;;  %v1559_v27 = vadd.f32 %v6692_v31, %v6702_v35  ;;  %v1560_v28 = vadd.f32 %v6695_v32, %v6716_v40  ;;  %v1023_v4 = vpop.f32.mrb[6].mxu0  ;;  %v1064_v5 = vpop.f32.mrb[6].mxu1 }
 0x2b1   : > { %1609 = vst [vmem:[#allocation3 + $0x58] sm:$0xff] %v1545_v12  ;;  %1610 = vst [vmem:[#allocation3 + $0x60] sm:$0xff] %v1546_v13  ;;  %v1561_v29 = vadd.f32 %v6698_v33, %v6718_v41  ;;  %v1562_v0 = vadd.f32 %v6689_v30, %v6720_v42  ;;  %v1563_v1 = vadd.f32 %v6692_v31, %v6734_v49  ;;  %v1065_v11 = vpop.f32.mrb[7].mxu1 }
 0x2b2   : > { %1611 = vst [vmem:[#allocation3 + $0x68] sm:$0xff] %v1547_v14  ;;  %1612 = vst [vmem:[#allocation3 + $0x70] sm:$0xff] %v1548_v15  ;;  %v1564_v2 = vadd.f32 %v6695_v32, %v6736_v50  ;;  %v1565_v3 = vadd.f32 %v6698_v33, %v6738_v52  ;;  %v1566_v10 = vadd.f32 %v6705_v37, %v6700_v34  ;;  %v1024_v33 = vpop.f32.mrb[7].mxu0 }
 0x2b3   : > { %1613 = vst [vmem:[#allocation3 + $0x78] sm:$0xff] %v1549_v16  ;;  %1614 = vst [vmem:[#allocation3 + $0x80] sm:$0xff] %v1550_v17  ;;  %v1567_v30 = vadd.f32 %v6708_v38, %v6702_v35  ;;  %v1568_v31 = vadd.f32 %v6711_v39, %v6716_v40  ;;  %v1569_v32 = vadd.f32 %v6714_v36, %v6718_v41 }
 0x2b4   : > { %1615 = vst [vmem:[#allocation3 + $0x88] sm:$0xff] %v1551_v18  ;;  %1616 = vst [vmem:[#allocation3 + $0x90] sm:$0xff] %v1552_v19  ;;  %v1570_v12 = vadd.f32 %v6705_v37, %v6720_v42  ;;  %v1571_v13 = vadd.f32 %v6708_v38, %v6734_v49  ;;  %v1572_v14 = vadd.f32 %v6711_v39, %v6736_v50 }
 0x2b5   : > { %1617 = vst [vmem:[#allocation3 + $0x98] sm:$0xff] %v1553_v20  ;;  %1618 = vst [vmem:[#allocation3 + $0xa0] sm:$0xff] %v1554_v21  ;;  %v1573_v15 = vadd.f32 %v6714_v36, %v6738_v52  ;;  %v1574_v16 = vadd.f32 %v6723_v43, %v6700_v34  ;;  %v1575_v17 = vadd.f32 %v6726_v44, %v6702_v35 }
 0x2b6   : > { %1619 = vst [vmem:[#allocation3 + $0xa8] sm:$0xff] %v1555_v22  ;;  %1620 = vst [vmem:[#allocation3 + $0xb0] sm:$0xff] %v1556_v23  ;;  %v1576_v37 = vadd.f32 %v6729_v45, %v6716_v40  ;;  %v1577_v38 = vadd.f32 %v6732_v47, %v6718_v41  ;;  %v1578_v39 = vadd.f32 %v6723_v43, %v6720_v42 }
 0x2b7   : > { %1621 = vst [vmem:[#allocation3 + $0xb8] sm:$0xff] %v1557_v24  ;;  %1622 = vst [vmem:[#allocation3 + $0xc0] sm:$0xff] %v1558_v26  ;;  %v1579_v36 = vadd.f32 %v6726_v44, %v6734_v49  ;;  %v1580_v18 = vadd.f32 %v6729_v45, %v6736_v50  ;;  %v1581_v19 = vadd.f32 %v6732_v47, %v6738_v52 }
 0x2b8   : > { %1623 = vst [vmem:[#allocation3 + $0xc8] sm:$0xff] %v1559_v27  ;;  %1624 = vst [vmem:[#allocation3 + $0xd0] sm:$0xff] %v1560_v28  ;;  %v1582_v20 = vadd.f32 %v6741_v53, %v6700_v34  ;;  %v1583_v21 = vadd.f32 %v6744_v54, %v6702_v35  ;;  %v1584_v43 = vadd.f32 %v6747_v55, %v6716_v40  ;;  %v5935_v28 = vld [vmem:[#allocation10 + $0xe8] ss:$16 sps:$4 sm:$0xff] (!%p5308_p0)  }
 0x2b9   : > { %1625 = vst [vmem:[#allocation3 + $0xd8] sm:$0xff] %v1561_v29  ;;  %1626 = vst [vmem:[#allocation3 + $0xe0] sm:$0xff] %v1562_v0  ;;  %v1585_v44 = vadd.f32 %v6750_v56, %v6718_v41  ;;  %v1586_v45 = vadd.f32 %v6741_v53, %v6720_v42  ;;  %v1587_v47 = vadd.f32 %v6744_v54, %v6734_v49  ;;  %v1664_v29 = vld [vmem:[#allocation3 + $0x40] ss:$8 sm:$0xf] }
 0x2ba   : > { %1627 = vst [vmem:[#allocation3 + $0xe8] sm:$0xff] %v1563_v1  ;;  %1628 = vst [vmem:[#allocation3 + $0xf0] sm:$0xff] %v1564_v2  ;;  %v1588_v22 = vadd.f32 %v6747_v55, %v6736_v50  ;;  %v1589_v23 = vadd.f32 %v6750_v56, %v6738_v52  ;;  %v1590_v24 = vadd.f32 %v6753_v57, %v6700_v34 }
 0x2bb   : > { %1629 = vst [vmem:[#allocation3 + $0xf8] sm:$0xff] %v1565_v3  ;;  %1630 = vst [vmem:[#allocation3 + $0x100] sm:$0xff] %v1566_v10  ;;  %v1591_v26 = vadd.f32 %v6756_v58, %v6702_v35  ;;  %v1592_v53 = vadd.f32 %v6759_v59, %v6716_v40  ;;  %v1593_v54 = vadd.f32 %v6762_v60, %v6718_v41 }
 0x2bc   : > { %1631 = vst [vmem:[#allocation3 + $0x108] sm:$0xff] %v1567_v30  ;;  %1632 = vst [vmem:[#allocation3 + $0x110] sm:$0xff] %v1568_v31  ;;  %v1594_v55 = vadd.f32 %v6753_v57, %v6720_v42  ;;  %v1595_v56 = vadd.f32 %v6756_v58, %v6734_v49  ;;  %v1596_v34 = vadd.f32 %v6759_v59, %v6736_v50  ;;  %v1666_v2 = vld [vmem:[#allocation3 + $0x80] ss:$8 sm:$0xf] }
 0x2bd   : > { %1633 = vst [vmem:[#allocation3 + $0x118] sm:$0xff] %v1569_v32  ;;  %1634 = vst [vmem:[#allocation3 + $0x120] sm:$0xff] %v1570_v12  ;;  %v1597_v35 = vadd.f32 %v6762_v60, %v6738_v52  ;;  %v1681_v40 = vcombine.low %v6796_v25, %v6808_v62  ;;  %v1682_v41 = vcombine.high %v6796_v25, %v6808_v62 }
 0x2be   : > { %1635 = vst [vmem:[#allocation3 + $0x128] sm:$0xff] %v1571_v13  ;;  %1636 = vst [vmem:[#allocation3 + $0x130] sm:$0xff] %v1572_v14  ;;  %v1683_v42 = vcombine.low %v6798_v61, %v6810_v63  ;;  %v1684_v49 = vcombine.high %v6798_v61, %v6810_v63  ;;  %v1662_v61 = vld [vmem:[#allocation3] ss:$8 sm:$0xf] }
 0x2bf   : > { %1637 = vst [vmem:[#allocation3 + $0x138] sm:$0xff] %v1573_v15  ;;  %1638 = vst [vmem:[#allocation3 + $0x140] sm:$0xff] %v1574_v16  ;;  %v1691_v50 = vrot.slane %v1681_v40, %v6646_v51  ;;  %v1698_v52 = vrot.slane %v1682_v41, %v6646_v51  ;;  %v1788_v40 = vld [vmem:[#allocation3 + $0x67] ss:$8 sm:$0xf] }
 0x2c0   : > { %1639 = vst [vmem:[#allocation3 + $0x148] sm:$0xff] %v1575_v17  ;;  %1640 = vst [vmem:[#allocation3 + $0x150] sm:$0xff] %v1576_v37  ;;  %v1705_v57 = vrot.slane %v1683_v42, %v6646_v51  ;;  %v1712_v58 = vrot.slane %v1684_v49, %v6646_v51  ;;  %v1668_v3 = vld [vmem:[#allocation3 + $0xc0] ss:$8 sm:$0xf] }
 0x2c1   : > { %1641 = vst [vmem:[#allocation3 + $0x158] sm:$0xff] %v1577_v38  ;;  %1642 = vst [vmem:[#allocation3 + $0x160] sm:$0xff] %v1578_v39 }
 0x2c2   : > { %1643 = vst [vmem:[#allocation3 + $0x168] sm:$0xff] %v1579_v36  ;;  %1644 = vst [vmem:[#allocation3 + $0x170] sm:$0xff] %v1580_v18  ;;  %v1713_v59 = vcombine.low %v1691_v50, %v1705_v57  ;;  %v1714_v60 = vcombine.high %v1691_v50, %v1705_v57  ;;  %v1715_v25 = vcombine.low %v1698_v52, %v1712_v58  ;;  %v1792_v57 = vld [vmem:[#allocation3 + $0xe7] ss:$8 sm:$0xf] }
 0x2c3   : > { %1645 = vst [vmem:[#allocation3 + $0x178] sm:$0xff] %v1581_v19  ;;  %1646 = vst [vmem:[#allocation3 + $0x180] sm:$0xff] %v1582_v20  ;;  %v1716_v27 = vcombine.high %v1698_v52, %v1712_v58  ;;  %v1790_v52 = vld [vmem:[#allocation3 + $0xa7] ss:$8 sm:$0xf] }
 0x2c4   : > { %1647 = vst [vmem:[#allocation3 + $0x188] sm:$0xff] %v1583_v21  ;;  %1648 = vst [vmem:[#allocation3 + $0x190] sm:$0xff] %v1584_v43  ;;  %v1723_v62 = vrot.slane %v1713_v59, %v6646_v51  ;;  %v1730_v63 = vrot.slane %v1715_v25, %v6646_v51  ;;  %v1737_v0 = vrot.slane %v1714_v60, %v6646_v51  ;;  %v1670_v4 = vld [vmem:[#allocation3 + $0x100] ss:$8 sm:$0xf] }
 0x2c5   : > { %1649 = vst [vmem:[#allocation3 + $0x198] sm:$0xff] %v1585_v44  ;;  %1650 = vst [vmem:[#allocation3 + $0x1a0] sm:$0xff] %v1586_v45  ;;  %v1744_v1 = vrot.slane %v1716_v27, %v6646_v51 }
 0x2c6   : > { %1651 = vst [vmem:[#allocation3 + $0x1a8] sm:$0xff] %v1587_v47  ;;  %1652 = vst [vmem:[#allocation3 + $0x1b0] sm:$0xff] %v1588_v22  ;;  %v1745_v10 = vcombine.high %v1723_v62, %v1723_v62  ;;  %v1746_v30 = vcombine.high %v1730_v63, %v1730_v63  ;;  %v1747_v46 = vcombine.high %v1737_v0, %v1737_v0  ;;  %v1246_v38 = vpop.f32.mrb[8].mxu0  ;;  %v1287_v39 = vpop.f32.mrb[8].mxu1 }
 0x2c7   : > { %1653 = vst [vmem:[#allocation3 + $0x1b8] sm:$0xff] %v1589_v23  ;;  %1654 = vst [vmem:[#allocation3 + $0x1c0] sm:$0xff] %v1590_v24  ;;  %v1748_v31 = vcombine.high %v1744_v1, %v1744_v1  ;;  %v1757_v11 = vsub.f32 %v1662_v61, %v1723_v62  ;;  %v1758_v12 = vsub.f32 %v1664_v29, %v1737_v0  ;;  %v1248_v36 = vpop.f32.mrb[9].mxu0  ;;  %v1289_v18 = vpop.f32.mrb[9].mxu1 }
 0x2c8   : > { %1655 = vst [vmem:[#allocation3 + $0x1c8] sm:$0xff] %v1591_v26  ;;  %1656 = vst [vmem:[#allocation3 + $0x1d0] sm:$0xff] %v1592_v53  ;;  %v1672_v5 = vld [vmem:[#allocation3 + $0x140] ss:$8 sm:$0xf]  ;;  %v1761_v13 = vsub.f32 %v1670_v4, %v1730_v63  ;;  %v1759_v15 = vsub.f32 %v1666_v2, %v1745_v10  ;;  %v1760_v16 = vsub.f32 %v1668_v3, %v1747_v46  ;;  %v1250_v44 = vpop.f32.mrb[10].mxu0 }
 0x2c9   : > { %1657 = vst [vmem:[#allocation3 + $0x1d8] sm:$0xff] %v1593_v54  ;;  %1658 = vst [vmem:[#allocation3 + $0x1e0] sm:$0xff] %v1594_v55  ;;  %v1762_v14 = vsub.f32 %v1672_v5, %v1744_v1  ;;  %v1805_v19 = vcombine.low %v1246_v38, %v1248_v36  ;;  %v1806_v20 = vcombine.high %v1246_v38, %v1248_v36  ;;  %v1291_v45 = vpop.f32.mrb[10].mxu1  ;;  %v1251_v47 = vpop.f32.mrb[11].mxu0  ;;  %v6261_v46 = vmov (!%p5308_p0), 0  }
 0x2ca   : > { %1659 = vst [vmem:[#allocation3 + $0x1e8] sm:$0xff] %v1595_v56  ;;  %1660 = vst [vmem:[#allocation3 + $0x1f0] sm:$0xff] %v1596_v34  ;;  %v1807_v21 = vcombine.low %v1287_v39, %v1289_v18  ;;  %v1808_v43 = vcombine.high %v1287_v39, %v1289_v18  ;;  %v1292_v22 = vpop.f32.mrb[11].mxu1  ;;  %v1794_v58 = vld [vmem:[#allocation3 + $0x127] ss:$8 sm:$0xf]  ;;  %2095 = vmatprep.mubr.bf16.mxu0 (!%p5308_p0), %v6261_v46  ;;  %2138 = vmatprep.mubr.bf16.mxu1 (!%p5308_p0), %v6261_v46 }
 0x2cb   : > { %1661 = vst [vmem:[#allocation3 + $0x1f8] sm:$0xff] %v1597_v35  ;;  %1769 = vst.msk [vmem:[#allocation3] ss:$8 sm:$0xf] %vm6897_vm2, %v1757_v11  ;;  %v1815_v23 = vrot.slane %v1805_v19, %v6646_v51  ;;  %v1822_v24 = vrot.slane %v1806_v20, %v6646_v51  ;;  %v5932_v11 = vld [vmem:[#allocation10 + $0xec] ss:$16 sps:$4 sm:$0xff] (!%p5308_p0)  }
 0x2cc   : > { %v1674_v32 = vld [vmem:[#allocation3 + $0x180] ss:$8 sm:$0xf]  ;;  %1771 = vst.msk [vmem:[#allocation3 + $0x40] ss:$8 sm:$0xf] %vm6897_vm2, %v1758_v12  ;;  %v1829_v26 = vrot.slane %v1807_v21, %v6646_v51  ;;  %v1836_v53 = vrot.slane %v1808_v43, %v6646_v51 }
 0x2cd   : > { %v1763_v17 = vsub.f32 %v1674_v32, %v1746_v30  ;;  %1777 = vst.msk [vmem:[#allocation3 + $0x100] ss:$8 sm:$0xf] %vm6897_vm2, %v1761_v13  ;;  %1779 = vst.msk [vmem:[#allocation3 + $0x140] ss:$8 sm:$0xf] %vm6897_vm2, %v1762_v14 }
 0x2ce   : > { %1773 = vst.msk [vmem:[#allocation3 + $0x80] ss:$8 sm:$0xf] %vm6897_vm2, %v1759_v15  ;;  %1775 = vst.msk [vmem:[#allocation3 + $0xc0] ss:$8 sm:$0xf] %vm6897_vm2, %v1760_v16  ;;  %v1837_v54 = vcombine.low %v1815_v23, %v1829_v26  ;;  %v1838_v55 = vcombine.high %v1815_v23, %v1829_v26  ;;  %v1839_v56 = vcombine.low %v1822_v24, %v1836_v53 }
 0x2cf   : > { %1781 = vst.msk [vmem:[#allocation3 + $0x180] ss:$8 sm:$0xf] %vm6897_vm2, %v1763_v17  ;;  %v1840_v34 = vcombine.high %v1822_v24, %v1836_v53  ;;  %v1786_v35 = vld [vmem:[#allocation3 + $0x27] ss:$8 sm:$0xf] }
 0x2d0   : > { %v1676_v33 = vld [vmem:[#allocation3 + $0x1c0] ss:$8 sm:$0xf]  ;;  %v1847_v41 = vrot.slane %v1837_v54, %v6646_v51  ;;  %v1854_v42 = vrot.slane %v1839_v56, %v6646_v51  ;;  %v1861_v49 = vrot.slane %v1838_v55, %v6646_v51  ;;  %v1796_v59 = vld [vmem:[#allocation3 + $0x167] ss:$8 sm:$0xf] }
 0x2d1   : > { %v1764_v37 = vsub.f32 %v1676_v33, %v1748_v31  ;;  %v1868_v50 = vrot.slane %v1840_v34, %v6646_v51  ;;  %v1798_v29 = vld [vmem:[#allocation3 + $0x1a7] ss:$8 sm:$0xf]  ;;  %v5928_v31 = vld [vmem:[#allocation10 + $0xc0] ss:$16 sps:$4 sm:$0xff] (!%p5308_p0)  }
 0x2d2   : > { %v1869_v60 = vcombine.high %v1847_v41, %v1847_v41  ;;  %v1870_v25 = vcombine.high %v1854_v42, %v1854_v42  ;;  %v1871_v27 = vcombine.high %v1861_v49, %v1861_v49  ;;  %v1800_v62 = vld [vmem:[#allocation3 + $0x1e7] ss:$8 sm:$0xf]  ;;  %v1881_v63 = vsub.f32 %v1786_v35, %v1847_v41  ;;  %1907 = sbr.rel (%p5308_p0) target bundleno = 967 (0x3c7), region = 68  ;;  %v5929_v32 = vld [vmem:[#allocation10 + $0xc8] ss:$16 sps:$4 sm:$0xff] (!%p5308_p0)  }
 0x2d3   : > { %1783 = vst.msk [vmem:[#allocation3 + $0x1c0] ss:$8 sm:$0xf] %vm6897_vm2, %v1764_v37  ;;  %v1872_v61 = vcombine.high %v1868_v50, %v1868_v50  ;;  %v1882_v0 = vsub.f32 %v1788_v40, %v1861_v49  ;;  %v1885_v1 = vsub.f32 %v1794_v58, %v1854_v42  ;;  %v1886_v2 = vsub.f32 %v1796_v59, %v1868_v50  ;;  %v5924_v51 = vld [vmem:[#allocation10 + $0xc4] ss:$16 sps:$4 sm:$0xff] (!%p5308_p0)   ;;  %v2149_v22 = vld [vmem:[#allocation3] sm:$0xff] (!%p5308_p0) }
 0x2d4   : > { %v1883_v3 = vsub.f32 %v1790_v52, %v1869_v60  ;;  %v1884_v4 = vsub.f32 %v1792_v57, %v1871_v27  ;;  %v1887_v5 = vsub.f32 %v1798_v29, %v1870_v25  ;;  %1889 = vst.msk [vmem:[#allocation3 + $0x27] ss:$8 sm:$0xf] %vm6897_vm2, %v1881_v63  ;;  %v5926_v30 = vld [vmem:[#allocation10 + $0xcc] ss:$16 sps:$4 sm:$0xff] (!%p5308_p0)   ;;  %2063 = vmatprep.subr.bf16.mxu0 (!%p5308_p0), %v5924_v51  ;;  %v2150_v24 = vld [vmem:[#allocation3 + $0x8] sm:$0xff] (!%p5308_p0) }
 0x2d5   : > { %v1888_v10 = vsub.f32 %v1800_v62, %v1872_v61  ;;  %1891 = vst.msk [vmem:[#allocation3 + $0x67] ss:$8 sm:$0xf] %vm6897_vm2, %v1882_v0  ;;  %1897 = vst.msk [vmem:[#allocation3 + $0x127] ss:$8 sm:$0xf] %vm6897_vm2, %v1885_v1  ;;  %2106 = vmatprep.subr.bf16.mxu1 (!%p5308_p0), %v5926_v30  ;;  %2064 = vmatpush1.bf16.msra.mxu0 (!%p5308_p0), %v5928_v31 }
 0x2d6   : > { %1899 = vst.msk [vmem:[#allocation3 + $0x167] ss:$8 sm:$0xf] %vm6897_vm2, %v1886_v2  ;;  %1893 = vst.msk [vmem:[#allocation3 + $0xa7] ss:$8 sm:$0xf] %vm6897_vm2, %v1883_v3  ;;  %2107 = vmatpush1.bf16.msra.mxu1 (!%p5308_p0), %v5929_v32 }
 0x2d7   : > { %1895 = vst.msk [vmem:[#allocation3 + $0xe7] ss:$8 sm:$0xf] %vm6897_vm2, %v1884_v4  ;;  %1901 = vst.msk [vmem:[#allocation3 + $0x1a7] ss:$8 sm:$0xf] %vm6897_vm2, %v1887_v5  ;;  %2108 = vmatprep.subr.bf16.mxu1 (!%p5308_p0), %v5932_v11 }
 0x2d8   : > { %1903 = vst.msk [vmem:[#allocation3 + $0x1e7] ss:$8 sm:$0xf] %vm6897_vm2, %v1888_v10  ;;  %v5930_v33 = vld [vmem:[#allocation10 + $0xe4] ss:$16 sps:$4 sm:$0xff] (!%p5308_p0)   ;;  %v2151_v23 = vld [vmem:[#allocation3 + $0x10] sm:$0xff] (!%p5308_p0) }
 0x2d9   : > { %v5934_v12 = vld [vmem:[#allocation10 + $0xe0] ss:$16 sps:$4 sm:$0xff]   ;;  %2065 = vmatprep.subr.bf16.mxu0 %v5930_v33  ;;  %v5936_v13 = vld [vmem:[#allocation10 + $0x104] ss:$16 sps:$4 sm:$0xff]   ;;  %v5938_v14 = vld [vmem:[#allocation10 + $0x10c] ss:$16 sps:$4 sm:$0xff]  }
 0x2da   : > { %v5940_v15 = vld [vmem:[#allocation10 + $0x100] ss:$16 sps:$4 sm:$0xff]   ;;  %v5941_v16 = vld [vmem:[#allocation10 + $0x108] ss:$16 sps:$4 sm:$0xff]   ;;  %2066 = vmatpush1.bf16.msra.mxu0 %v5934_v12  ;;  %2109 = vmatpush1.bf16.msra.mxu1 %v5935_v28  ;;  %v5942_v17 = vld [vmem:[#allocation10 + $0x124] ss:$16 sps:$4 sm:$0xff]  }
 0x2db   : > { %2067 = vmatprep.subr.bf16.mxu0 %v5936_v13  ;;  %2110 = vmatprep.subr.bf16.mxu1 %v5938_v14  ;;  %v5944_v37 = vld [vmem:[#allocation10 + $0x12c] ss:$16 sps:$4 sm:$0xff]   ;;  %v5946_v38 = vld [vmem:[#allocation10 + $0x120] ss:$16 sps:$4 sm:$0xff]   ;;  %v5947_v39 = vld [vmem:[#allocation10 + $0x128] ss:$16 sps:$4 sm:$0xff]  }
 0x2dc   : > { %v5948_v36 = vld [vmem:[#allocation10 + $0x144] ss:$16 sps:$4 sm:$0xff]   ;;  %v5950_v18 = vld [vmem:[#allocation10 + $0x14c] ss:$16 sps:$4 sm:$0xff]   ;;  %v5952_v19 = vld [vmem:[#allocation10 + $0x140] ss:$16 sps:$4 sm:$0xff]  }
 0x2dd   : > { %v5953_v20 = vld [vmem:[#allocation10 + $0x148] ss:$16 sps:$4 sm:$0xff]   ;;  %v5954_v21 = vld [vmem:[#allocation10 + $0x164] ss:$16 sps:$4 sm:$0xff]   ;;  %v5956_v43 = vld [vmem:[#allocation10 + $0x16c] ss:$16 sps:$4 sm:$0xff]  }
 0x2de   : > { %2068 = vmatpush1.bf16.msra.mxu0 %v5940_v15  ;;  %2111 = vmatpush1.bf16.msra.mxu1 %v5941_v16  ;;  %v5958_v44 = vld [vmem:[#allocation10 + $0x160] ss:$16 sps:$4 sm:$0xff]   ;;  %v5959_v45 = vld [vmem:[#allocation10 + $0x168] ss:$16 sps:$4 sm:$0xff]  }
 0x2df   : > { %2069 = vmatprep.subr.bf16.mxu0 %v5942_v17  ;;  %2112 = vmatprep.subr.bf16.mxu1 %v5944_v37  ;;  %v5960_v47 = vld [vmem:[%s6600_s29] sm:$0xff]   ;;  %v2152_v26 = vld [vmem:[#allocation3 + $0x18] sm:$0xff]  ;;  %v2153_v55 = vld [vmem:[#allocation3 + $0x20] sm:$0xff] }
 0x2e0   : > { %v2155_v56 = vld [vmem:[#allocation3 + $0x30] sm:$0xff]  ;;  %v2154_v42 = vld [vmem:[#allocation3 + $0x28] sm:$0xff]  ;;  %v2156_v49 = vld [vmem:[#allocation3 + $0x38] sm:$0xff] }
 0x2e2   : > { %2070 = vmatpush1.bf16.msra.mxu0 %v5946_v38  ;;  %2113 = vmatpush1.bf16.msra.mxu1 %v5947_v39 }
 0x2e3   : > { %2071 = vmatprep.subr.bf16.mxu0 %v5948_v36  ;;  %2114 = vmatprep.subr.bf16.mxu1 %v5950_v18 }
 0x2e6   : > { %2072 = vmatpush1.bf16.msra.mxu0 %v5952_v19  ;;  %2115 = vmatpush1.bf16.msra.mxu1 %v5953_v20 }
 0x2e7   : > { %2073 = vmatprep.subr.bf16.mxu0 %v5954_v21  ;;  %2116 = vmatprep.subr.bf16.mxu1 %v5956_v43 }
 0x2ea   : > { %2074 = vmatpush1.bf16.msra.mxu0 %v5958_v44  ;;  %2117 = vmatpush1.bf16.msra.mxu1 %v5959_v45 }
 0x2ed   : > { %5440 = vmatmul.mubr.msk.bf16.vlgmr.msra.gmra.mrb[0].mxu0 %vm754_vm1, %v5960_v47  ;;  %5441 = vmatmul.mubr.msk.bf16.vlgmr.msra.gmra.mrb[0].mxu1 %vm754_vm1, %v5960_v47 }
 0x3c0   : > { %v2097_v53 = vpop.f32.mrb[0].mxu0  ;;  %v2140_v54 = vpop.f32.mrb[0].mxu1 }
 0x3c1   : > { %v2157_v34 = vsub.f32 %v2149_v22, %v2097_v53  ;;  %v2159_v35 = vsub.f32 %v2151_v23, %v2140_v54  ;;  %v2099_v40 = vpop.f32.mrb[1].mxu0  ;;  %v2142_v41 = vpop.f32.mrb[1].mxu1 }
 0x3c2   : > { %v2158_v50 = vsub.f32 %v2150_v24, %v2099_v40  ;;  %v2160_v52 = vsub.f32 %v2152_v26, %v2142_v41  ;;  %v2101_v57 = vpop.f32.mrb[2].mxu0  ;;  %v2144_v58 = vpop.f32.mrb[2].mxu1 }
 0x3c3   : > { %2165 = vst [vmem:[#allocation3] sm:$0xff] %v2157_v34  ;;  %2167 = vst [vmem:[#allocation3 + $0x10] sm:$0xff] %v2159_v35  ;;  %v2161_v59 = vsub.f32 %v2153_v55, %v2101_v57  ;;  %v2163_v60 = vsub.f32 %v2155_v56, %v2144_v58  ;;  %v2103_v25 = vpop.f32.mrb[3].mxu0  ;;  %v2146_v27 = vpop.f32.mrb[3].mxu1 }
 0x3c4   : > { %2166 = vst [vmem:[#allocation3 + $0x8] sm:$0xff] %v2158_v50  ;;  %2168 = vst [vmem:[#allocation3 + $0x18] sm:$0xff] %v2160_v52  ;;  %v2162_v61 = vsub.f32 %v2154_v42, %v2103_v25  ;;  %v2164_v29 = vsub.f32 %v2156_v49, %v2146_v27 }
 0x3c5   : > { %2169 = vst [vmem:[#allocation3 + $0x20] sm:$0xff] %v2161_v59  ;;  %2171 = vst [vmem:[#allocation3 + $0x30] sm:$0xff] %v2163_v60 }
 0x3c6   : > { %2170 = vst [vmem:[#allocation3 + $0x28] sm:$0xff] %v2162_v61  ;;  %2172 = vst [vmem:[#allocation3 + $0x38] sm:$0xff] %v2164_v29 }
 0x3c7 PF: > { %p5442_p2 = scmp.ne.s32.totalorder %s6232_s27, 1 }
 0x3c8   : > { %v5961_v62 = vld [vmem:[#allocation10 + $0x184] ss:$16 sps:$4 sm:$0xff] (!%p5442_p2)   ;;  %v5963_v63 = vld [vmem:[#allocation10 + $0x18c] ss:$16 sps:$4 sm:$0xff] (!%p5442_p2)   ;;  %v6262_v0 = vmov (!%p5442_p2), 0  }
 0x3c9   : > { %2176 = sbr.rel (%p5442_p2) target bundleno = 1212 (0x4bc), region = 72  ;;  %2364 = vmatprep.mubr.bf16.mxu0 (!%p5442_p2), %v6262_v0  ;;  %2407 = vmatprep.mubr.bf16.mxu1 (!%p5442_p2), %v6262_v0  ;;  %v5965_v1 = vld [vmem:[#allocation10 + $0x180] ss:$16 sps:$4 sm:$0xff] (!%p5442_p2)   ;;  %v5966_v2 = vld [vmem:[#allocation10 + $0x188] ss:$16 sps:$4 sm:$0xff] (!%p5442_p2)  }
 0x3ca   : > { %2332 = vmatprep.subr.bf16.mxu0 (!%p5442_p2), %v5961_v62  ;;  %2375 = vmatprep.subr.bf16.mxu1 (!%p5442_p2), %v5963_v63  ;;  %v5967_v3 = vld [vmem:[#allocation10 + $0x1a4] ss:$16 sps:$4 sm:$0xff] (!%p5442_p2)   ;;  %v5969_v4 = vld [vmem:[#allocation10 + $0x1ac] ss:$16 sps:$4 sm:$0xff] (!%p5442_p2)   ;;  %v5971_v5 = vld [vmem:[#allocation10 + $0x1a0] ss:$16 sps:$4 sm:$0xff] (!%p5442_p2)  }
 0x3cb   : > { %2333 = vmatpush1.bf16.msra.mxu0 (!%p5442_p2), %v5965_v1  ;;  %2376 = vmatpush1.bf16.msra.mxu1 (!%p5442_p2), %v5966_v2  ;;  %v5972_v10 = vld [vmem:[#allocation10 + $0x1a8] ss:$16 sps:$4 sm:$0xff] (!%p5442_p2)   ;;  %v5973_v51 = vld [vmem:[#allocation10 + $0x1c4] ss:$16 sps:$4 sm:$0xff] (!%p5442_p2)   ;;  %v5975_v30 = vld [vmem:[#allocation10 + $0x1cc] ss:$16 sps:$4 sm:$0xff] (!%p5442_p2)  }
 0x3cc   : > { %2334 = vmatprep.subr.bf16.mxu0 (!%p5442_p2), %v5967_v3  ;;  %2377 = vmatprep.subr.bf16.mxu1 (!%p5442_p2), %v5969_v4  ;;  %v5977_v46 = vld [vmem:[#allocation10 + $0x1c0] ss:$16 sps:$4 sm:$0xff] (!%p5442_p2)   ;;  %v5978_v31 = vld [vmem:[#allocation10 + $0x1c8] ss:$16 sps:$4 sm:$0xff] (!%p5442_p2)   ;;  %v5979_v32 = vld [vmem:[#allocation10 + $0x1e4] ss:$16 sps:$4 sm:$0xff] (!%p5442_p2)  }
 0x3cd   : > { %v5981_v33 = vld [vmem:[#allocation10 + $0x1ec] ss:$16 sps:$4 sm:$0xff] (!%p5442_p2)   ;;  %v5983_v11 = vld [vmem:[#allocation10 + $0x1e0] ss:$16 sps:$4 sm:$0xff] (!%p5442_p2)   ;;  %v5984_v12 = vld [vmem:[#allocation10 + $0x1e8] ss:$16 sps:$4 sm:$0xff] (!%p5442_p2)  }
 0x3ce   : > { %v5985_v28 = vld [vmem:[#allocation10 + $0x204] ss:$16 sps:$4 sm:$0xff] (!%p5442_p2)   ;;  %v5987_v13 = vld [vmem:[#allocation10 + $0x20c] ss:$16 sps:$4 sm:$0xff] (!%p5442_p2)   ;;  %v5989_v14 = vld [vmem:[#allocation10 + $0x200] ss:$16 sps:$4 sm:$0xff] (!%p5442_p2)  }
 0x3cf   : > { %2335 = vmatpush1.bf16.msra.mxu0 (!%p5442_p2), %v5971_v5  ;;  %2378 = vmatpush1.bf16.msra.mxu1 (!%p5442_p2), %v5972_v10  ;;  %v5990_v15 = vld [vmem:[#allocation10 + $0x208] ss:$16 sps:$4 sm:$0xff] (!%p5442_p2)   ;;  %v5991_v16 = vld [vmem:[#allocation10 + $0x224] ss:$16 sps:$4 sm:$0xff] (!%p5442_p2)   ;;  %v5993_v17 = vld [vmem:[#allocation10 + $0x22c] ss:$16 sps:$4 sm:$0xff] (!%p5442_p2)  }
 0x3d0   : > { %2336 = vmatprep.subr.bf16.mxu0 %v5973_v51  ;;  %2379 = vmatprep.subr.bf16.mxu1 %v5975_v30  ;;  %v5995_v37 = vld [vmem:[#allocation10 + $0x220] ss:$16 sps:$4 sm:$0xff]   ;;  %v5996_v38 = vld [vmem:[#allocation10 + $0x228] ss:$16 sps:$4 sm:$0xff]  }
 0x3d1   : > { %v5997_v39 = vld [vmem:[%s6600_s29] sm:$0xff]   ;;  %v2419_v36 = vld [vmem:[#allocation3 + $0x1c0] sm:$0xff]  ;;  %v2422_v20 = vld [vmem:[#allocation3 + $0x1d8] sm:$0xff] }
 0x3d2   : > { %v2421_v18 = vld [vmem:[#allocation3 + $0x1d0] sm:$0xff]  ;;  %v2420_v19 = vld [vmem:[#allocation3 + $0x1c8] sm:$0xff]  ;;  %v2423_v44 = vld [vmem:[#allocation3 + $0x1e0] sm:$0xff] }
 0x3d3   : > { %2337 = vmatpush1.bf16.msra.mxu0 %v5977_v46  ;;  %2380 = vmatpush1.bf16.msra.mxu1 %v5978_v31  ;;  %v2425_v45 = vld [vmem:[#allocation3 + $0x1f0] sm:$0xff]  ;;  %v2424_v26 = vld [vmem:[#allocation3 + $0x1e8] sm:$0xff]  ;;  %v2426_v53 = vld [vmem:[#allocation3 + $0x1f8] sm:$0xff] }
 0x3d4   : > { %2338 = vmatprep.subr.bf16.mxu0 %v5979_v32  ;;  %2381 = vmatprep.subr.bf16.mxu1 %v5981_v33 }
 0x3d7   : > { %2339 = vmatpush1.bf16.msra.mxu0 %v5983_v11  ;;  %2382 = vmatpush1.bf16.msra.mxu1 %v5984_v12 }
 0x3d8   : > { %2340 = vmatprep.subr.bf16.mxu0 %v5985_v28  ;;  %2383 = vmatprep.subr.bf16.mxu1 %v5987_v13 }
 0x3db   : > { %2341 = vmatpush1.bf16.msra.mxu0 %v5989_v14  ;;  %2384 = vmatpush1.bf16.msra.mxu1 %v5990_v15 }
 0x3dc   : > { %2342 = vmatprep.subr.bf16.mxu0 %v5991_v16  ;;  %2385 = vmatprep.subr.bf16.mxu1 %v5993_v17 }
 0x3df   : > { %2343 = vmatpush1.bf16.msra.mxu0 %v5995_v37  ;;  %2386 = vmatpush1.bf16.msra.mxu1 %v5996_v38 }
 0x3e2   : > { %5468 = vmatmul.mubr.msk.bf16.vlgmr.msra.gmra.mrb[0].mxu0 %vm754_vm1, %v5997_v39  ;;  %5469 = vmatmul.mubr.msk.bf16.vlgmr.msra.gmra.mrb[0].mxu1 %vm754_vm1, %v5997_v39 }
 0x4b5   : > { %v2366_v21 = vpop.f32.mrb[0].mxu0  ;;  %v2409_v43 = vpop.f32.mrb[0].mxu1 }
 0x4b6   : > { %v2427_v47 = vsub.f32 %v2419_v36, %v2366_v21  ;;  %v2429_v22 = vsub.f32 %v2421_v18, %v2409_v43  ;;  %v2368_v23 = vpop.f32.mrb[1].mxu0  ;;  %v2411_v24 = vpop.f32.mrb[1].mxu1 }
 0x4b7   : > { %v2428_v54 = vsub.f32 %v2420_v19, %v2368_v23  ;;  %v2430_v55 = vsub.f32 %v2422_v20, %v2411_v24  ;;  %v2370_v56 = vpop.f32.mrb[2].mxu0  ;;  %v2413_v34 = vpop.f32.mrb[2].mxu1 }
 0x4b8   : > { %2435 = vst [vmem:[#allocation3 + $0x1c0] sm:$0xff] %v2427_v47  ;;  %2437 = vst [vmem:[#allocation3 + $0x1d0] sm:$0xff] %v2429_v22  ;;  %v2431_v35 = vsub.f32 %v2423_v44, %v2370_v56  ;;  %v2433_v40 = vsub.f32 %v2425_v45, %v2413_v34  ;;  %v2372_v41 = vpop.f32.mrb[3].mxu0  ;;  %v2415_v42 = vpop.f32.mrb[3].mxu1 }
 0x4b9   : > { %2436 = vst [vmem:[#allocation3 + $0x1c8] sm:$0xff] %v2428_v54  ;;  %2438 = vst [vmem:[#allocation3 + $0x1d8] sm:$0xff] %v2430_v55  ;;  %v2432_v49 = vsub.f32 %v2424_v26, %v2372_v41  ;;  %v2434_v50 = vsub.f32 %v2426_v53, %v2415_v42 }
 0x4ba   : > { %2439 = vst [vmem:[#allocation3 + $0x1e0] sm:$0xff] %v2431_v35  ;;  %2441 = vst [vmem:[#allocation3 + $0x1f0] sm:$0xff] %v2433_v40 }
 0x4bb   : > { %2440 = vst [vmem:[#allocation3 + $0x1e8] sm:$0xff] %v2432_v49  ;;  %2442 = vst [vmem:[#allocation3 + $0x1f8] sm:$0xff] %v2434_v50 }
 0x4bc PF: > { %v6263_v52 = vmov 1983009808   ;;  %v2443_v59 = vld [vmem:[#allocation3] sm:$0xff]  ;;  %v2444_v60 = vld [vmem:[#allocation3 + $0x8] sm:$0xff]  ;;  %v2445_v25 = vld [vmem:[#allocation3 + $0x10] sm:$0xff]  ;;  %s9946_s28 = sld [smem:[#allocation56_spill]] }
 0x4bd   : > { %v2812_v57 = vunpack.c.l.s4 %v6263_v52  ;;  %v2446_v27 = vld [vmem:[#allocation3 + $0x18] sm:$0xff]  ;;  %v2447_v61 = vld [vmem:[#allocation3 + $0x20] sm:$0xff]  ;;  %v2448_v29 = vld [vmem:[#allocation3 + $0x28] sm:$0xff]  ;;  %v6964_v51 = vsub.s32 4, %v6643_v48  ;;  %v6967_v30 = vsub.s32 6, %v6643_v48  ;;  %vm4888_vm3 = vcmask 1041409  }
 0x4be   : > { %v2449_v62 = vld [vmem:[#allocation3 + $0x30] sm:$0xff]  ;;  %v2450_v63 = vld [vmem:[#allocation3 + $0x38] sm:$0xff]  ;;  %v2451_v0 = vld [vmem:[#allocation3 + $0x40] sm:$0xff]  ;;  %vm4891_vm4 = vcmask 1042434   ;;  %vm4894_vm5 = vcmask 1043459   ;;  %vm4897_vm6 = vcmask 1044484  }
 0x4bf   : > { %v2813_v58 = vunpack.c.0.s8 %v2812_v57  ;;  %v2452_v1 = vld [vmem:[#allocation3 + $0x48] sm:$0xff]  ;;  %v2453_v2 = vld [vmem:[#allocation3 + $0x50] sm:$0xff]  ;;  %v2454_v3 = vld [vmem:[#allocation3 + $0x58] sm:$0xff]  ;;  %9948 = vst [vmem:[#allocation27_spill] sm:$0xff] %v6964_v51  ;;  %vm4900_vm7 = vcmask 1045509   ;;  %vm4903_vm8 = vcmask 1046534  }
 0x4c0   : > { %v2507_v4 = vld [vmem:[%s9771_s4] sm:$0xf]  ;;  %9949 = vst [vmem:[#allocation28_spill] sm:$0xff] %v6967_v30  ;;  %v2456_v31 = vld [vmem:[#allocation3 + $0x68] sm:$0xff]  ;;  %v2457_v32 = vld [vmem:[#allocation3 + $0x70] sm:$0xff]  ;;  %vm4906_vm9 = vcmask 1047559  }
 0x4c1   : > { %v6961_v10 = vsub.s32 %v2813_v58, %v6643_v48  ;;  %v2455_v46 = vld [vmem:[#allocation3 + $0x60] sm:$0xff]  ;;  %v2458_v33 = vld [vmem:[#allocation3 + $0x78] sm:$0xff]  ;;  %v6970_v11 = vrot.slane %v2507_v4, %v6653_v6  ;;  %v6973_v12 = vrot.slane %v2507_v4, %v6656_v7  ;;  %v6976_v28 = vrot.slane %v2507_v4, %v6659_v8  ;;  %v2460_v15 = vld [vmem:[#allocation3 + $0x88] sm:$0xff]  ;;  %s10523_s18 = sld [smem:[#allocation18_spill]]  ;;  %s5638_s12 = sshll.u32 %s6232_s27, 4 }
 0x4c2   : > { %v2593_v5 = vld [vmem:[%s9946_s28] sm:$0xf]  ;;  %v6979_v13 = vrot.slane %v2507_v4, %v6662_v9  ;;  %v2461_v48 = vld [vmem:[#allocation3 + $0x90] sm:$0xff]  ;;  %v2462_v16 = vld [vmem:[#allocation3 + $0x98] sm:$0xff]  ;;  %s5159_s17 = sshll.u32 %s6615_s3, 4  ;;  %s10549_s15 = sld [smem:[#allocation57_spill]]  ;;  %s9703_s17 = int_to_ptr.vmem [resolvable:$true] %s5159_s17 }
 0x4c3   : > { %9947 = vst [vmem:[#allocation26_spill] sm:$0xff] %v6961_v10  ;;  %v2459_v14 = vld [vmem:[#allocation3 + $0x80] sm:$0xff]  ;;  %v6982_v17 = vrot.slane %v2593_v5, %v6653_v6  ;;  %v6985_v37 = vrot.slane %v2593_v5, %v6656_v7  ;;  %v6988_v38 = vrot.slane %v2593_v5, %v6659_v8  ;;  %v6991_v39 = vrot.slane %v2593_v5, %v6662_v9  ;;  %v2464_v18 = vld [vmem:[#allocation3 + $0xa8] sm:$0xff]  ;;  %v2465_v19 = vld [vmem:[#allocation3 + $0xb0] sm:$0xff]  ;;  %s5143_s29 = scalar_lea.sflag [#allocation6], %s6588_s13  ;;  %s6114_s20 = scalar_lea.vmem %s9703_s17, 1024 }
 0x4c4   : > { %v2463_v36 = vld [vmem:[#allocation3 + $0xa0] sm:$0xff]  ;;  %v2466_v20 = vld [vmem:[#allocation3 + $0xb8] sm:$0xff]  ;;  %v6994_v21 = vmul.f32 %v6970_v11, %v2443_v59  ;;  %v6997_v43 = vmul.f32 %v6973_v12, %v2444_v60  ;;  %v7000_v44 = vmul.f32 %v6976_v28, %v2445_v25  ;;  %v7003_v7 = vmul.f32 %v6979_v13, %v2446_v27  ;;  %v2468_v47 = vld [vmem:[#allocation3 + $0xc8] sm:$0xff]  ;;  %p6115_p3 = scmp.ne.s32.totalorder %s9703_s17, %s6114_s20  ;;  %p10550_p11 = scmp.ne.s32.totalorder %s9931_s6, 0 }
 0x4c5   : > { %v2467_v45 = vld [vmem:[#allocation3 + $0xc0] sm:$0xff]  ;;  %v2469_v9 = vld [vmem:[#allocation3 + $0xd0] sm:$0xff]  ;;  %v2470_v22 = vld [vmem:[#allocation3 + $0xd8] sm:$0xff]  ;;  %v7006_v23 = vmul.f32 %v6970_v11, %v2447_v61  ;;  %v7009_v24 = vmul.f32 %v6973_v12, %v2448_v29  ;;  %v7012_v26 = vmul.f32 %v6976_v28, %v2449_v62  ;;  %v7015_v53 = vmul.f32 %v6979_v13, %v2450_v63  ;;  %s6264_s8 = smov [#allocation12]  }
 0x4c6   : > { %v2471_v54 = vld [vmem:[#allocation3 + $0xe0] sm:$0xff]  ;;  %v2472_v55 = vld [vmem:[#allocation3 + $0xe8] sm:$0xff]  ;;  %v2473_v56 = vld [vmem:[#allocation3 + $0xf0] sm:$0xff]  ;;  %v7018_v35 = vmul.f32 %v6970_v11, %v2451_v0  ;;  %v7021_v40 = vmul.f32 %v6973_v12, %v2452_v1  ;;  %v7024_v41 = vmul.f32 %v6976_v28, %v2453_v2  ;;  %v7027_v42 = vmul.f32 %v6979_v13, %v2454_v3  ;;  %p6116_p7 = pnand %p6115_p3, %p10550_p11  ;;  %s6118_s9 = sshll.u32 %s6264_s8, 4  ;;  %s6119_s9 = int_to_ptr.vmem [resolvable:$false] %s6118_s9 }
 0x4c7   : > { %v2474_v34 = vld [vmem:[#allocation3 + $0xf8] sm:$0xff]  ;;  %v2475_v49 = vld [vmem:[#allocation3 + $0x100] sm:$0xff]  ;;  %v2476_v50 = vld [vmem:[#allocation3 + $0x108] sm:$0xff]  ;;  %v7030_v58 = vmul.f32 %v6970_v11, %v2455_v46  ;;  %v7033_v59 = vmul.f32 %v6973_v12, %v2456_v31  ;;  %v7036_v60 = vmul.f32 %v6976_v28, %v2457_v32  ;;  %v7039_v25 = vmul.f32 %v6979_v13, %v2458_v33  ;;  %s5569_s5 = sshll.u32 %s10523_s18, 5  ;;  %s6120_s19 = scalar_lea.vmem %s6119_s9, 2048 }
 0x4c8   : > { %v2477_v52 = vld [vmem:[#allocation3 + $0x110] sm:$0xff]  ;;  %v2478_v57 = vld [vmem:[#allocation3 + $0x118] sm:$0xff]  ;;  %v2479_v27 = vld [vmem:[#allocation3 + $0x120] sm:$0xff]  ;;  %v7042_v63 = vmul.f32 %v6970_v11, %v2459_v14  ;;  %v7045_v0 = vmul.f32 %v6973_v12, %v2460_v15  ;;  %v7048_v1 = vmul.f32 %v6976_v28, %v2461_v48  ;;  %v7051_v2 = vmul.f32 %v6979_v13, %v2462_v16  ;;  %s9662_s27 = sadd.s32 %s5638_s12, %s5569_s5  ;;  %p6117_p12 = pneg %p6116_p7 }
 0x4c9   : > { %v2480_v61 = vld [vmem:[#allocation3 + $0x128] sm:$0xff]  ;;  %v2481_v29 = vld [vmem:[#allocation3 + $0x130] sm:$0xff]  ;;  %v2482_v62 = vld [vmem:[#allocation3 + $0x138] sm:$0xff]  ;;  %v7054_v46 = vmul.f32 %v6970_v11, %v2463_v36  ;;  %v7057_v31 = vmul.f32 %v6973_v12, %v2464_v18  ;;  %v7060_v32 = vmul.f32 %v6976_v28, %v2465_v19  ;;  %v7063_v33 = vmul.f32 %v6979_v13, %v2466_v20  ;;  %s5570_s14 = sshll.u32 %s9662_s27, 6  ;;  %p6121_p13 = scmp.lt.s32.totalorder %s9703_s17, %s6119_s9 }
 0x4ca   : > { %v2483_v3 = vld [vmem:[#allocation3 + $0x140] sm:$0xff]  ;;  %v2484_v4 = vld [vmem:[#allocation3 + $0x148] sm:$0xff]  ;;  %v2485_v5 = vld [vmem:[#allocation3 + $0x150] sm:$0xff]  ;;  %v7066_v16 = vmul.f32 %v6970_v11, %v2467_v45  ;;  %v7069_v30 = vmul.f32 %v6973_v12, %v2468_v47  ;;  %v7072_v36 = vmul.f32 %v6976_v28, %v2469_v9  ;;  %v7075_v18 = vmul.f32 %v6979_v13, %v2470_v22  ;;  %s9701_s11 = scalar_lea.hbm %s10549_s15, %s5570_s14  ;;  %p6122_p6 = scmp.lt.s32.totalorder %s6120_s19, %s6114_s20 }
 0x4cb   : > { %v2486_v14 = vld [vmem:[#allocation3 + $0x158] sm:$0xff]  ;;  %v2487_v15 = vld [vmem:[#allocation3 + $0x160] sm:$0xff]  ;;  %v2488_v48 = vld [vmem:[#allocation3 + $0x168] sm:$0xff]  ;;  %v7078_v20 = vmul.f32 %v6970_v11, %v2471_v54  ;;  %v7081_v6 = vmul.f32 %v6973_v12, %v2472_v55  ;;  %v7084_v45 = vmul.f32 %v6976_v28, %v2473_v56  ;;  %v7087_v47 = vmul.f32 %v6979_v13, %v2474_v34 }
 0x4cc   : > { %9950 = vst [vmem:[#allocation29_spill] sm:$0xff] %v7072_v36  ;;  %9951 = vst [vmem:[#allocation30_spill] sm:$0xff] %v7075_v18  ;;  %v2489_v19 = vld [vmem:[#allocation3 + $0x170] sm:$0xff]  ;;  %v2490_v51 = vld [vmem:[#allocation3 + $0x178] sm:$0xff]  ;;  %v7090_v22 = vmul.f32 %v6970_v11, %v2475_v49  ;;  %v7093_v18 = vmul.f32 %v6973_v12, %v2476_v50  ;;  %v7096_v54 = vmul.f32 %v6976_v28, %v2477_v52  ;;  %p6123_p8 = por %p6122_p6, %p6121_p13 }
 0x4cd   : > { %v2491_v8 = vld [vmem:[#allocation3 + $0x180] sm:$0xff]  ;;  %9952 = vst [vmem:[#allocation31_spill] sm:$0xff] %v7081_v6  ;;  %9953 = vst [vmem:[#allocation32_spill] sm:$0xff] %v7084_v45  ;;  %v2492_v9 = vld [vmem:[#allocation3 + $0x188] sm:$0xff]  ;;  %v7099_v55 = vmul.f32 %v6979_v13, %v2478_v57  ;;  %v7102_v34 = vmul.f32 %v6970_v11, %v2479_v27  ;;  %v7108_v49 = vmul.f32 %v6976_v28, %v2481_v29 }
 0x4ce   : > { %9954 = vst [vmem:[#allocation33_spill] sm:$0xff] %v7087_v47  ;;  %v2493_v10 = vld [vmem:[#allocation3 + $0x190] sm:$0xff]  ;;  %v2494_v36 = vld [vmem:[#allocation3 + $0x198] sm:$0xff]  ;;  %9955 = vst [vmem:[#allocation34_spill] sm:$0xff] %v7093_v18  ;;  %v7105_v47 = vmul.f32 %v6973_v12, %v2480_v61  ;;  %v7111_v50 = vmul.f32 %v6979_v13, %v2482_v62  ;;  %v7114_v57 = vmul.f32 %v6970_v11, %v2483_v3  ;;  %p6124_p4 = pnand %p6123_p8, %p6117_p12 }
 0x4cf   : > { %9956 = vst [vmem:[#allocation35_spill] sm:$0xff] %v7096_v54  ;;  %9957 = vst [vmem:[#allocation36_spill] sm:$0xff] %v7099_v55  ;;  %v2495_v56 = vld [vmem:[#allocation3 + $0x1a0] sm:$0xff]  ;;  %v2496_v45 = vld [vmem:[#allocation3 + $0x1a8] sm:$0xff]  ;;  %v7117_v55 = vmul.f32 %v6973_v12, %v2484_v4  ;;  %v7120_v27 = vmul.f32 %v6976_v28, %v2485_v5  ;;  %v7123_v61 = vmul.f32 %v6979_v13, %v2486_v14 }
 0x4d0   : > { %v2497_v6 = vld [vmem:[#allocation3 + $0x1b0] sm:$0xff]  ;;  %9958 = vst [vmem:[#allocation37_spill] sm:$0xff] %v7105_v47  ;;  %9959 = vst [vmem:[#allocation38_spill] sm:$0xff] %v7108_v49  ;;  %v2498_v52 = vld [vmem:[#allocation3 + $0x1b8] sm:$0xff]  ;;  %v7126_v62 = vmul.f32 %v6970_v11, %v2487_v15  ;;  %v7132_v3 = vmul.f32 %v6976_v28, %v2489_v19  ;;  %v7135_v4 = vmul.f32 %v6979_v13, %v2490_v51 }
 0x4d1   : > { %9960 = vst [vmem:[#allocation39_spill] sm:$0xff] %v7111_v50  ;;  %v2499_v54 = vld [vmem:[#allocation3 + $0x1c0] sm:$0xff]  ;;  %v2500_v18 = vld [vmem:[#allocation3 + $0x1c8] sm:$0xff]  ;;  %9961 = vst [vmem:[#allocation40_spill] sm:$0xff] %v7117_v55  ;;  %v7129_v50 = vmul.f32 %v6973_v12, %v2488_v48  ;;  %v7138_v14 = vmul.f32 %v6970_v11, %v2491_v8  ;;  %v7144_v15 = vmul.f32 %v6976_v28, %v2493_v10 }
 0x4d2   : > { %9962 = vst [vmem:[#allocation41_spill] sm:$0xff] %v7120_v27  ;;  %9963 = vst [vmem:[#allocation42_spill] sm:$0xff] %v7123_v61  ;;  %v2501_v29 = vld [vmem:[#allocation3 + $0x1d0] sm:$0xff]  ;;  %v2502_v49 = vld [vmem:[#allocation3 + $0x1d8] sm:$0xff]  ;;  %v7141_v61 = vmul.f32 %v6973_v12, %v2492_v9  ;;  %v7147_v48 = vmul.f32 %v6979_v13, %v2494_v36  ;;  %v7150_v19 = vmul.f32 %v6970_v11, %v2495_v56 }
 0x4d3   : > { %v2503_v47 = vld [vmem:[#allocation3 + $0x1e0] sm:$0xff]  ;;  %9964 = vst [vmem:[#allocation43_spill] sm:$0xff] %v7135_v4  ;;  %v2504_v5 = vld [vmem:[#allocation3 + $0x1e8] sm:$0xff]  ;;  %v2505_v27 = vld [vmem:[#allocation3 + $0x1f0] sm:$0xff]  ;;  %v7153_v51 = vmul.f32 %v6973_v12, %v2496_v45  ;;  %v7156_v4 = vmul.f32 %v6976_v28, %v2497_v6  ;;  %v7159_v8 = vmul.f32 %v6979_v13, %v2498_v52  ;;  %v7162_v9 = vmul.f32 %v6970_v11, %v2499_v54 }
 0x4d4   : > { %v2506_v55 = vld [vmem:[#allocation3 + $0x1f8] sm:$0xff]  ;;  %v7165_v10 = vmul.f32 %v6973_v12, %v2500_v18  ;;  %v7168_v36 = vmul.f32 %v6976_v28, %v2501_v29  ;;  %v7171_v56 = vmul.f32 %v6979_v13, %v2502_v49  ;;  %v7174_v45 = vmul.f32 %v6970_v11, %v2503_v47  ;;  %v9973_v47 = vld [vmem:[#allocation30_spill] sm:$0xff] }
 0x4d5   : > { %v7177_v6 = vmul.f32 %v6973_v12, %v2504_v5  ;;  %v7180_v52 = vmul.f32 %v6976_v28, %v2505_v27  ;;  %v7183_v54 = vmul.f32 %v6979_v13, %v2506_v55  ;;  %v7187_v18 = vadd.f32 %v6982_v17, %v6994_v21  ;;  %v9975_v55 = vld [vmem:[#allocation31_spill] sm:$0xff]  ;;  %v9977_v27 = vld [vmem:[#allocation32_spill] sm:$0xff]  ;;  %v9979_v29 = vld [vmem:[#allocation33_spill] sm:$0xff] }
 0x4d6   : > { %v7191_v49 = vadd.f32 %v6985_v37, %v6997_v43  ;;  %v7195_v11 = vadd.f32 %v6988_v38, %v7000_v44  ;;  %v7199_v12 = vadd.f32 %v6991_v39, %v7003_v7  ;;  %v7203_v28 = vadd.f32 %v6982_v17, %v7006_v23 }
 0x4d7   : > { %v7207_v13 = vadd.f32 %v6985_v37, %v7009_v24  ;;  %v7211_v21 = vadd.f32 %v6988_v38, %v7012_v26  ;;  %v7215_v43 = vadd.f32 %v6991_v39, %v7015_v53  ;;  %v7219_v44 = vadd.f32 %v6982_v17, %v7018_v35 }
 0x4d8   : > { %v7223_v7 = vadd.f32 %v6985_v37, %v7021_v40  ;;  %v7227_v23 = vadd.f32 %v6988_v38, %v7024_v41  ;;  %v7231_v24 = vadd.f32 %v6991_v39, %v7027_v42  ;;  %v7235_v26 = vadd.f32 %v6982_v17, %v7030_v58 }
 0x4d9   : > { %v7239_v53 = vadd.f32 %v6985_v37, %v7033_v59  ;;  %v7243_v35 = vadd.f32 %v6988_v38, %v7036_v60  ;;  %v7247_v40 = vadd.f32 %v6991_v39, %v7039_v25  ;;  %v7251_v41 = vadd.f32 %v6982_v17, %v7042_v63 }
 0x4da   : > { %v7255_v42 = vadd.f32 %v6985_v37, %v7045_v0  ;;  %v7259_v58 = vadd.f32 %v6988_v38, %v7048_v1  ;;  %v7263_v59 = vadd.f32 %v6991_v39, %v7051_v2  ;;  %v7267_v60 = vadd.f32 %v6982_v17, %v7054_v46  ;;  %v9971_v46 = vld [vmem:[#allocation29_spill] sm:$0xff] }
 0x4db   : > { %v7271_v25 = vadd.f32 %v6985_v37, %v7057_v31  ;;  %v7275_v63 = vadd.f32 %v6988_v38, %v7060_v32  ;;  %v7279_v0 = vadd.f32 %v6991_v39, %v7063_v33  ;;  %v7283_v1 = vadd.f32 %v6982_v17, %v7066_v16 }
 0x4dc   : > { %9965 = vst [vmem:[#allocation44_spill] sm:$0xff] %v7259_v58  ;;  %9966 = vst [vmem:[#allocation45_spill] sm:$0xff] %v7267_v60  ;;  %v7287_v2 = vadd.f32 %v6985_v37, %v7069_v30  ;;  %v7291_v31 = vadd.f32 %v6988_v38, %v9971_v46  ;;  %v7295_v32 = vadd.f32 %v6991_v39, %v9973_v47  ;;  %v9982_v47 = vld [vmem:[#allocation34_spill] sm:$0xff] }
 0x4dd   : > { %9967 = vst [vmem:[#allocation46_spill] sm:$0xff] %v7271_v25  ;;  %9968 = vst [vmem:[#allocation47_spill] sm:$0xff] %v7275_v63  ;;  %v7299_v33 = vadd.f32 %v6982_v17, %v7078_v20  ;;  %v7303_v16 = vadd.f32 %v6985_v37, %v9975_v55  ;;  %v7307_v30 = vadd.f32 %v6988_v38, %v9977_v27 }
 0x4de   : > { %9969 = vst [vmem:[#allocation48_spill] sm:$0xff] %v7283_v1  ;;  %9970 = vst [vmem:[#allocation49_spill] sm:$0xff] %v7287_v2  ;;  %v7311_v5 = vadd.f32 %v6991_v39, %v9979_v29  ;;  %v7315_v46 = vadd.f32 %v6982_v17, %v7090_v22  ;;  %v7319_v20 = vadd.f32 %v6985_v37, %v9982_v47 }
 0x4df   : > { %9972 = vst [vmem:[#allocation29_spill] sm:$0xff] %v7291_v31  ;;  %9974 = vst [vmem:[#allocation30_spill] sm:$0xff] %v7299_v33  ;;  %v9984_v33 = vld [vmem:[#allocation35_spill] sm:$0xff]  ;;  %v7331_v29 = vadd.f32 %v6982_v17, %v7102_v34 }
 0x4e0   : > { %9976 = vst [vmem:[#allocation31_spill] sm:$0xff] %v7303_v16  ;;  %9978 = vst [vmem:[#allocation32_spill] sm:$0xff] %v7307_v30  ;;  %v7323_v55 = vadd.f32 %v6988_v38, %v9984_v33  ;;  %v9985_v16 = vld [vmem:[#allocation36_spill] sm:$0xff] }
 0x4e1   : > { %9980 = vst [vmem:[#allocation33_spill] sm:$0xff] %v7311_v5  ;;  %9981 = vst [vmem:[#allocation50_spill] sm:$0xff] %v7315_v46  ;;  %v7327_v27 = vadd.f32 %v6991_v39, %v9985_v16  ;;  %v9988_v5 = vld [vmem:[#allocation37_spill] sm:$0xff]  ;;  %v9990_v46 = vld [vmem:[#allocation38_spill] sm:$0xff]  ;;  %v7347_v16 = vadd.f32 %v6982_v17, %v7114_v57  ;;  %v7367_v57 = vadd.f32 %v6985_v37, %v7129_v50 }
 0x4e2   : > { %9983 = vst [vmem:[#allocation34_spill] sm:$0xff] %v7319_v20  ;;  %9987 = vst [vmem:[#allocation36_spill] sm:$0xff] %v7331_v29  ;;  %v7335_v22 = vadd.f32 %v6985_v37, %v9988_v5  ;;  %v7339_v47 = vadd.f32 %v6988_v38, %v9990_v46  ;;  %v9991_v20 = vld [vmem:[#allocation39_spill] sm:$0xff]  ;;  %v9994_v29 = vld [vmem:[#allocation41_spill] sm:$0xff]  ;;  %v7387_v50 = vadd.f32 %v6988_v38, %v7144_v15 }
 0x4e3   : > { %9986 = vst [vmem:[#allocation35_spill] sm:$0xff] %v7327_v27  ;;  %v7343_v33 = vadd.f32 %v6991_v39, %v9991_v20  ;;  %v9992_v27 = vld [vmem:[#allocation40_spill] sm:$0xff]  ;;  %v7355_v5 = vadd.f32 %v6988_v38, %v9994_v29  ;;  %v7363_v20 = vadd.f32 %v6982_v17, %v7126_v62  ;;  %v7383_v62 = vadd.f32 %v6985_v37, %v7141_v61 }
 0x4e4   : > { %9989 = vst [vmem:[#allocation37_spill] sm:$0xff] %v7335_v22  ;;  %v7351_v34 = vadd.f32 %v6985_v37, %v9992_v27  ;;  %v9995_v22 = vld [vmem:[#allocation42_spill] sm:$0xff]  ;;  %v7371_v27 = vadd.f32 %v6988_v38, %v7132_v3  ;;  %v7391_v3 = vadd.f32 %v6991_v39, %v7147_v48  ;;  %v7403_v61 = vadd.f32 %v6988_v38, %v7156_v4 }
 0x4e5   : > { %v7359_v46 = vadd.f32 %v6991_v39, %v9995_v22  ;;  %v7379_v22 = vadd.f32 %v6982_v17, %v7138_v14  ;;  %v7399_v14 = vadd.f32 %v6985_v37, %v7153_v51  ;;  %v7407_v15 = vadd.f32 %v6991_v39, %v7159_v8 }
 0x4e6   : > { %9993 = vst [vmem:[#allocation38_spill] sm:$0xff] %v7351_v34  ;;  %9996 = vst [vmem:[#allocation39_spill] sm:$0xff] %v7371_v27  ;;  %v9997_v34 = vld [vmem:[#allocation43_spill] sm:$0xff]  ;;  %v7411_v48 = vadd.f32 %v6982_v17, %v7162_v9  ;;  %v7419_v51 = vadd.f32 %v6988_v38, %v7168_v36  ;;  %v7423_v4 = vadd.f32 %v6991_v39, %v7171_v56  ;;  %v10005_v56 = vld [vmem:[#allocation30_spill] sm:$0xff] }
 0x4e7   : > { %v7375_v29 = vadd.f32 %v6991_v39, %v9997_v34  ;;  %9998 = vst [vmem:[#allocation40_spill] sm:$0xff] %v7379_v22  ;;  %v7395_v34 = vadd.f32 %v6982_v17, %v7150_v19  ;;  %9999 = vst [vmem:[#allocation41_spill] sm:$0xff] %v7403_v61  ;;  %v7415_v19 = vadd.f32 %v6985_v37, %v7165_v10  ;;  %v10006_v58 = vld [vmem:[#allocation31_spill] sm:$0xff] }
 0x4e8   : > { %10000 = vst [vmem:[#allocation42_spill] sm:$0xff] %v7419_v51  ;;  %10001 = vst [vmem:[#allocation43_spill] sm:$0xff] %v7423_v4  ;;  %v7427_v8 = vadd.f32 %v6982_v17, %v7174_v45  ;;  %v7431_v9 = vadd.f32 %v6985_v37, %v7177_v6  ;;  %v7435_v10 = vadd.f32 %v6988_v38, %v7180_v52  ;;  %v10007_v60 = vld [vmem:[#allocation33_spill] sm:$0xff]  ;;  %v10008_v25 = vld [vmem:[#allocation50_spill] sm:$0xff]  ;;  %v10014_v27 = vmov %v7419_v51 }
 0x4e9   : > { %v7439_v36 = vadd.f32 %v6991_v39, %v7183_v54  ;;  %v10009_v63 = vld [vmem:[#allocation34_spill] sm:$0xff]  ;;  %v10011_v2 = vld [vmem:[#allocation36_spill] sm:$0xff]  ;;  %v10015_v22 = vmov %v7423_v4  ;;  %v10016_v45 = vmax.f32 %v7191_v49, 0.0  ;;  %v10017_v37 = vmax.f32 %v7187_v18, 0.0 }
 0x4ea   : > { %10002 = vst [vmem:[#allocation51_spill] sm:$0xff] %v7427_v8  ;;  %10003 = vst [vmem:[#allocation52_spill] sm:$0xff] %v7435_v10  ;;  %v10010_v1 = vld [vmem:[#allocation35_spill] sm:$0xff]  ;;  %v10020_v39 = vmax.f32 %v7199_v12, 0.0  ;;  %v10021_v54 = vmax.f32 %v7195_v11, 0.0  ;;  %v10024_v10 = vmax.f32 %v7207_v13, 0.0 }
 0x4eb   : > { %10004 = vst [vmem:[#allocation53_spill] sm:$0xff] %v7439_v36  ;;  %v10012_v31 = vld [vmem:[#allocation37_spill] sm:$0xff]  ;;  %v2807_v61 = vcombine.low %v10017_v37, %v10016_v45  ;;  %v10018_v6 = vmov %v10016_v45  ;;  %v10019_v38 = vmov %v10017_v37  ;;  %v10025_v36 = vmax.f32 %v7203_v28, 0.0 }
 0x4ec   : > { %v2808_v52 = vcombine.high %v10019_v38, %v10018_v6  ;;  %v2809_v8 = vcombine.low %v10021_v54, %v10020_v39  ;;  %v10022_v51 = vmov %v10020_v39  ;;  %v10023_v4 = vmov %v10021_v54 }
 0x4ed   : > { %v10013_v30 = vld [vmem:[#allocation38_spill] sm:$0xff]  ;;  %v2810_v17 = vcombine.high %v10023_v4, %v10022_v51  ;;  %v2843_v45 = vcombine.low %v10025_v36, %v10024_v10  ;;  %v10026_v49 = vmov %v10024_v10  ;;  %v10027_v18 = vmov %v10025_v36 }
 0x4ee   : > { %v2844_v37 = vcombine.high %v10027_v18, %v10026_v49  ;;  %v10028_v6 = vmax.f32 %v7215_v43, 0.0  ;;  %v10029_v38 = vmax.f32 %v7211_v21, 0.0  ;;  %v10032_v4 = vld [vmem:[#allocation26_spill] sm:$0xff]  ;;  %v10040_v49 = vmax.f32 %v7231_v24, 0.0 }
 0x4ef   : > { %v7538_v54 = vrot.slane %v2807_v61, %v10032_v4  ;;  %v7541_v10 = vrot.slane %v2808_v52, %v10032_v4  ;;  %v7544_v13 = vrot.slane %v2809_v8, %v10032_v4  ;;  %v7547_v28 = vrot.slane %v2810_v17, %v10032_v4 }
 0x4f0   : > { %v2845_v39 = vcombine.low %v10029_v38, %v10028_v6  ;;  %v10030_v12 = vmov %v10028_v6  ;;  %v10031_v11 = vmov %v10029_v38  ;;  %v7550_v36 = vrot.slane %v2843_v45, %v10032_v4 }
 0x4f1   : > { %v2846_v51 = vcombine.high %v10031_v11, %v10030_v12  ;;  %v7553_v43 = vrot.slane %v2844_v37, %v10032_v4  ;;  %v10036_v38 = vmax.f32 %v7223_v7, 0.0  ;;  %v10041_v18 = vmax.f32 %v7227_v23, 0.0 }
 0x4f2   : > { %v7556_v21 = vrot.slane %v2845_v39, %v10032_v4  ;;  %v10037_v39 = vmax.f32 %v7219_v44, 0.0  ;;  %v10042_v37 = vmov %v10040_v49  ;;  %v10044_v52 = vmax.f32 %v7239_v53, 0.0 }
 0x4f3   : > { %10033 = vst [vmem:[#allocation30_spill] sm:$0xff] %v7553_v43  ;;  %v7559_v61 = vrot.slane %v2846_v51, %v10032_v4  ;;  %v10038_v11 = vmov %v10036_v38  ;;  %v2881_v17 = vcombine.low %v10041_v18, %v10040_v49  ;;  %v10043_v8 = vmov %v10041_v18 }
 0x4f4   : > { %10034 = vst [vmem:[#allocation31_spill] sm:$0xff] %v7556_v21  ;;  %v2879_v12 = vcombine.low %v10037_v39, %v10036_v38  ;;  %v10039_v51 = vmov %v10037_v39  ;;  %v2882_v6 = vcombine.high %v10043_v8, %v10042_v37  ;;  %v10046_v7 = vmov %v10044_v52 }
 0x4f5   : > { %10035 = vst [vmem:[#allocation33_spill] sm:$0xff] %v7559_v61  ;;  %v2880_v45 = vcombine.high %v10039_v51, %v10038_v11  ;;  %v10045_v61 = vmax.f32 %v7235_v26, 0.0  ;;  %v10048_v11 = vmax.f32 %v7247_v40, 0.0  ;;  %v10049_v51 = vmax.f32 %v7243_v35, 0.0 }
 0x4f6   : > { %v7610_v18 = vrot.slane %v2879_v12, %v10032_v4  ;;  %v7616_v53 = vrot.slane %v2881_v17, %v10032_v4  ;;  %v7619_v26 = vrot.slane %v2882_v6, %v10032_v4  ;;  %v10059_v12 = vld [vmem:[#allocation44_spill] sm:$0xff] }
 0x4f7   : > { %v2915_v38 = vcombine.low %v10045_v61, %v10044_v52  ;;  %v10047_v44 = vmov %v10045_v61  ;;  %v2917_v49 = vcombine.low %v10049_v51, %v10048_v11  ;;  %v10050_v24 = vmov %v10048_v11 }
 0x4f8   : > { %v2916_v39 = vcombine.high %v10047_v44, %v10046_v7  ;;  %v10051_v23 = vmov %v10049_v51  ;;  %v7613_v61 = vrot.slane %v2880_v45, %v10032_v4  ;;  %v10054_v11 = vmax.f32 %v7255_v42, 0.0  ;;  %v10063_v45 = vld [vmem:[#allocation46_spill] sm:$0xff] }
 0x4f9   : > { %v2918_v8 = vcombine.high %v10051_v23, %v10050_v24  ;;  %v7622_v52 = vrot.slane %v2915_v38, %v10032_v4  ;;  %v7628_v35 = vrot.slane %v2917_v49, %v10032_v4  ;;  %v10055_v51 = vmax.f32 %v7251_v41, 0.0 }
 0x4fa   : > { %v7625_v40 = vrot.slane %v2916_v39, %v10032_v4  ;;  %v10056_v24 = vmov %v10054_v11  ;;  %v10058_v38 = vmax.f32 %v7263_v59, 0.0  ;;  %v10060_v7 = vmax.f32 %v10059_v12, 0.0 }
 0x4fb   : > { %v7631_v37 = vrot.slane %v2918_v8, %v10032_v4  ;;  %v2951_v49 = vcombine.low %v10055_v51, %v10054_v11  ;;  %v10057_v23 = vmov %v10055_v51  ;;  %v10064_v43 = vmax.f32 %v10063_v45, 0.0 }
 0x4fc   : > { %10052 = vst [vmem:[#allocation50_spill] sm:$0xff] %v7625_v40  ;;  %v2952_v8 = vcombine.high %v10057_v23, %v10056_v24  ;;  %v2953_v6 = vcombine.low %v10060_v7, %v10058_v38  ;;  %v10061_v44 = vmov %v10058_v38  ;;  %v10062_v17 = vmov %v10060_v7  ;;  %v10070_v23 = vld [vmem:[#allocation47_spill] sm:$0xff] }
 0x4fd   : > { %10053 = vst [vmem:[#allocation34_spill] sm:$0xff] %v7631_v37  ;;  %v2954_v39 = vcombine.high %v10062_v17, %v10061_v44  ;;  %v10065_v37 = vld [vmem:[#allocation45_spill] sm:$0xff]  ;;  %v10067_v42 = vmov %v10064_v43  ;;  %v10069_v24 = vmax.f32 %v7279_v0, 0.0  ;;  %v10071_v21 = vmax.f32 %v10070_v23, 0.0 }
 0x4fe   : > { %v10066_v40 = vmax.f32 %v10065_v37, 0.0  ;;  %v7682_v7 = vrot.slane %v2951_v49, %v10032_v4 }
 0x4ff   : > { %v2989_v38 = vcombine.low %v10071_v21, %v10069_v24  ;;  %v10072_v59 = vmov %v10069_v24  ;;  %v10073_v12 = vmov %v10071_v21  ;;  %v7691_v37 = vrot.slane %v2954_v39, %v10032_v4  ;;  %v10078_v24 = vld [vmem:[#allocation49_spill] sm:$0xff] }
 0x500   : > { %v2987_v11 = vcombine.low %v10066_v40, %v10064_v43  ;;  %v10068_v41 = vmov %v10066_v40  ;;  %v2990_v17 = vcombine.high %v10073_v12, %v10072_v59  ;;  %v7685_v43 = vrot.slane %v2952_v8, %v10032_v4 }
 0x501   : > { %v2988_v51 = vcombine.high %v10068_v41, %v10067_v42  ;;  %v7688_v40 = vrot.slane %v2953_v6, %v10032_v4  ;;  %v7700_v21 = vrot.slane %v2989_v38, %v10032_v4  ;;  %v10079_v23 = vmax.f32 %v10078_v24, 0.0  ;;  %v10080_v38 = vld [vmem:[#allocation48_spill] sm:$0xff]  ;;  %v10085_v6 = vld [vmem:[#allocation29_spill] sm:$0xff] }
 0x502   : > { %v7694_v45 = vrot.slane %v2987_v11, %v10032_v4  ;;  %v7703_v44 = vrot.slane %v2990_v17, %v10032_v4  ;;  %v10081_v59 = vmax.f32 %v10080_v38, 0.0  ;;  %v10084_v11 = vmax.f32 %v7295_v32, 0.0 }
 0x503   : > { %v7697_v0 = vrot.slane %v2988_v51, %v10032_v4  ;;  %10076 = vst [vmem:[#allocation37_spill] sm:$0xff] %v7700_v21  ;;  %v10082_v17 = vmov %v10079_v23  ;;  %v10086_v42 = vmax.f32 %v10085_v6, 0.0 }
 0x504   : > { %10074 = vst [vmem:[#allocation35_spill] sm:$0xff] %v7694_v45  ;;  %10077 = vst [vmem:[#allocation38_spill] sm:$0xff] %v7703_v44  ;;  %v3023_v12 = vcombine.low %v10081_v59, %v10079_v23  ;;  %v10083_v8 = vmov %v10081_v59  ;;  %v10087_v41 = vmov %v10084_v11  ;;  %v10089_v44 = vmax.f32 %v10006_v58, 0.0 }
 0x505   : > { %10075 = vst [vmem:[#allocation36_spill] sm:$0xff] %v7697_v0  ;;  %v3024_v39 = vcombine.high %v10083_v8, %v10082_v17  ;;  %v3025_v49 = vcombine.low %v10086_v42, %v10084_v11  ;;  %v10088_v21 = vmov %v10086_v42  ;;  %v10090_v0 = vmax.f32 %v10005_v56, 0.0  ;;  %v10094_v17 = vld [vmem:[#allocation32_spill] sm:$0xff] }
 0x506   : > { %v3026_v51 = vcombine.high %v10088_v21, %v10087_v41  ;;  %v10091_v24 = vmov %v10089_v44  ;;  %v10093_v59 = vmax.f32 %v10007_v60, 0.0  ;;  %v10095_v45 = vmax.f32 %v10094_v17, 0.0 }
 0x507   : > { %v3059_v23 = vcombine.low %v10090_v0, %v10089_v44  ;;  %v10092_v38 = vmov %v10090_v0  ;;  %v7754_v42 = vrot.slane %v3023_v12, %v10032_v4  ;;  %v7757_v0 = vrot.slane %v3024_v39, %v10032_v4 }
 0x508   : > { %v3060_v8 = vcombine.high %v10092_v38, %v10091_v24  ;;  %v3061_v11 = vcombine.low %v10095_v45, %v10093_v59  ;;  %v10096_v32 = vmov %v10093_v59  ;;  %v10097_v6 = vmov %v10095_v45 }
 0x509   : > { %v3062_v21 = vcombine.high %v10097_v6, %v10096_v32  ;;  %v7760_v58 = vrot.slane %v3025_v49, %v10032_v4  ;;  %v7763_v56 = vrot.slane %v3026_v51, %v10032_v4  ;;  %v7766_v44 = vrot.slane %v3059_v23, %v10032_v4 }
 0x50a   : > { %v7769_v60 = vrot.slane %v3060_v8, %v10032_v4  ;;  %v7772_v45 = vrot.slane %v3061_v11, %v10032_v4  ;;  %v10098_v59 = vmax.f32 %v10009_v63, 0.0  ;;  %v10099_v17 = vmax.f32 %v10008_v25, 0.0 }
 0x50b   : > { %v7775_v41 = vrot.slane %v3062_v21, %v10032_v4  ;;  %v10102_v23 = vmax.f32 %v10010_v1, 0.0  ;;  %v10103_v24 = vmax.f32 %v7323_v55, 0.0  ;;  %v10106_v49 = vmax.f32 %v10012_v31, 0.0 }
 0x50c   : > { %v3095_v11 = vcombine.low %v10099_v17, %v10098_v59  ;;  %v10100_v32 = vmov %v10098_v59  ;;  %v10101_v6 = vmov %v10099_v17  ;;  %v10107_v39 = vmax.f32 %v10011_v2, 0.0 }
 0x50d   : > { %v3096_v21 = vcombine.high %v10101_v6, %v10100_v32  ;;  %v3097_v12 = vcombine.low %v10103_v24, %v10102_v23  ;;  %v10104_v38 = vmov %v10102_v23  ;;  %v10105_v51 = vmov %v10103_v24 }
 0x50e   : > { %v3098_v8 = vcombine.high %v10105_v51, %v10104_v38  ;;  %v3131_v59 = vcombine.low %v10107_v39, %v10106_v49  ;;  %v10108_v63 = vmov %v10106_v49  ;;  %v10109_v25 = vmov %v10107_v39 }
 0x50f   : > { %v3132_v17 = vcombine.high %v10109_v25, %v10108_v63  ;;  %v10110_v32 = vmax.f32 %v7343_v33, 0.0  ;;  %v10111_v6 = vmax.f32 %v7339_v47, 0.0  ;;  %v7826_v24 = vrot.slane %v3095_v11, %v10032_v4 }
 0x510   : > { %v7829_v39 = vrot.slane %v3096_v21, %v10032_v4  ;;  %v7832_v31 = vrot.slane %v3097_v12, %v10032_v4  ;;  %v7835_v2 = vrot.slane %v3098_v8, %v10032_v4  ;;  %v7838_v49 = vrot.slane %v3131_v59, %v10032_v4 }
 0x511   : > { %v3133_v23 = vcombine.low %v10111_v6, %v10110_v32  ;;  %v10112_v1 = vmov %v10110_v32  ;;  %v10113_v55 = vmov %v10111_v6  ;;  %v7841_v33 = vrot.slane %v3132_v17, %v10032_v4 }
 0x512   : > { %v3134_v51 = vcombine.high %v10113_v55, %v10112_v1  ;;  %10114 = vst [vmem:[#allocation42_spill] sm:$0xff] %v7838_v49  ;;  %v10118_v32 = vmax.f32 %v10013_v30, 0.0  ;;  %v10119_v6 = vmax.f32 %v7347_v16, 0.0  ;;  %v10122_v59 = vmax.f32 %v7359_v46, 0.0 }
 0x513   : > { %10115 = vst [vmem:[#allocation43_spill] sm:$0xff] %v7841_v33  ;;  %v7844_v47 = vrot.slane %v3133_v23, %v10032_v4  ;;  %v10123_v63 = vmax.f32 %v7355_v5, 0.0  ;;  %v10126_v12 = vmax.f32 %v7367_v57, 0.0  ;;  %v10127_v11 = vmax.f32 %v7363_v20, 0.0 }
 0x514   : > { %v7847_v38 = vrot.slane %v3134_v51, %v10032_v4  ;;  %v3167_v23 = vcombine.low %v10119_v6, %v10118_v32  ;;  %v10120_v1 = vmov %v10118_v32  ;;  %v10121_v55 = vmov %v10119_v6 }
 0x515   : > { %10116 = vst [vmem:[#allocation26_spill] sm:$0xff] %v7844_v47  ;;  %v3168_v51 = vcombine.high %v10121_v55, %v10120_v1  ;;  %v3169_v21 = vcombine.low %v10123_v63, %v10122_v59  ;;  %v10124_v25 = vmov %v10122_v59  ;;  %v10125_v8 = vmov %v10123_v63  ;;  %v10131_v55 = vld [vmem:[#allocation39_spill] sm:$0xff]  ;;  %v10170_v47 = vld [vmem:[#allocation52_spill] sm:$0xff] }
 0x516   : > { %10117 = vst [vmem:[#allocation44_spill] sm:$0xff] %v7847_v38  ;;  %v3170_v17 = vcombine.high %v10125_v8, %v10124_v25  ;;  %v3203_v32 = vcombine.low %v10127_v11, %v10126_v12  ;;  %v10128_v30 = vmov %v10126_v12  ;;  %v10129_v16 = vmov %v10127_v11 }
 0x517   : > { %v3204_v6 = vcombine.high %v10129_v16, %v10128_v30  ;;  %v10130_v1 = vmax.f32 %v7375_v29, 0.0  ;;  %v10132_v38 = vmax.f32 %v10131_v55, 0.0  ;;  %v7898_v63 = vrot.slane %v3167_v23, %v10032_v4  ;;  %v10138_v55 = vld [vmem:[#allocation40_spill] sm:$0xff] }
 0x518   : > { %v7901_v11 = vrot.slane %v3168_v51, %v10032_v4  ;;  %v7904_v57 = vrot.slane %v3169_v21, %v10032_v4  ;;  %v7907_v20 = vrot.slane %v3170_v17, %v10032_v4  ;;  %v7910_v12 = vrot.slane %v3203_v32, %v10032_v4 }
 0x519   : > { %v3205_v59 = vcombine.low %v10132_v38, %v10130_v1  ;;  %v10133_v46 = vmov %v10130_v1  ;;  %v10134_v5 = vmov %v10132_v38  ;;  %v7913_v29 = vrot.slane %v3204_v6, %v10032_v4 }
 0x51a   : > { %v3206_v8 = vcombine.high %v10134_v5, %v10133_v46  ;;  %v10137_v1 = vmax.f32 %v7383_v62, 0.0  ;;  %v10142_v32 = vmax.f32 %v7391_v3, 0.0  ;;  %v10143_v30 = vmax.f32 %v7387_v50, 0.0 }
 0x51b   : > { %10135 = vst [vmem:[#allocation46_spill] sm:$0xff] %v7913_v29  ;;  %v7916_v38 = vrot.slane %v3205_v59, %v10032_v4  ;;  %v10139_v59 = vmax.f32 %v10138_v55, 0.0  ;;  %v10146_v23 = vmax.f32 %v7399_v14, 0.0  ;;  %v10147_v33 = vmax.f32 %v7395_v34, 0.0 }
 0x51c   : > { %v7919_v25 = vrot.slane %v3206_v8, %v10032_v4  ;;  %v10140_v5 = vmov %v10137_v1  ;;  %v3241_v17 = vcombine.low %v10143_v30, %v10142_v32  ;;  %v10144_v16 = vmov %v10142_v32 }
 0x51d   : > { %v3239_v46 = vcombine.low %v10139_v59, %v10137_v1  ;;  %v10141_v8 = vmov %v10139_v59  ;;  %v10145_v21 = vmov %v10143_v30  ;;  %v3275_v1 = vcombine.low %v10147_v33, %v10146_v23 }
 0x51e   : > { %10136 = vst [vmem:[#allocation45_spill] sm:$0xff] %v7919_v25  ;;  %v3240_v51 = vcombine.high %v10141_v8, %v10140_v5  ;;  %v3242_v6 = vcombine.high %v10145_v21, %v10144_v16  ;;  %v10148_v62 = vmov %v10146_v23  ;;  %v10149_v55 = vmov %v10147_v33  ;;  %v10151_v8 = vld [vmem:[#allocation41_spill] sm:$0xff] }
 0x51f   : > { %v3276_v59 = vcombine.high %v10149_v55, %v10148_v62  ;;  %v10150_v5 = vmax.f32 %v7407_v15, 0.0  ;;  %v10152_v25 = vmax.f32 %v10151_v8, 0.0  ;;  %v7970_v30 = vrot.slane %v3239_v46, %v10032_v4 }
 0x520   : > { %v7973_v33 = vrot.slane %v3240_v51, %v10032_v4  ;;  %v7976_v14 = vrot.slane %v3241_v17, %v10032_v4  ;;  %v7979_v34 = vrot.slane %v3242_v6, %v10032_v4  ;;  %v7982_v23 = vrot.slane %v3275_v1, %v10032_v4 }
 0x521   : > { %v3277_v32 = vcombine.low %v10152_v25, %v10150_v5  ;;  %v10153_v3 = vmov %v10150_v5  ;;  %v10154_v50 = vmov %v10152_v25  ;;  %v7985_v15 = vrot.slane %v3276_v59, %v10032_v4 }
 0x522   : > { %v3278_v21 = vcombine.high %v10154_v50, %v10153_v3  ;;  %v3271_v51 = vcombine.low %v7970_v30, %v7976_v14  ;;  %v3272_v17 = vcombine.high %v7970_v30, %v7976_v14  ;;  %v3273_v6 = vcombine.low %v7973_v33, %v7979_v34 }
 0x523   : > { %v7988_v25 = vrot.slane %v3277_v32, %v10032_v4  ;;  %v3274_v46 = vcombine.high %v7973_v33, %v7979_v34  ;;  %v10155_v5 = vmax.f32 %v7415_v19, 0.0  ;;  %v10156_v8 = vmax.f32 %v7411_v48, 0.0 }
 0x524   : > { %v7991_v16 = vrot.slane %v3278_v21, %v10032_v4  ;;  %v10159_v30 = vmax.f32 %v10015_v22, 0.0  ;;  %v10160_v33 = vmax.f32 %v10014_v27, 0.0  ;;  %v10171_v49 = vmax.f32 %v10170_v47, 0.0 }
 0x525   : > { %v3307_v1 = vcombine.low %v7982_v23, %v7988_v25  ;;  %v3308_v62 = vcombine.high %v7982_v23, %v7988_v25  ;;  %v3311_v32 = vcombine.low %v10156_v8, %v10155_v5  ;;  %v10157_v3 = vmov %v10155_v5 }
 0x526   : > { %v3309_v55 = vcombine.low %v7985_v15, %v7991_v16  ;;  %v3310_v59 = vcombine.high %v7985_v15, %v7991_v16  ;;  %v10158_v50 = vmov %v10156_v8  ;;  %v3313_v14 = vcombine.low %v10160_v33, %v10159_v30  ;;  %v10164_v16 = vld [vmem:[#allocation51_spill] sm:$0xff] }
 0x527   : > { %v3312_v21 = vcombine.high %v10158_v50, %v10157_v3  ;;  %v10161_v34 = vmov %v10159_v30  ;;  %v10162_v23 = vmov %v10160_v33  ;;  %v10163_v25 = vmax.f32 %v7431_v9, 0.0  ;;  %v10168_v3 = vld [vmem:[#allocation53_spill] sm:$0xff] }
 0x528   : > { %v3314_v15 = vcombine.high %v10162_v23, %v10161_v34  ;;  %v10165_v29 = vmax.f32 %v10164_v16, 0.0  ;;  %v10169_v50 = vmax.f32 %v10168_v3, 0.0  ;;  %v10173_v27 = vmov %v10171_v49 }
 0x529   : > { %v10166_v19 = vmov %v10163_v25  ;;  %v3321_v34 = vrot.slane %v3311_v32, %v10032_v4  ;;  %v3328_v23 = vrot.slane %v3312_v21, %v10032_v4 }
 0x52a   : > { %v3347_v5 = vcombine.low %v10165_v29, %v10163_v25  ;;  %v10167_v48 = vmov %v10165_v29  ;;  %v3349_v30 = vcombine.low %v10171_v49, %v10169_v50  ;;  %v10172_v22 = vmov %v10169_v50 }
 0x52b   : > { %v3348_v8 = vcombine.high %v10167_v48, %v10166_v19  ;;  %v3350_v33 = vcombine.high %v10173_v27, %v10172_v22  ;;  %v3335_v29 = vrot.slane %v3313_v14, %v10032_v4  ;;  %v3342_v9 = vrot.slane %v3314_v15, %v10032_v4 }
 0x52c   : > { %v3357_v25 = vrot.slane %v3347_v5, %v10032_v4  ;;  %v3371_v19 = vrot.slane %v3349_v30, %v10032_v4  ;;  %v10174_v14 = vcombine.low %v7610_v18, %v7616_v53  ;;  %v10175_v15 = vcombine.low %v7538_v54, %v7544_v13 }
 0x52d   : > { %v3364_v16 = vrot.slane %v3348_v8, %v10032_v4  ;;  %v3378_v49 = vrot.slane %v3350_v33, %v10032_v4  ;;  %v3343_v48 = vcombine.low %v3321_v34, %v3335_v29  ;;  %v3344_v3 = vcombine.high %v3321_v34, %v3335_v29 }
 0x52e   : > { %v3345_v47 = vcombine.low %v3328_v23, %v3342_v9  ;;  %v3346_v50 = vcombine.high %v3328_v23, %v3342_v9  ;;  %v3379_v22 = vcombine.low %v3357_v25, %v3371_v19  ;;  %v3380_v32 = vcombine.high %v3357_v25, %v3371_v19 }
 0x52f   : > { %v3381_v27 = vcombine.low %v3364_v16, %v3378_v49  ;;  %v3382_v21 = vcombine.high %v3364_v16, %v3378_v49  ;;  %v8055_v5 = vmax.f32 %v10175_v15, %v10174_v14  ;;  %v10176_v8 = vcombine.high %v7610_v18, %v7616_v53  ;;  %v10190_v49 = vld [vmem:[#allocation30_spill] sm:$0xff]  ;;  %v10191_v14 = vld [vmem:[#allocation33_spill] sm:$0xff] }
 0x530   : > { %v10177_v4 = vcombine.high %v7538_v54, %v7544_v13  ;;  %v10178_v33 = vcombine.low %v7613_v61, %v7619_v26  ;;  %v10179_v34 = vcombine.low %v7541_v10, %v7547_v28  ;;  %v10180_v29 = vcombine.high %v7613_v61, %v7619_v26  ;;  %v10183_v13 = vld [vmem:[#allocation31_spill] sm:$0xff]  ;;  %v10187_v26 = vld [vmem:[#allocation50_spill] sm:$0xff] }
 0x531   : > { %v10181_v9 = vcombine.high %v7541_v10, %v7547_v28  ;;  %v10182_v54 = vcombine.low %v7622_v52, %v7628_v35  ;;  %v10184_v53 = vcombine.low %v7550_v36, %v10183_v13  ;;  %v10185_v16 = vcombine.high %v7622_v52, %v7628_v35  ;;  %v10188_v10 = vld [vmem:[#allocation34_spill] sm:$0xff] }
 0x532   : > { %v8063_v30 = vmax.f32 %v10177_v4, %v10176_v8  ;;  %v8071_v23 = vmax.f32 %v10179_v34, %v10178_v33  ;;  %v10186_v19 = vcombine.high %v7550_v36, %v10183_v13  ;;  %v10189_v28 = vcombine.low %v10187_v26, %v10188_v10 }
 0x533   : > { %v8079_v18 = vmax.f32 %v10181_v9, %v10180_v29  ;;  %v8087_v25 = vmax.f32 %v10184_v53, %v10182_v54  ;;  %v10192_v15 = vcombine.low %v10190_v49, %v10191_v14  ;;  %v10193_v4 = vcombine.high %v10187_v26, %v10188_v10 }
 0x534   : > { %v8095_v61 = vmax.f32 %v10186_v19, %v10185_v16  ;;  %v10194_v33 = vcombine.high %v10190_v49, %v10191_v14  ;;  %v10195_v36 = vcombine.low %v7754_v42, %v7760_v58  ;;  %v10196_v35 = vcombine.low %v7682_v7, %v7688_v40 }
 0x535   : > { %v8103_v8 = vmax.f32 %v10192_v15, %v10189_v28  ;;  %v10197_v29 = vcombine.high %v7754_v42, %v7760_v58  ;;  %v10198_v9 = vcombine.high %v7682_v7, %v7688_v40  ;;  %v10199_v13 = vcombine.low %v7757_v0, %v7763_v56  ;;  %v10204_v40 = vld [vmem:[#allocation35_spill] sm:$0xff]  ;;  %v10205_v58 = vld [vmem:[#allocation37_spill] sm:$0xff] }
 0x536   : > { %v8111_v52 = vmax.f32 %v10194_v33, %v10193_v4  ;;  %v8119_v34 = vmax.f32 %v10196_v35, %v10195_v36  ;;  %v10200_v53 = vcombine.low %v7685_v43, %v7691_v37  ;;  %v10201_v19 = vcombine.high %v7757_v0, %v7763_v56  ;;  %v10211_v56 = vld [vmem:[#allocation38_spill] sm:$0xff] }
 0x537   : > { %v8127_v54 = vmax.f32 %v10198_v9, %v10197_v29  ;;  %v10202_v26 = vcombine.high %v7685_v43, %v7691_v37  ;;  %v10203_v7 = vcombine.low %v7766_v44, %v7772_v45  ;;  %v10206_v10 = vcombine.low %v10204_v40, %v10205_v58  ;;  %v10210_v37 = vld [vmem:[#allocation36_spill] sm:$0xff] }
 0x538   : > { %v8135_v16 = vmax.f32 %v10200_v53, %v10199_v13  ;;  %v10207_v49 = vcombine.high %v7766_v44, %v7772_v45  ;;  %v10208_v14 = vcombine.high %v10204_v40, %v10205_v58  ;;  %v10209_v43 = vcombine.low %v7769_v60, %v7775_v41 }
 0x539   : > { %v8143_v42 = vmax.f32 %v10202_v26, %v10201_v19  ;;  %v8151_v28 = vmax.f32 %v10206_v10, %v10203_v7  ;;  %v10212_v15 = vcombine.low %v10210_v37, %v10211_v56  ;;  %v10213_v33 = vcombine.high %v7769_v60, %v7775_v41 }
 0x53a   : > { %v8159_v0 = vmax.f32 %v10208_v14, %v10207_v49  ;;  %v10214_v36 = vcombine.high %v10210_v37, %v10211_v56  ;;  %v10215_v45 = vcombine.low %v7898_v63, %v7904_v57  ;;  %v10216_v35 = vcombine.low %v7826_v24, %v7832_v31  ;;  %v10232_v14 = vld [vmem:[#allocation43_spill] sm:$0xff] }
 0x53b   : > { %v8167_v4 = vmax.f32 %v10212_v15, %v10209_v43  ;;  %v10217_v9 = vcombine.high %v7898_v63, %v7904_v57  ;;  %v10218_v13 = vcombine.high %v7826_v24, %v7832_v31  ;;  %v10219_v41 = vcombine.low %v7901_v11, %v7907_v20  ;;  %v10224_v31 = vld [vmem:[#allocation42_spill] sm:$0xff]  ;;  %v10233_v43 = vld [vmem:[#allocation44_spill] sm:$0xff] }
 0x53c   : > { %v8175_v44 = vmax.f32 %v10214_v36, %v10213_v33  ;;  %v8183_v29 = vmax.f32 %v10216_v35, %v10215_v45  ;;  %v10220_v53 = vcombine.low %v7829_v39, %v7835_v2  ;;  %v10221_v26 = vcombine.high %v7901_v11, %v7907_v20  ;;  %v10225_v57 = vld [vmem:[#allocation26_spill] sm:$0xff] }
 0x53d   : > { %v8191_v60 = vmax.f32 %v10218_v13, %v10217_v9  ;;  %v10222_v7 = vcombine.high %v7829_v39, %v7835_v2  ;;  %v10223_v24 = vcombine.low %v7910_v12, %v7916_v38  ;;  %v10226_v40 = vcombine.low %v10224_v31, %v10225_v57  ;;  %v10229_v20 = vld [vmem:[#allocation46_spill] sm:$0xff]  ;;  %v10230_v39 = vld [vmem:[#allocation45_spill] sm:$0xff] }
 0x53e   : > { %v8199_v19 = vmax.f32 %v10220_v53, %v10219_v41  ;;  %v10227_v10 = vcombine.high %v7910_v12, %v7916_v38  ;;  %v10228_v49 = vcombine.high %v10224_v31, %v10225_v57  ;;  %v10231_v2 = vcombine.low %v10229_v20, %v10230_v39 }
 0x53f   : > { %v8207_v63 = vmax.f32 %v10222_v7, %v10221_v26  ;;  %v8215_v58 = vmax.f32 %v10226_v40, %v10223_v24  ;;  %v10234_v37 = vcombine.low %v10232_v14, %v10233_v43  ;;  %v10236_v15 = vcombine.high %v10229_v20, %v10230_v39 }
 0x540   : > { %v8223_v11 = vmax.f32 %v10228_v49, %v10227_v10  ;;  %v10237_v33 = vcombine.high %v10232_v14, %v10233_v43  ;;  %v8241_v38 = vmax.f32 %v3271_v51, %v3343_v48  ;;  %v8243_v36 = vmax.f32 %v3272_v17, %v3344_v3 }
 0x541   : > { %v8231_v56 = vmax.f32 %v10234_v37, %v10231_v2  ;;  %v8245_v45 = vmax.f32 %v3273_v6, %v3345_v47  ;;  %v8247_v35 = vmax.f32 %v3274_v46, %v3346_v50  ;;  %v8249_v9 = vmax.f32 %v3307_v1, %v3379_v22 }
 0x542   : > { %v8239_v12 = vmax.f32 %v10237_v33, %v10236_v15  ;;  %10239 = vst [vmem:[#allocation48_spill] sm:$0xff] %v8243_v36  ;;  %v8251_v13 = vmax.f32 %v3308_v62, %v3380_v32  ;;  %v8253_v41 = vmax.f32 %v3309_v55, %v3381_v27  ;;  %v8255_v53 = vmax.f32 %v3310_v59, %v3382_v21 }
 0x543   : > { %10235 = vst [vmem:[#allocation47_spill] sm:$0xff] %v8231_v56  ;;  %10240 = vst [vmem:[#allocation29_spill] sm:$0xff] %v8245_v45  ;;  %v5470_v26 = vrot.slane %v8055_v5, 9  ;;  %v5471_v7 = vrot.slane %v8063_v30, 9  ;;  %v5472_v51 = vrot.slane %v8071_v23, 9  ;;  %v5473_v17 = vrot.slane %v8079_v18, 9 }
 0x544   : > { %10238 = vst [vmem:[#allocation49_spill] sm:$0xff] %v8239_v12  ;;  %10241 = vst [vmem:[#allocation32_spill] sm:$0xff] %v8249_v9  ;;  %v5474_v6 = vrot.slane %v8087_v25, 9  ;;  %v5475_v46 = vrot.slane %v8095_v61, 9  ;;  %v5476_v1 = vrot.slane %v8103_v8, 9  ;;  %v5477_v62 = vrot.slane %v8111_v52, 9 }
 0x545   : > { %10242 = vst [vmem:[#allocation39_spill] sm:$0xff] %v8251_v13  ;;  %10243 = vst [vmem:[#allocation40_spill] sm:$0xff] %v8255_v53  ;;  %v5478_v55 = vrot.slane %v8119_v34, 9  ;;  %v5479_v59 = vrot.slane %v8127_v54, 9  ;;  %v5480_v48 = vrot.slane %v8135_v16, 9  ;;  %v5481_v3 = vrot.slane %v8143_v42, 9 }
 0x546   : > { %v5482_v47 = vrot.slane %v8151_v28, 9  ;;  %v5483_v50 = vrot.slane %v8159_v0, 9  ;;  %v5484_v22 = vrot.slane %v8167_v4, 9  ;;  %v5485_v32 = vrot.slane %v8175_v44, 9 }
 0x547   : > { %v5486_v27 = vrot.slane %v8183_v29, 9  ;;  %v5487_v21 = vrot.slane %v8191_v60, 9  ;;  %v5488_v24 = vrot.slane %v8199_v19, 9  ;;  %v5489_v31 = vrot.slane %v8207_v63, 9 }
 0x548   : > { %v5490_v57 = vrot.slane %v8215_v58, 9  ;;  %v5491_v40 = vrot.slane %v8223_v11, 9  ;;  %v5492_v10 = vrot.slane %v8231_v56, 9  ;;  %v5493_v49 = vrot.slane %v8239_v12, 9 }
 0x549   : > { %v5494_v20 = vrot.slane %v8241_v38, 9  ;;  %v5495_v39 = vrot.slane %v8243_v36, 9  ;;  %v5496_v2 = vrot.slane %v8245_v45, 9  ;;  %v5497_v14 = vrot.slane %v8247_v35, 9 }
 0x54a   : > { %v5498_v43 = vrot.slane %v8249_v9, 9  ;;  %v5499_v37 = vrot.slane %v8251_v13, 9  ;;  %v5500_v15 = vrot.slane %v8253_v41, 9  ;;  %v5501_v33 = vrot.slane %v8255_v53, 9 }
 0x54b   : > { %v8290_v56 = vmax.f32 %v8055_v5, %v5470_v26  ;;  %v8293_v12 = vmax.f32 %v8063_v30, %v5471_v7  ;;  %v8296_v36 = vmax.f32 %v8071_v23, %v5472_v51  ;;  %v8299_v45 = vmax.f32 %v8079_v18, %v5473_v17 }
 0x54c   : > { %v8302_v9 = vmax.f32 %v8087_v25, %v5474_v6  ;;  %v8305_v13 = vmax.f32 %v8095_v61, %v5475_v46  ;;  %v8308_v53 = vmax.f32 %v8103_v8, %v5476_v1  ;;  %v8311_v5 = vmax.f32 %v8111_v52, %v5477_v62  ;;  %v10249_v46 = vld [vmem:[#allocation39_spill] sm:$0xff] }
 0x54d   : > { %v8314_v30 = vmax.f32 %v8119_v34, %v5478_v55  ;;  %v8317_v23 = vmax.f32 %v8127_v54, %v5479_v59  ;;  %v8320_v18 = vmax.f32 %v8135_v16, %v5480_v48  ;;  %v8323_v25 = vmax.f32 %v8143_v42, %v5481_v3  ;;  %v10251_v59 = vld [vmem:[#allocation24_spill] sm:$0xff]  ;;  %v10252_v3 = vld [vmem:[#allocation25_spill] sm:$0xff] }
 0x54e   : > { %v8326_v61 = vmax.f32 %v8151_v28, %v5482_v47  ;;  %v8329_v8 = vmax.f32 %v8159_v0, %v5483_v50  ;;  %v8332_v52 = vmax.f32 %v8167_v4, %v5484_v22  ;;  %v8335_v34 = vmax.f32 %v8175_v44, %v5485_v32  ;;  %v10244_v44 = vld [vmem:[#allocation47_spill] sm:$0xff]  ;;  %v10254_v22 = vld [vmem:[#allocation28_spill] sm:$0xff] }
 0x54f   : > { %v8338_v54 = vmax.f32 %v8183_v29, %v5486_v27  ;;  %v8341_v16 = vmax.f32 %v8191_v60, %v5487_v21  ;;  %v8344_v42 = vmax.f32 %v8199_v19, %v5488_v24  ;;  %v8347_v28 = vmax.f32 %v8207_v63, %v5489_v31  ;;  %v10245_v29 = vld [vmem:[#allocation49_spill] sm:$0xff]  ;;  %v10246_v19 = vld [vmem:[#allocation48_spill] sm:$0xff] }
 0x550   : > { %v8350_v0 = vmax.f32 %v8215_v58, %v5490_v57  ;;  %v8353_v4 = vmax.f32 %v8223_v11, %v5491_v40  ;;  %v8356_v26 = vmax.f32 %v10244_v44, %v5492_v10  ;;  %v8359_v7 = vmax.f32 %v10245_v29, %v5493_v49  ;;  %v10247_v63 = vld [vmem:[#allocation29_spill] sm:$0xff]  ;;  %v10248_v11 = vld [vmem:[#allocation32_spill] sm:$0xff] }
 0x551   : > { %v8362_v60 = vmax.f32 %v8241_v38, %v5494_v20  ;;  %v8365_v51 = vmax.f32 %v10246_v19, %v5495_v39  ;;  %v8368_v17 = vmax.f32 %v10247_v63, %v5496_v2  ;;  %v8371_v58 = vmax.f32 %v8247_v35, %v5497_v14  ;;  %v10250_v38 = vld [vmem:[#allocation40_spill] sm:$0xff]  ;;  %v10253_v35 = vld [vmem:[#allocation27_spill] sm:$0xff] }
 0x552   : > { %v8374_v6 = vmax.f32 %v10248_v11, %v5498_v43  ;;  %v8377_v1 = vmax.f32 %v10249_v46, %v5499_v37  ;;  %v8380_v62 = vmax.f32 %v8253_v41, %v5500_v15  ;;  %v8383_v55 = vmax.f32 %v10250_v38, %v5501_v33 }
 0x553   : > { %v3674_v48 = vrot.slane %v8290_v56, %v10251_v59  ;;  %v3678_v47 = vrot.slane %v8290_v56, %v10252_v3  ;;  %v3682_v50 = vrot.slane %v8290_v56, %v10253_v35  ;;  %v3686_v32 = vrot.slane %v8290_v56, %v10254_v22 }
 0x554   : > { %v3690_v27 = vrot.slane %v8293_v12, %v10251_v59  ;;  %v3694_v41 = vrot.slane %v8293_v12, %v10252_v3  ;;  %v3698_v21 = vrot.slane %v8293_v12, %v10253_v35  ;;  %v3702_v24 = vrot.slane %v8293_v12, %v10254_v22 }
 0x555   : > { %v3706_v31 = vrot.slane %v8296_v36, %v10251_v59  ;;  %v3710_v57 = vrot.slane %v8296_v36, %v10252_v3  ;;  %v3714_v40 = vrot.slane %v8296_v36, %v10253_v35  ;;  %v3718_v10 = vrot.slane %v8296_v36, %v10254_v22 }
 0x556   : > { %v3722_v49 = vrot.slane %v8299_v45, %v10251_v59  ;;  %v3726_v20 = vrot.slane %v8299_v45, %v10252_v3  ;;  %v3730_v39 = vrot.slane %v8299_v45, %v10253_v35  ;;  %v3734_v2 = vrot.slane %v8299_v45, %v10254_v22 }
 0x557   : > { %v3738_v14 = vrot.slane %v8302_v9, %v10251_v59  ;;  %v3742_v43 = vrot.slane %v8302_v9, %v10252_v3  ;;  %v3746_v37 = vrot.slane %v8302_v9, %v10253_v35  ;;  %v3750_v15 = vrot.slane %v8302_v9, %v10254_v22 }
 0x558   : > { %v3754_v33 = vrot.slane %v8305_v13, %v10251_v59  ;;  %v8647_v63 = vpack.c.bf16 %v3678_v47, %v3674_v48  ;;  %v8655_v38 = vpack.c.bf16 %v3686_v32, %v3682_v50  ;;  %v8663_v29 = vpack.c.bf16 %v3694_v41, %v3690_v27 }
 0x559   : > { %v8671_v48 = vpack.c.bf16 %v3702_v24, %v3698_v21  ;;  %v8679_v56 = vpack.c.bf16 %v3710_v57, %v3706_v31  ;;  %v8687_v47 = vpack.c.bf16 %v3718_v10, %v3714_v40  ;;  %v8695_v12 = vpack.c.bf16 %v3726_v20, %v3722_v49 }
 0x55a   : > { %v8703_v50 = vpack.c.bf16 %v3734_v2, %v3730_v39  ;;  %v8711_v36 = vpack.c.bf16 %v3742_v43, %v3738_v14  ;;  %v8719_v32 = vpack.c.bf16 %v3750_v15, %v3746_v37  ;;  %v10255_v45 = vrot.slane %v8305_v13, %v10252_v3 }
 0x55b   : > { %v10256_v41 = vrot.slane %v8305_v13, %v10253_v35  ;;  %v10257_v21 = vrot.slane %v8305_v13, %v10254_v22  ;;  %v10258_v9 = vrot.slane %v8308_v53, %v10251_v59  ;;  %v10259_v31 = vrot.slane %v8308_v53, %v10252_v3 }
 0x55c   : > { %v8727_v27 = vpack.c.bf16 %v10255_v45, %v3754_v33  ;;  %v10260_v40 = vrot.slane %v8308_v53, %v10253_v35  ;;  %v10261_v10 = vrot.slane %v8308_v53, %v10254_v22  ;;  %v10262_v13 = vrot.slane %v8311_v5, %v10251_v59 }
 0x55d   : > { %v8735_v24 = vpack.c.bf16 %v10257_v21, %v10256_v41  ;;  %v8743_v57 = vpack.c.bf16 %v10259_v31, %v10258_v9  ;;  %v10263_v20 = vrot.slane %v8311_v5, %v10252_v3  ;;  %v10264_v2 = vrot.slane %v8311_v5, %v10253_v35 }
 0x55e   : > { %v8751_v49 = vpack.c.bf16 %v10261_v10, %v10260_v40  ;;  %v10265_v14 = vrot.slane %v8311_v5, %v10254_v22  ;;  %v10266_v53 = vrot.slane %v8314_v30, %v10251_v59  ;;  %v10267_v37 = vrot.slane %v8314_v30, %v10252_v3 }
 0x55f   : > { %v8759_v39 = vpack.c.bf16 %v10263_v20, %v10262_v13  ;;  %v10268_v33 = vrot.slane %v8314_v30, %v10253_v35  ;;  %v10269_v45 = vrot.slane %v8314_v30, %v10254_v22  ;;  %v10270_v5 = vrot.slane %v8317_v23, %v10251_v59 }
 0x560   : > { %v8767_v43 = vpack.c.bf16 %v10265_v14, %v10264_v2  ;;  %v8775_v15 = vpack.c.bf16 %v10267_v37, %v10266_v53  ;;  %v10271_v21 = vrot.slane %v8317_v23, %v10252_v3  ;;  %v10272_v31 = vrot.slane %v8317_v23, %v10253_v35 }
 0x561   : > { %v8783_v41 = vpack.c.bf16 %v10269_v45, %v10268_v33  ;;  %v10273_v40 = vrot.slane %v8317_v23, %v10254_v22  ;;  %v10274_v30 = vrot.slane %v8320_v18, %v10251_v59  ;;  %v10275_v13 = vrot.slane %v8320_v18, %v10252_v3 }
 0x562   : > { %v8791_v9 = vpack.c.bf16 %v10271_v21, %v10270_v5  ;;  %v10276_v2 = vrot.slane %v8320_v18, %v10253_v35  ;;  %v10277_v14 = vrot.slane %v8320_v18, %v10254_v22  ;;  %v10278_v23 = vrot.slane %v8323_v25, %v10251_v59 }
 0x563   : > { %v8799_v10 = vpack.c.bf16 %v10273_v40, %v10272_v31  ;;  %v8807_v20 = vpack.c.bf16 %v10275_v13, %v10274_v30  ;;  %v10279_v37 = vrot.slane %v8323_v25, %v10252_v3  ;;  %v10280_v45 = vrot.slane %v8323_v25, %v10253_v35 }
 0x564   : > { %v8815_v53 = vpack.c.bf16 %v10277_v14, %v10276_v2  ;;  %v10281_v5 = vrot.slane %v8323_v25, %v10254_v22  ;;  %v10282_v18 = vrot.slane %v8326_v61, %v10251_v59  ;;  %v10283_v31 = vrot.slane %v8326_v61, %v10252_v3 }
 0x565   : > { %v8823_v33 = vpack.c.bf16 %v10279_v37, %v10278_v23  ;;  %v10284_v30 = vrot.slane %v8326_v61, %v10253_v35  ;;  %v10285_v13 = vrot.slane %v8326_v61, %v10254_v22  ;;  %v10286_v25 = vrot.slane %v8329_v8, %v10251_v59 }
 0x566   : > { %v8831_v21 = vpack.c.bf16 %v10281_v5, %v10280_v45  ;;  %v8839_v40 = vpack.c.bf16 %v10283_v31, %v10282_v18  ;;  %v10287_v14 = vrot.slane %v8329_v8, %v10252_v3  ;;  %v10288_v37 = vrot.slane %v8329_v8, %v10253_v35 }
 0x567   : > { %v8847_v2 = vpack.c.bf16 %v10285_v13, %v10284_v30  ;;  %v10289_v45 = vrot.slane %v8329_v8, %v10254_v22  ;;  %v10290_v61 = vrot.slane %v8332_v52, %v10251_v59  ;;  %v10291_v18 = vrot.slane %v8332_v52, %v10252_v3 }
 0x568   : > { %v8855_v23 = vpack.c.bf16 %v10287_v14, %v10286_v25  ;;  %v10292_v30 = vrot.slane %v8332_v52, %v10253_v35  ;;  %v10293_v13 = vrot.slane %v8332_v52, %v10254_v22  ;;  %v10294_v8 = vrot.slane %v8335_v34, %v10251_v59 }
 0x569   : > { %v8863_v5 = vpack.c.bf16 %v10289_v45, %v10288_v37  ;;  %v8871_v31 = vpack.c.bf16 %v10291_v18, %v10290_v61  ;;  %v10295_v14 = vrot.slane %v8335_v34, %v10252_v3  ;;  %v10296_v45 = vrot.slane %v8335_v34, %v10253_v35 }
 0x56a   : > { %v8879_v25 = vpack.c.bf16 %v10293_v13, %v10292_v30  ;;  %v10297_v61 = vrot.slane %v8335_v34, %v10254_v22  ;;  %v10298_v52 = vrot.slane %v8338_v54, %v10251_v59  ;;  %v10299_v30 = vrot.slane %v8338_v54, %v10252_v3 }
 0x56b   : > { %v8887_v37 = vpack.c.bf16 %v10295_v14, %v10294_v8  ;;  %v10300_v8 = vrot.slane %v8338_v54, %v10253_v35  ;;  %v10301_v14 = vrot.slane %v8338_v54, %v10254_v22  ;;  %v10303_v34 = vrot.slane %v8341_v16, %v10251_v59 }
 0x56c   : > { %v8895_v18 = vpack.c.bf16 %v10297_v61, %v10296_v45  ;;  %v8903_v13 = vpack.c.bf16 %v10299_v30, %v10298_v52  ;;  %v10304_v45 = vrot.slane %v8341_v16, %v10252_v3  ;;  %v10305_v52 = vrot.slane %v8341_v16, %v10253_v35 }
 0x56d   : > { %v8911_v44 = vpack.c.bf16 %v10301_v14, %v10300_v8  ;;  %v10306_v30 = vrot.slane %v8341_v16, %v10254_v22  ;;  %v10307_v54 = vrot.slane %v8344_v42, %v10251_v59  ;;  %v10308_v8 = vrot.slane %v8344_v42, %v10252_v3 }
 0x56e   : > { %v8919_v61 = vpack.c.bf16 %v10304_v45, %v10303_v34  ;;  %v10309_v34 = vrot.slane %v8344_v42, %v10253_v35  ;;  %v10310_v45 = vrot.slane %v8344_v42, %v10254_v22  ;;  %v10312_v16 = vrot.slane %v8347_v28, %v10251_v59 }
 0x56f   : > { %10302 = vst [vmem:[#allocation41_spill] sm:$0xff] %v8911_v44  ;;  %v8927_v46 = vpack.c.bf16 %v10306_v30, %v10305_v52  ;;  %v8935_v14 = vpack.c.bf16 %v10308_v8, %v10307_v54  ;;  %v10313_v52 = vrot.slane %v8347_v28, %v10252_v3  ;;  %v10315_v54 = vrot.slane %v8347_v28, %v10253_v35 }
 0x570   : > { %v8943_v11 = vpack.c.bf16 %v10310_v45, %v10309_v34  ;;  %v10316_v8 = vrot.slane %v8347_v28, %v10254_v22  ;;  %v10318_v42 = vrot.slane %v8350_v0, %v10251_v59  ;;  %v10319_v34 = vrot.slane %v8350_v0, %v10252_v3 }
 0x571   : > { %v8951_v30 = vpack.c.bf16 %v10313_v52, %v10312_v16  ;;  %v10321_v16 = vrot.slane %v8350_v0, %v10253_v35  ;;  %v10322_v52 = vrot.slane %v8350_v0, %v10254_v22  ;;  %v10324_v28 = vrot.slane %v8353_v4, %v10251_v59 }
 0x572   : > { %10311 = vst [vmem:[#allocation51_spill] sm:$0xff] %v8943_v11  ;;  %v8959_v19 = vpack.c.bf16 %v10316_v8, %v10315_v54  ;;  %v8967_v45 = vpack.c.bf16 %v10319_v34, %v10318_v42  ;;  %v10325_v54 = vrot.slane %v8353_v4, %v10252_v3  ;;  %v10327_v42 = vrot.slane %v8353_v4, %v10253_v35 }
 0x573   : > { %10314 = vst [vmem:[#allocation53_spill] sm:$0xff] %v8951_v30  ;;  %v8975_v30 = vpack.c.bf16 %v10322_v52, %v10321_v16  ;;  %v10328_v34 = vrot.slane %v8353_v4, %v10254_v22  ;;  %v10330_v0 = vrot.slane %v8356_v26, %v10251_v59  ;;  %v10331_v16 = vrot.slane %v8356_v26, %v10252_v3 }
 0x574   : > { %10317 = vst [vmem:[#allocation52_spill] sm:$0xff] %v8959_v19  ;;  %10320 = vst [vmem:[#allocation31_spill] sm:$0xff] %v8967_v45  ;;  %v8983_v8 = vpack.c.bf16 %v10325_v54, %v10324_v28  ;;  %v10333_v28 = vrot.slane %v8356_v26, %v10253_v35  ;;  %v10334_v54 = vrot.slane %v8356_v26, %v10254_v22 }
 0x575   : > { %10323 = vst [vmem:[#allocation50_spill] sm:$0xff] %v8975_v30  ;;  %v8991_v45 = vpack.c.bf16 %v10328_v34, %v10327_v42  ;;  %v8999_v52 = vpack.c.bf16 %v10331_v16, %v10330_v0  ;;  %v10336_v4 = vrot.slane %v8359_v7, %v10251_v59  ;;  %v10337_v42 = vrot.slane %v8359_v7, %v10252_v3 }
 0x576   : > { %10326 = vst [vmem:[#allocation34_spill] sm:$0xff] %v8983_v8  ;;  %v9007_v8 = vpack.c.bf16 %v10334_v54, %v10333_v28  ;;  %v10339_v0 = vrot.slane %v8359_v7, %v10253_v35  ;;  %v10340_v16 = vrot.slane %v8359_v7, %v10254_v22  ;;  %v10341_v26 = vrot.slane %v8362_v60, %v10251_v59 }
 0x577   : > { %10329 = vst [vmem:[#allocation30_spill] sm:$0xff] %v8991_v45  ;;  %10332 = vst [vmem:[#allocation33_spill] sm:$0xff] %v8999_v52  ;;  %v9015_v34 = vpack.c.bf16 %v10337_v42, %v10336_v4  ;;  %v10342_v28 = vrot.slane %v8362_v60, %v10252_v3  ;;  %v10344_v4 = vrot.slane %v8362_v60, %v10253_v35 }
 0x578   : > { %10335 = vst [vmem:[#allocation35_spill] sm:$0xff] %v9007_v8  ;;  %v9023_v52 = vpack.c.bf16 %v10340_v16, %v10339_v0  ;;  %v10345_v42 = vrot.slane %v8362_v60, %v10254_v22  ;;  %v10347_v7 = vrot.slane %v8365_v51, %v10251_v59  ;;  %v10348_v0 = vrot.slane %v8365_v51, %v10252_v3 }
 0x579   : > { %10338 = vst [vmem:[#allocation37_spill] sm:$0xff] %v9015_v34  ;;  %v9031_v54 = vpack.c.bf16 %v10342_v28, %v10341_v26  ;;  %v10350_v26 = vrot.slane %v8365_v51, %v10253_v35  ;;  %v10351_v28 = vrot.slane %v8365_v51, %v10254_v22  ;;  %v10353_v60 = vrot.slane %v8368_v17, %v10251_v59 }
 0x57a   : > { %v9039_v34 = vpack.c.bf16 %v10345_v42, %v10344_v4  ;;  %v9047_v16 = vpack.c.bf16 %v10348_v0, %v10347_v7  ;;  %v10354_v4 = vrot.slane %v8368_v17, %v10252_v3  ;;  %v10356_v7 = vrot.slane %v8368_v17, %v10253_v35 }
 0x57b   : > { %10343 = vst [vmem:[#allocation36_spill] sm:$0xff] %v9031_v54  ;;  %v9055_v54 = vpack.c.bf16 %v10351_v28, %v10350_v26  ;;  %v10357_v0 = vrot.slane %v8368_v17, %v10254_v22  ;;  %v10359_v51 = vrot.slane %v8371_v58, %v10251_v59  ;;  %v10360_v26 = vrot.slane %v8371_v58, %v10252_v3 }
 0x57c   : > { %10346 = vst [vmem:[#allocation38_spill] sm:$0xff] %v9039_v34  ;;  %10349 = vst [vmem:[#allocation42_spill] sm:$0xff] %v9047_v16  ;;  %v9063_v42 = vpack.c.bf16 %v10354_v4, %v10353_v60  ;;  %v10362_v60 = vrot.slane %v8371_v58, %v10253_v35  ;;  %v10363_v4 = vrot.slane %v8371_v58, %v10254_v22  ;;  %v10414_v34 = vunpack.c.h.b16 %v8743_v57 }
 0x57d   : > { %10352 = vst [vmem:[#allocation26_spill] sm:$0xff] %v9055_v54  ;;  %v9071_v16 = vpack.c.bf16 %v10357_v0, %v10356_v7  ;;  %v9079_v28 = vpack.c.bf16 %v10360_v26, %v10359_v51  ;;  %v10365_v17 = vrot.slane %v8374_v6, %v10251_v59  ;;  %v10366_v7 = vrot.slane %v8374_v6, %v10252_v3  ;;  %v10391_v44 = vld [vmem:[#allocation34_spill] sm:$0xff] }
 0x57e   : > { %10355 = vst [vmem:[#allocation46_spill] sm:$0xff] %v9063_v42  ;;  %v9087_v42 = vpack.c.bf16 %v10363_v4, %v10362_v60  ;;  %v10368_v51 = vrot.slane %v8374_v6, %v10253_v35  ;;  %v10369_v26 = vrot.slane %v8374_v6, %v10254_v22  ;;  %v10371_v58 = vrot.slane %v8377_v1, %v10251_v59  ;;  %v10392_v11 = vld [vmem:[#allocation33_spill] sm:$0xff] }
 0x57f   : > { %10358 = vst [vmem:[#allocation45_spill] sm:$0xff] %v9071_v16  ;;  %10361 = vst [vmem:[#allocation43_spill] sm:$0xff] %v9079_v28  ;;  %v9095_v0 = vpack.c.bf16 %v10366_v7, %v10365_v17  ;;  %v10372_v60 = vrot.slane %v8377_v1, %v10252_v3  ;;  %v10374_v17 = vrot.slane %v8377_v1, %v10253_v35  ;;  %v10413_v54 = vunpack.c.h.b16 %v8727_v27 }
 0x580   : > { %10364 = vst [vmem:[#allocation44_spill] sm:$0xff] %v9087_v42  ;;  %v9103_v28 = vpack.c.bf16 %v10369_v26, %v10368_v51  ;;  %v10375_v7 = vrot.slane %v8377_v1, %v10254_v22  ;;  %v10377_v6 = vrot.slane %v8380_v62, %v10251_v59  ;;  %v10378_v51 = vrot.slane %v8380_v62, %v10252_v3  ;;  %v10393_v19 = vld [vmem:[#allocation37_spill] sm:$0xff] }
 0x581   : > { %10367 = vst [vmem:[#allocation47_spill] sm:$0xff] %v9095_v0  ;;  %v9111_v4 = vpack.c.bf16 %v10372_v60, %v10371_v58  ;;  %v10380_v58 = vrot.slane %v8380_v62, %v10253_v35  ;;  %v10381_v60 = vrot.slane %v8380_v62, %v10254_v22  ;;  %v10383_v1 = vrot.slane %v8383_v55, %v10251_v59 }
 0x582   : > { %10370 = vst [vmem:[#allocation49_spill] sm:$0xff] %v9103_v28  ;;  %v9119_v0 = vpack.c.bf16 %v10375_v7, %v10374_v17  ;;  %v9127_v26 = vpack.c.bf16 %v10378_v51, %v10377_v6  ;;  %v10384_v17 = vrot.slane %v8383_v55, %v10252_v3  ;;  %v10386_v6 = vrot.slane %v8383_v55, %v10253_v35  ;;  %v10390_v3 = vld [vmem:[#allocation31_spill] sm:$0xff] }
 0x583   : > { %10373 = vst [vmem:[#allocation48_spill] sm:$0xff] %v9111_v4  ;;  %v9135_v4 = vpack.c.bf16 %v10381_v60, %v10380_v58  ;;  %v10387_v51 = vrot.slane %v8383_v55, %v10254_v22  ;;  %v10389_v55 = vld [vmem:[#allocation53_spill] sm:$0xff]  ;;  %v10395_v45 = vld [vmem:[#allocation42_spill] sm:$0xff]  ;;  %v10401_v62 = vunpack.c.l.b16 %v8663_v29  ;;  %v10402_v22 = vunpack.c.l.b16 %v8679_v56 }
 0x584   : > { %10376 = vst [vmem:[#allocation29_spill] sm:$0xff] %v9119_v0  ;;  %10379 = vst [vmem:[#allocation32_spill] sm:$0xff] %v9127_v26  ;;  %v9143_v7 = vpack.c.bf16 %v10384_v17, %v10383_v1  ;;  %v10403_v60 = vunpack.c.l.b16 %v8695_v12  ;;  %v10404_v59 = vunpack.c.l.b16 %v8711_v36  ;;  %v10405_v17 = vunpack.c.l.b16 %v8647_v63 }
 0x585   : > { %10382 = vst [vmem:[#allocation39_spill] sm:$0xff] %v9135_v4  ;;  %v9151_v26 = vpack.c.bf16 %v10387_v51, %v10386_v6  ;;  %v10396_v8 = vld [vmem:[#allocation46_spill] sm:$0xff]  ;;  %v4887_v28 = vrot.slane %v10401_v62, 7  ;;  %v4890_v6 = vrot.slane %v10402_v22, 6  ;;  %v10406_v1 = vunpack.c.l.b16 %v8727_v27 }
 0x586   : > { %10385 = vst [vmem:[#allocation40_spill] sm:$0xff] %v9143_v7  ;;  %v10397_v30 = vld [vmem:[#allocation43_spill] sm:$0xff]  ;;  %v4893_v51 = vrot.slane %v10403_v60, 5  ;;  %v4896_v58 = vrot.slane %v10404_v59, 4  ;;  %v10408_v60 = vunpack.c.l.b16 %v8759_v39  ;;  %v10409_v42 = vunpack.c.h.b16 %v8663_v29 }
 0x587   : > { %10388 = vst [vmem:[#allocation24_spill] sm:$0xff] %v9151_v26  ;;  %v4889_v35 = vsel %vm4888_vm3, %v4887_v28, %v10405_v17  ;;  %v4899_v62 = vrot.slane %v10406_v1, 3  ;;  %v10407_v26 = vunpack.c.l.b16 %v8743_v57  ;;  %v10410_v28 = vunpack.c.h.b16 %v8679_v56 }
 0x588   : > { %v4892_v4 = vsel %vm4891_vm4, %v4890_v6, %v4889_v35  ;;  %v4905_v0 = vrot.slane %v10408_v60, 1  ;;  %v4908_v7 = vrot.slane %v10409_v42, 7  ;;  %v10411_v1 = vunpack.c.h.b16 %v8695_v12 }
 0x589   : > { %v4902_v22 = vrot.slane %v10407_v26, 2  ;;  %v4895_v59 = vsel %vm4894_vm5, %v4893_v51, %v4892_v4  ;;  %v4910_v17 = vrot.slane %v10410_v28, 6  ;;  %v10412_v35 = vunpack.c.h.b16 %v8711_v36 }
 0x58a   : > { %v4912_v16 = vrot.slane %v10411_v1, 5  ;;  %v4898_v26 = vsel %vm4897_vm6, %v4896_v58, %v4895_v59  ;;  %v4916_v60 = vrot.slane %v10413_v54, 3  ;;  %v4918_v4 = vrot.slane %v10414_v34, 2 }
 0x58b   : > { %v4914_v6 = vrot.slane %v10412_v35, 4  ;;  %v4901_v29 = vsel %vm4900_vm7, %v4899_v62, %v4898_v26  ;;  %v10415_v42 = vunpack.c.h.b16 %v8647_v63  ;;  %v10416_v12 = vunpack.c.h.b16 %v8759_v39 }
 0x58c   : > { %v10417_v58 = vunpack.c.l.b16 %v8671_v48  ;;  %v4904_v36 = vsel %vm4903_vm8, %v4902_v22, %v4901_v29  ;;  %v10418_v54 = vunpack.c.l.b16 %v8687_v47  ;;  %v10419_v34 = vunpack.c.l.b16 %v8703_v50 }
 0x58d   : > { %v4909_v56 = vsel %vm4888_vm3, %v4908_v7, %v10415_v42  ;;  %v4920_v51 = vrot.slane %v10416_v12, 1  ;;  %v9328_v63 = vsel %vm4906_vm9, %v4905_v0, %v4904_v36  ;;  %v10420_v39 = vunpack.c.l.b16 %v8655_v38 }
 0x58e   : > { %v4922_v59 = vrot.slane %v10417_v58, 7  ;;  %v4911_v27 = vsel %vm4891_vm4, %v4910_v17, %v4909_v56  ;;  %v4924_v57 = vrot.slane %v10418_v54, 6  ;;  %v4926_v62 = vrot.slane %v10419_v34, 5 }
 0x58f   : > { %v4913_v7 = vsel %vm4894_vm5, %v4912_v16, %v4911_v27  ;;  %v10421_v1 = vunpack.c.l.b16 %v8719_v32  ;;  %v10422_v35 = vunpack.c.l.b16 %v8735_v24  ;;  %v10423_v42 = vunpack.c.l.b16 %v8751_v49 }
 0x590   : > { %v4923_v28 = vsel %vm4888_vm3, %v4922_v59, %v10420_v39  ;;  %v4915_v17 = vsel %vm4897_vm6, %v4914_v6, %v4913_v7  ;;  %v10424_v12 = vunpack.c.l.b16 %v8767_v43  ;;  %v10425_v59 = vunpack.c.h.b16 %v8671_v48 }
 0x591   : > { %v4928_v22 = vrot.slane %v10421_v1, 4  ;;  %v4925_v26 = vsel %vm4891_vm4, %v4924_v57, %v4923_v28  ;;  %v4930_v29 = vrot.slane %v10422_v35, 3  ;;  %v4932_v0 = vrot.slane %v10423_v42, 2 }
 0x592   : > { %v4917_v56 = vsel %vm4900_vm7, %v4916_v60, %v4915_v17  ;;  %v4927_v16 = vsel %vm4894_vm5, %v4926_v62, %v4925_v26  ;;  %v4934_v58 = vrot.slane %v10424_v12, 1  ;;  %v4936_v36 = vrot.slane %v10425_v59, 7 }
 0x593   : > { %v4919_v6 = vsel %vm4903_vm8, %v4918_v4, %v4917_v56  ;;  %v4929_v27 = vsel %vm4897_vm6, %v4928_v22, %v4927_v16  ;;  %v10426_v54 = vunpack.c.h.b16 %v8687_v47  ;;  %v10427_v34 = vunpack.c.h.b16 %v8703_v50 }
 0x594   : > { %v9355_v60 = vsel %vm4906_vm9, %v4920_v51, %v4919_v6  ;;  %v4931_v62 = vsel %vm4900_vm7, %v4930_v29, %v4929_v27  ;;  %v10428_v39 = vunpack.c.h.b16 %v8655_v38  ;;  %v10429_v28 = vunpack.c.h.b16 %v8719_v32 }
 0x595   : > { %v4938_v57 = vrot.slane %v10426_v54, 6  ;;  %v4940_v7 = vrot.slane %v10427_v34, 5  ;;  %v4933_v1 = vsel %vm4903_vm8, %v4932_v0, %v4931_v62  ;;  %v10430_v22 = vunpack.c.h.b16 %v8735_v24 }
 0x596   : > { %v4937_v48 = vsel %vm4888_vm3, %v4936_v36, %v10428_v39  ;;  %v4942_v4 = vrot.slane %v10429_v28, 4  ;;  %v10431_v17 = vunpack.c.h.b16 %v8751_v49  ;;  %v9370_v26 = vsel %vm4906_vm9, %v4934_v58, %v4933_v1 }
 0x597   : > { %v4939_v47 = vsel %vm4891_vm4, %v4938_v57, %v4937_v48  ;;  %v4944_v50 = vrot.slane %v10430_v22, 3  ;;  %v10432_v35 = vunpack.c.h.b16 %v8767_v43  ;;  %v10433_v32 = vunpack.c.l.b16 %v8791_v9 }
 0x598   : > { %v4946_v51 = vrot.slane %v10431_v17, 2  ;;  %v4941_v38 = vsel %vm4894_vm5, %v4940_v7, %v4939_v47  ;;  %v10434_v56 = vunpack.c.l.b16 %v8807_v20  ;;  %v10435_v16 = vunpack.c.l.b16 %v8823_v33 }
 0x599   : > { %v4948_v29 = vrot.slane %v10432_v35, 1  ;;  %v4950_v42 = vrot.slane %v10433_v32, 7  ;;  %v4943_v0 = vsel %vm4897_vm6, %v4942_v4, %v4941_v38  ;;  %v10436_v12 = vunpack.c.l.b16 %v8839_v40 }
 0x59a   : > { %v4952_v24 = vrot.slane %v10434_v56, 6  ;;  %v4954_v49 = vrot.slane %v10435_v16, 5  ;;  %v4945_v59 = vsel %vm4900_vm7, %v4944_v50, %v4943_v0  ;;  %v10437_v36 = vunpack.c.l.b16 %v8775_v15 }
 0x59b   : > { %v4956_v58 = vrot.slane %v10436_v12, 4  ;;  %v10438_v6 = vunpack.c.l.b16 %v8855_v23  ;;  %v10439_v54 = vunpack.c.l.b16 %v8871_v31  ;;  %v4947_v34 = vsel %vm4903_vm8, %v4946_v51, %v4945_v59 }
 0x59c   : > { %v4951_v43 = vsel %vm4888_vm3, %v4950_v42, %v10437_v36  ;;  %v10440_v62 = vunpack.c.l.b16 %v8887_v37  ;;  %v10441_v48 = vunpack.c.h.b16 %v8791_v9  ;;  %v9399_v4 = vsel %vm4906_vm9, %v4948_v29, %v4947_v34 }
 0x59d   : > { %v4958_v27 = vrot.slane %v10438_v6, 3  ;;  %v4960_v57 = vrot.slane %v10439_v54, 2  ;;  %v4953_v7 = vsel %vm4891_vm4, %v4952_v24, %v4951_v43  ;;  %v10442_v47 = vunpack.c.h.b16 %v8807_v20 }
 0x59e   : > { %v4962_v39 = vrot.slane %v10440_v62, 1  ;;  %v4964_v28 = vrot.slane %v10441_v48, 7  ;;  %v4955_v1 = vsel %vm4894_vm5, %v4954_v49, %v4953_v7  ;;  %v10443_v50 = vunpack.c.h.b16 %v8823_v33 }
 0x59f   : > { %v4966_v22 = vrot.slane %v10442_v47, 6  ;;  %v4957_v51 = vsel %vm4897_vm6, %v4956_v58, %v4955_v1  ;;  %v10444_v38 = vunpack.c.h.b16 %v8775_v15  ;;  %v10445_v9 = vunpack.c.h.b16 %v8839_v40 }
 0x5a0   : > { %v4968_v17 = vrot.slane %v10443_v50, 5  ;;  %v10446_v29 = vunpack.c.h.b16 %v8855_v23  ;;  %v4959_v0 = vsel %vm4900_vm7, %v4958_v27, %v4957_v51  ;;  %v10447_v56 = vunpack.c.h.b16 %v8871_v31 }
 0x5a1   : > { %v4965_v35 = vsel %vm4888_vm3, %v4964_v28, %v10444_v38  ;;  %v4970_v32 = vrot.slane %v10445_v9, 4  ;;  %v10448_v24 = vunpack.c.h.b16 %v8887_v37  ;;  %v4961_v15 = vsel %vm4903_vm8, %v4960_v57, %v4959_v0 }
 0x5a2   : > { %v4972_v42 = vrot.slane %v10446_v29, 3  ;;  %v4967_v20 = vsel %vm4891_vm4, %v4966_v22, %v4965_v35  ;;  %v4974_v33 = vrot.slane %v10447_v56, 2  ;;  %v10449_v40 = vunpack.c.l.b16 %v8799_v10 }
 0x5a3   : > { %v4976_v16 = vrot.slane %v10448_v24, 1  ;;  %v4969_v49 = vsel %vm4894_vm5, %v4968_v17, %v4967_v20  ;;  %v10450_v23 = vunpack.c.l.b16 %v8815_v53  ;;  %v9427_v59 = vsel %vm4906_vm9, %v4962_v39, %v4961_v15 }
 0x5a4   : > { %v4978_v12 = vrot.slane %v10449_v40, 7  ;;  %v4971_v36 = vsel %vm4897_vm6, %v4970_v32, %v4969_v49  ;;  %v10451_v31 = vunpack.c.l.b16 %v8831_v21  ;;  %v10452_v37 = vunpack.c.l.b16 %v8847_v2 }
 0x5a5   : > { %v4980_v58 = vrot.slane %v10450_v23, 6  ;;  %v4973_v27 = vsel %vm4900_vm7, %v4972_v42, %v4971_v36  ;;  %v10453_v54 = vunpack.c.l.b16 %v8783_v41  ;;  %v10454_v34 = vunpack.c.l.b16 %v8863_v5 }
 0x5a6   : > { %v4982_v43 = vrot.slane %v10451_v31, 5  ;;  %v4984_v6 = vrot.slane %v10452_v37, 4  ;;  %v10455_v62 = vunpack.c.l.b16 %v8879_v25  ;;  %v4975_v48 = vsel %vm4903_vm8, %v4974_v33, %v4973_v27 }
 0x5a7   : > { %v4979_v57 = vsel %vm4888_vm3, %v4978_v12, %v10453_v54  ;;  %v4986_v7 = vrot.slane %v10454_v34, 3  ;;  %v10456_v1 = vunpack.c.l.b16 %v8895_v18  ;;  %v10457_v22 = vunpack.c.h.b16 %v8799_v10 }
 0x5a8   : > { %v4988_v39 = vrot.slane %v10455_v62, 2  ;;  %v4981_v28 = vsel %vm4891_vm4, %v4980_v58, %v4979_v57  ;;  %v9449_v17 = vsel %vm4906_vm9, %v4976_v16, %v4975_v48  ;;  %v10458_v38 = vunpack.c.h.b16 %v8815_v53 }
 0x5a9   : > { %v4990_v47 = vrot.slane %v10456_v1, 1  ;;  %v4992_v50 = vrot.slane %v10457_v22, 7  ;;  %v4983_v51 = vsel %vm4894_vm5, %v4982_v43, %v4981_v28  ;;  %v10459_v9 = vunpack.c.h.b16 %v8831_v21 }
 0x5aa   : > { %v4994_v35 = vrot.slane %v10458_v38, 6  ;;  %v4985_v29 = vsel %vm4897_vm6, %v4984_v6, %v4983_v51  ;;  %v10460_v42 = vunpack.c.h.b16 %v8783_v41  ;;  %v10461_v10 = vunpack.c.h.b16 %v8847_v2 }
 0x5ab   : > { %v4996_v32 = vrot.slane %v10459_v9, 5  ;;  %v10462_v56 = vunpack.c.h.b16 %v8863_v5  ;;  %v4987_v24 = vsel %vm4900_vm7, %v4986_v7, %v4985_v29  ;;  %v10463_v16 = vunpack.c.h.b16 %v8879_v25 }
 0x5ac   : > { %v4993_v0 = vsel %vm4888_vm3, %v4992_v50, %v10460_v42  ;;  %v4998_v20 = vrot.slane %v10461_v10, 4  ;;  %v10464_v15 = vunpack.c.h.b16 %v8895_v18  ;;  %v4989_v41 = vsel %vm4903_vm8, %v4988_v39, %v4987_v24 }
 0x5ad   : > { %v5000_v33 = vrot.slane %v10462_v56, 3  ;;  %v4995_v53 = vsel %vm4891_vm4, %v4994_v35, %v4993_v0  ;;  %v5002_v21 = vrot.slane %v10463_v16, 2  ;;  %v10465_v2 = vunpack.c.l.b16 %v8919_v61 }
 0x5ae   : > { %v5004_v49 = vrot.slane %v10464_v15, 1  ;;  %v4997_v40 = vsel %vm4894_vm5, %v4996_v32, %v4995_v53  ;;  %v10466_v5 = vunpack.c.l.b16 %v8935_v14  ;;  %v9477_v58 = vsel %vm4906_vm9, %v4990_v47, %v4989_v41  ;;  %v10482_v15 = vld [vmem:[#allocation51_spill] sm:$0xff] }
 0x5af   : > { %v5006_v12 = vrot.slane %v10465_v2, 7  ;;  %v4999_v36 = vsel %vm4897_vm6, %v4998_v20, %v4997_v40  ;;  %v10467_v25 = vunpack.c.l.b16 %v10389_v55  ;;  %v10468_v18 = vunpack.c.l.b16 %v10390_v3 }
 0x5b0   : > { %v5008_v23 = vrot.slane %v10466_v5, 6  ;;  %v5001_v37 = vsel %vm4900_vm7, %v5000_v33, %v4999_v36  ;;  %v10469_v6 = vunpack.c.l.b16 %v8903_v13  ;;  %v10470_v54 = vunpack.c.l.b16 %v10391_v44 }
 0x5b1   : > { %v5010_v31 = vrot.slane %v10467_v25, 5  ;;  %v5012_v43 = vrot.slane %v10468_v18, 4  ;;  %v10471_v34 = vunpack.c.l.b16 %v10392_v11  ;;  %v5003_v62 = vsel %vm4903_vm8, %v5002_v21, %v5001_v37  ;;  %v10488_v25 = vld [vmem:[#allocation41_spill] sm:$0xff] }
 0x5b2   : > { %v5007_v27 = vsel %vm4888_vm3, %v5006_v12, %v10469_v6  ;;  %v5014_v57 = vrot.slane %v10470_v54, 3  ;;  %v10472_v48 = vunpack.c.l.b16 %v10393_v19  ;;  %v10473_v1 = vunpack.c.h.b16 %v8919_v61 }
 0x5b3   : > { %v5016_v7 = vrot.slane %v10471_v34, 2  ;;  %v5009_v39 = vsel %vm4891_vm4, %v5008_v23, %v5007_v27  ;;  %v9499_v22 = vsel %vm4906_vm9, %v5004_v49, %v5003_v62  ;;  %v10474_v51 = vunpack.c.h.b16 %v8935_v14  ;;  %v10492_v27 = vld [vmem:[#allocation35_spill] sm:$0xff] }
 0x5b4   : > { %v5018_v28 = vrot.slane %v10472_v48, 1  ;;  %v5020_v47 = vrot.slane %v10473_v1, 7  ;;  %v5011_v50 = vsel %vm4894_vm5, %v5010_v31, %v5009_v39  ;;  %v10475_v35 = vunpack.c.h.b16 %v10389_v55 }
 0x5b5   : > { %v5022_v38 = vrot.slane %v10474_v51, 6  ;;  %v5013_v32 = vsel %vm4897_vm6, %v5012_v43, %v5011_v50  ;;  %v10476_v29 = vunpack.c.h.b16 %v8903_v13  ;;  %v10477_v61 = vunpack.c.h.b16 %v10390_v3  ;;  %v10490_v43 = vld [vmem:[#allocation30_spill] sm:$0xff] }
 0x5b6   : > { %v5024_v9 = vrot.slane %v10475_v35, 5  ;;  %v10478_v10 = vunpack.c.h.b16 %v10391_v44  ;;  %v5015_v56 = vsel %vm4900_vm7, %v5014_v57, %v5013_v32  ;;  %v10479_v33 = vunpack.c.h.b16 %v10392_v11  ;;  %v10484_v11 = vld [vmem:[#allocation52_spill] sm:$0xff] }
 0x5b7   : > { %v5021_v42 = vsel %vm4888_vm3, %v5020_v47, %v10476_v29  ;;  %v5026_v0 = vrot.slane %v10477_v61, 4  ;;  %v10480_v24 = vunpack.c.h.b16 %v10393_v19  ;;  %v5017_v13 = vsel %vm4903_vm8, %v5016_v7, %v5015_v56  ;;  %v10486_v19 = vld [vmem:[#allocation50_spill] sm:$0xff] }
 0x5b8   : > { %v5028_v20 = vrot.slane %v10478_v10, 3  ;;  %v5023_v14 = vsel %vm4891_vm4, %v5022_v38, %v5021_v42  ;;  %v5030_v55 = vrot.slane %v10479_v33, 2  ;;  %v10481_v3 = vunpack.c.l.b16 %v8927_v46 }
 0x5b9   : > { %v5032_v53 = vrot.slane %v10480_v24, 1  ;;  %v5025_v16 = vsel %vm4894_vm5, %v5024_v9, %v5023_v14  ;;  %v10483_v44 = vunpack.c.l.b16 %v10482_v15  ;;  %v9527_v41 = vsel %vm4906_vm9, %v5018_v28, %v5017_v13 }
 0x5ba   : > { %v5034_v21 = vrot.slane %v10481_v3, 7  ;;  %v5027_v40 = vsel %vm4897_vm6, %v5026_v0, %v5025_v16  ;;  %v10485_v2 = vunpack.c.l.b16 %v10484_v11  ;;  %v10487_v5 = vunpack.c.l.b16 %v10486_v19 }
 0x5bb   : > { %v5036_v49 = vrot.slane %v10483_v44, 6  ;;  %v5029_v36 = vsel %vm4900_vm7, %v5028_v20, %v5027_v40  ;;  %v10489_v31 = vunpack.c.l.b16 %v10488_v25  ;;  %v10491_v37 = vunpack.c.l.b16 %v10490_v43 }
 0x5bc   : > { %v5038_v12 = vrot.slane %v10485_v2, 5  ;;  %v5040_v23 = vrot.slane %v10487_v5, 4  ;;  %v10493_v54 = vunpack.c.l.b16 %v10492_v27  ;;  %v5031_v34 = vsel %vm4903_vm8, %v5030_v55, %v5029_v36  ;;  %v10510_v36 = vld [vmem:[#allocation48_spill] sm:$0xff] }
 0x5bd   : > { %v5035_v18 = vsel %vm4888_vm3, %v5034_v21, %v10489_v31  ;;  %v5042_v6 = vrot.slane %v10491_v37, 3  ;;  %v10494_v62 = vunpack.c.l.b16 %v9023_v52  ;;  %v10495_v48 = vunpack.c.h.b16 %v8927_v46 }
 0x5be   : > { %v5044_v57 = vrot.slane %v10493_v54, 2  ;;  %v5037_v7 = vsel %vm4891_vm4, %v5036_v49, %v5035_v18  ;;  %v9549_v1 = vsel %vm4906_vm9, %v5032_v53, %v5031_v34  ;;  %v10496_v50 = vunpack.c.h.b16 %v10482_v15  ;;  %v10512_v18 = vld [vmem:[#allocation32_spill] sm:$0xff] }
 0x5bf   : > { %v5046_v39 = vrot.slane %v10494_v62, 1  ;;  %v5048_v28 = vrot.slane %v10495_v48, 7  ;;  %v5039_v47 = vsel %vm4894_vm5, %v5038_v12, %v5037_v7  ;;  %v10497_v38 = vunpack.c.h.b16 %v10484_v11  ;;  %v10514_v54 = vld [vmem:[#allocation40_spill] sm:$0xff] }
 0x5c0   : > { %v5050_v51 = vrot.slane %v10496_v50, 6  ;;  %v5041_v9 = vsel %vm4897_vm6, %v5040_v23, %v5039_v47  ;;  %v10498_v32 = vunpack.c.h.b16 %v10488_v25  ;;  %v10499_v46 = vunpack.c.h.b16 %v10486_v19  ;;  %v10508_v19 = vld [vmem:[#allocation36_spill] sm:$0xff] }
 0x5c1   : > { %v5052_v35 = vrot.slane %v10497_v38, 5  ;;  %v10500_v61 = vunpack.c.h.b16 %v10490_v43  ;;  %v5043_v10 = vsel %vm4900_vm7, %v5042_v6, %v5041_v9  ;;  %v10501_v56 = vunpack.c.h.b16 %v10492_v27 }
 0x5c2   : > { %v5049_v29 = vsel %vm4888_vm3, %v5048_v28, %v10498_v32  ;;  %v5054_v42 = vrot.slane %v10499_v46, 4  ;;  %v10502_v33 = vunpack.c.h.b16 %v9023_v52  ;;  %v5045_v24 = vsel %vm4903_vm8, %v5044_v57, %v5043_v10  ;;  %v10506_v52 = vld [vmem:[#allocation47_spill] sm:$0xff] }
 0x5c3   : > { %v5056_v0 = vrot.slane %v10500_v61, 3  ;;  %v5051_v20 = vsel %vm4891_vm4, %v5050_v51, %v5049_v29  ;;  %v5058_v14 = vrot.slane %v10501_v56, 2  ;;  %v10503_v13 = vunpack.c.l.b16 %v10395_v45 }
 0x5c4   : > { %v5060_v55 = vrot.slane %v10502_v33, 1  ;;  %v5053_v53 = vsel %vm4894_vm5, %v5052_v35, %v5051_v20  ;;  %v10504_v3 = vunpack.c.l.b16 %v10396_v8  ;;  %v9577_v15 = vsel %vm4906_vm9, %v5046_v39, %v5045_v24  ;;  %v10527_v24 = vld [vmem:[#allocation45_spill] sm:$0xff] }
 0x5c5   : > { %v5062_v16 = vrot.slane %v10503_v13, 7  ;;  %v5055_v44 = vsel %vm4897_vm6, %v5054_v42, %v5053_v53  ;;  %v10505_v49 = vunpack.c.l.b16 %v10397_v30  ;;  %v10507_v11 = vunpack.c.l.b16 %v10506_v52 }
 0x5c6   : > { %v5064_v21 = vrot.slane %v10504_v3, 6  ;;  %v5057_v12 = vsel %vm4900_vm7, %v5056_v0, %v5055_v44  ;;  %v10509_v5 = vunpack.c.l.b16 %v10508_v19  ;;  %v10511_v25 = vunpack.c.l.b16 %v10510_v36 }
 0x5c7   : > { %v5066_v40 = vrot.slane %v10505_v49, 5  ;;  %v5068_v2 = vrot.slane %v10507_v11, 4  ;;  %v10513_v43 = vunpack.c.l.b16 %v10512_v18  ;;  %v5059_v6 = vsel %vm4903_vm8, %v5058_v14, %v5057_v12  ;;  %v10525_v14 = vld [vmem:[#allocation26_spill] sm:$0xff] }
 0x5c8   : > { %v5063_v23 = vsel %vm4888_vm3, %v5062_v16, %v10509_v5  ;;  %v5070_v31 = vrot.slane %v10511_v25, 3  ;;  %v10515_v57 = vunpack.c.l.b16 %v10514_v54  ;;  %v10516_v7 = vunpack.c.h.b16 %v10395_v45  ;;  %v10533_v12 = vld [vmem:[#allocation38_spill] sm:$0xff] }
 0x5c9   : > { %v5072_v37 = vrot.slane %v10513_v43, 2  ;;  %v5065_v27 = vsel %vm4891_vm4, %v5064_v21, %v5063_v23  ;;  %v9599_v39 = vsel %vm4906_vm9, %v5060_v55, %v5059_v6  ;;  %v10517_v28 = vunpack.c.h.b16 %v10396_v8  ;;  %v10529_v21 = vld [vmem:[#allocation44_spill] sm:$0xff]  ;;  %v10535_v23 = vld [vmem:[#allocation29_spill] sm:$0xff] }
 0x5ca   : > { %v5074_v34 = vrot.slane %v10515_v57, 1  ;;  %v5076_v62 = vrot.slane %v10516_v7, 7  ;;  %v5067_v48 = vsel %vm4894_vm5, %v5066_v40, %v5065_v27  ;;  %v10518_v50 = vunpack.c.h.b16 %v10397_v30  ;;  %v10531_v40 = vld [vmem:[#allocation49_spill] sm:$0xff]  ;;  %v10539_v27 = vld [vmem:[#allocation24_spill] sm:$0xff] }
 0x5cb   : > { %v5078_v47 = vrot.slane %v10517_v28, 6  ;;  %v5069_v38 = vsel %vm4897_vm6, %v5068_v2, %v5067_v48  ;;  %v10519_v35 = vunpack.c.h.b16 %v10508_v19  ;;  %v10520_v45 = vunpack.c.h.b16 %v10506_v52 }
 0x5cc   : > { %v5080_v51 = vrot.slane %v10518_v50, 5  ;;  %v10521_v29 = vunpack.c.h.b16 %v10510_v36  ;;  %v5071_v42 = vsel %vm4900_vm7, %v5070_v31, %v5069_v38  ;;  %v10522_v30 = vunpack.c.h.b16 %v10512_v18  ;;  %v10537_v31 = vld [vmem:[#allocation39_spill] sm:$0xff] }
 0x5cd   : > { %v5077_v9 = vsel %vm4888_vm3, %v5076_v62, %v10519_v35  ;;  %v5082_v32 = vrot.slane %v10520_v45, 4  ;;  %v10524_v0 = vunpack.c.h.b16 %v10514_v54  ;;  %v5073_v20 = vsel %vm4903_vm8, %v5072_v37, %v5071_v42 }
 0x5ce   : > { %v5084_v46 = vrot.slane %v10521_v29, 3  ;;  %v5079_v8 = vsel %vm4891_vm4, %v5078_v47, %v5077_v9  ;;  %v5086_v61 = vrot.slane %v10522_v30, 2  ;;  %v10526_v33 = vunpack.c.l.b16 %v10525_v14 }
 0x5cf   : > { %v5088_v10 = vrot.slane %v10524_v0, 1  ;;  %v5081_v56 = vsel %vm4894_vm5, %v5080_v51, %v5079_v8  ;;  %v10528_v53 = vunpack.c.l.b16 %v10527_v24  ;;  %v5075_v16 = vsel %vm4906_vm9, %v5074_v34, %v5073_v20 }
 0x5d0   : > { %v5090_v55 = vrot.slane %v10526_v33, 7  ;;  %v5083_v3 = vsel %vm4897_vm6, %v5082_v32, %v5081_v56  ;;  %v10530_v44 = vunpack.c.l.b16 %v10529_v21  ;;  %v10532_v52 = vunpack.c.l.b16 %v10531_v40 }
 0x5d1   : > { %v5092_v13 = vrot.slane %v10528_v53, 6  ;;  %v5085_v2 = vsel %vm4900_vm7, %v5084_v46, %v5083_v3  ;;  %v10534_v19 = vunpack.c.l.b16 %v10533_v12  ;;  %v10536_v36 = vunpack.c.l.b16 %v10535_v23 }
 0x5d2   : > { %v5094_v49 = vrot.slane %v10530_v44, 5  ;;  %v5096_v11 = vrot.slane %v10532_v52, 4  ;;  %v10538_v18 = vunpack.c.l.b16 %v10537_v31  ;;  %v5087_v37 = vsel %vm4903_vm8, %v5086_v61, %v5085_v2 }
 0x5d3   : > { %v5091_v5 = vsel %vm4888_vm3, %v5090_v55, %v10534_v19  ;;  %v5098_v25 = vrot.slane %v10536_v36, 3  ;;  %v10540_v54 = vunpack.c.l.b16 %v10539_v27  ;;  %v10541_v34 = vunpack.c.h.b16 %v10525_v14 }
 0x5d4   : > { %v5100_v43 = vrot.slane %v10538_v18, 2  ;;  %v5093_v6 = vsel %vm4891_vm4, %v5092_v13, %v5091_v5  ;;  %v5089_v62 = vsel %vm4906_vm9, %v5088_v10, %v5087_v37  ;;  %v10542_v28 = vunpack.c.h.b16 %v10527_v24 }
 0x5d5   : > { %v5102_v57 = vrot.slane %v10540_v54, 1  ;;  %v5104_v7 = vrot.slane %v10541_v34, 7  ;;  %v5095_v48 = vsel %vm4894_vm5, %v5094_v49, %v5093_v6  ;;  %v10543_v50 = vunpack.c.h.b16 %v10529_v21 }
 0x5d6   : > { %v5106_v47 = vrot.slane %v10542_v28, 6  ;;  %v5097_v38 = vsel %vm4897_vm6, %v5096_v11, %v5095_v48  ;;  %v10544_v35 = vunpack.c.h.b16 %v10533_v12  ;;  %v10545_v45 = vunpack.c.h.b16 %v10531_v40 }
 0x5d7   : > { %v5108_v51 = vrot.slane %v10543_v50, 5  ;;  %v10546_v29 = vunpack.c.h.b16 %v10535_v23  ;;  %v5099_v42 = vsel %vm4900_vm7, %v5098_v25, %v5097_v38  ;;  %v10547_v30 = vunpack.c.h.b16 %v10537_v31 }
 0x5d8   : > { %v5105_v9 = vsel %vm4888_vm3, %v5104_v7, %v10544_v35  ;;  %v5110_v32 = vrot.slane %v10545_v45, 4  ;;  %v10548_v0 = vunpack.c.h.b16 %v10539_v27  ;;  %v5101_v20 = vsel %vm4903_vm8, %v5100_v43, %v5099_v42 }
 0x5d9   : > { %v5112_v46 = vrot.slane %v10546_v29, 3  ;;  %v5107_v8 = vsel %vm4891_vm4, %v5106_v47, %v5105_v9  ;;  %v5114_v61 = vrot.slane %v10547_v30, 2  ;;  %v5118_v14 = vpack.c.b16 %v9355_v60, %v9328_v63 }
 0x5da   : > { %v5116_v10 = vrot.slane %v10548_v0, 1  ;;  %v5109_v56 = vsel %vm4894_vm5, %v5108_v51, %v5107_v8  ;;  %v5119_v33 = vpack.c.b16 %v9399_v4, %v9370_v26  ;;  %v5103_v55 = vsel %vm4906_vm9, %v5102_v57, %v5101_v20 }
 0x5db   : > { %v5111_v24 = vsel %vm4897_vm6, %v5110_v32, %v5109_v56  ;;  %v5120_v53 = vpack.c.b16 %v9449_v17, %v9427_v59  ;;  %v5121_v13 = vpack.c.b16 %v9499_v22, %v9477_v58  ;;  %v5122_v60 = vpack.c.b16 %v9549_v1, %v9527_v41  ;;  %5134 = vst [vmem:[%s6615_s3] sm:$0xff] %v5118_v14 }
 0x5dc   : > { %v5113_v63 = vsel %vm4900_vm7, %v5112_v46, %v5111_v24  ;;  %v5123_v26 = vpack.c.b16 %v9599_v39, %v9577_v15  ;;  %v5124_v4 = vpack.c.b16 %v5089_v62, %v5075_v16  ;;  %5135 = vst [vmem:[%s6615_s3 + $0x8] sm:$0xff] %v5119_v33 }
 0x5dd   : > { %v5115_v59 = vsel %vm4903_vm8, %v5114_v61, %v5113_v63  ;;  %5136 = vst [vmem:[%s6615_s3 + $0x10] sm:$0xff] %v5120_v53  ;;  %5137 = vst [vmem:[%s6615_s3 + $0x18] sm:$0xff] %v5121_v13 }
 0x5de   : > { %v5117_v17 = vsel %vm4906_vm9, %v5116_v10, %v5115_v59  ;;  %5138 = vst [vmem:[%s6615_s3 + $0x20] sm:$0xff] %v5122_v60  ;;  %5139 = vst [vmem:[%s6615_s3 + $0x28] sm:$0xff] %v5123_v26 }
 0x5df   : > { %5140 = vst [vmem:[%s6615_s3 + $0x30] sm:$0xff] %v5124_v4  ;;  %v5125_v58 = vpack.c.b16 %v5117_v17, %v5103_v55 }
 0x5e1   : > { %5141 = vst [vmem:[%s6615_s3 + $0x38] sm:$0xff] %v5125_v58 }
 0x5e2   : > { %6127 = shalt.err (!%p6124_p4)
}
 0x5e3   : > { %s6128_s3 = scalar_lea.hbm %s9701_s11, 1024  ;;  %s6132_s18 = scalar_lea.hbm %s10549_s15, 4096 }
 0x5e4   : > { %p6129_p9 = scmp.ne.s32.totalorder %s9701_s11, %s6128_s3  ;;  %p6133_p5 = scmp.lt.u32.totalorder %s9701_s11, %s10549_s15 }
 0x5e5   : > { %p6134_p0 = scmp.lt.u32.totalorder %s6132_s18, %s6128_s3  ;;  %p6136_p3 = scmp.lt.u32.totalorder %s6128_s3, %s9701_s11 }
 0x5e6   : > { %p6130_p1 = pnand %p6129_p9, %p10550_p11 }
 0x5e7   : > { %p6135_p2 = por %p6134_p0, %p6133_p5 }
 0x5e8   : > { %p6131_p10 = pneg %p6130_p1 }
 0x5e9   : > { %p6137_p7 = por %p6136_p3, %p6135_p2 }
 0x5eb   : > { %p6138_p12 = pnand %p6137_p7, %p6131_p10 }
 0x5ed   : > { %6141 = shalt.err (!%p6138_p12)
}
 0x5ee   : > { %s6265_s27 = smov 256   ;;  %s6266_s14 = smov 16  }
 0x5ef   : > { %5651 = dma.vmem_to_hbm [thread:$0]  (%p10550_p11), %s9703_s17, 1024, %s9701_s11, %s5143_s29, %s6265_s27, %s6265_s27, %s6266_s14  }
 0x5f0 PF: > { %p5676_p13 = scmp.ge.s32.totalorder %s6248_s7, 2  ;;  %s5174_s10 = sand.u32 1, %s6220_s24  }
 0x5f1   : > { %p10551_p6 = scmp.ne.s32.totalorder %s9932_s21, 0  ;;  %s5175_s2 = scalar_lea.sflag [#allocation6], %s5174_s10 }
 0x5f3   : > { %p5668_p8 = pnand %p5676_p13, %p10551_p6 }
 0x5f5   : > { %6203 = dma.done.wait (!%p5668_p8), %s5175_s2, 1024  }
 0x5f6   : > { %6205 = vsyncadd (!%p5668_p8), %s5175_s2, 4294966272  ;;  %s26_s7 = sadd.s32 1, %s6248_s7   ;;  %s10552_s20 = sld [smem:[#allocation22_spill]] }
 0x5f7   : > { %p23_p4 = scmp.ge.s32.totalorder %s26_s7, 6   ;;  %s10553_s6 = sld [smem:[#allocation23_spill]] }
 0x5f8   : > { %s10554_s27 = sld [smem:[#allocation19_spill]]  ;;  %s10555_s29 = sld [smem:[#allocation20_spill]] }
 0x5f9   : > { %s10556_s13 = sld [smem:[#allocation21_spill]]  ;;  %s10557_s21 = smov %s6212_s22 }
 0x5fa   : > { %s10558_s22 = smov %s6216_s23  ;;  %s10560_s24 = smov %s6224_s25 }
 0x5fb   : > { %s10561_s25 = smov %s6228_s26  ;;  %s10563_s28 = smov %s6244_s30 }
 0x5fc   : > { %s10559_s23 = smov %s10552_s20  ;;  %25 = sbr.rel (!%p23_p4) target bundleno = 17 (0x11), region = 142 }
 0x5fd   : > { %s10562_s26 = smov %s10553_s6 }
 0x5ff   : > { %s10564_s30 = smov %s10556_s13 }
 0x603   :  { %5180 = vsyncpa [#allocation5], 1 }
 0x604   :  { %5182 = vsyncpa [#allocation5 + $0x1], 1 }
 0x605   :  { %5183 = vsyncpa [#allocation8], 1 }
 0x606   :  { %5185 = vsyncpa [#allocation8 + $0x1], 1 }
 0x607   :  { %5186 = vsyncpa [#allocation11], 1 }
 0x608   :  { %5187 = vsyncpa [#allocation6], 1 }
 0x609   :  { %5189 = vsyncpa [#allocation6 + $0x1], 1 }

</bundles_post_ra>
